<compile_context>
chip_gen: v6e
topology: v6e:2x2x1
jax: 0.10.0
libtpu: 0.0.40
codegen_flags: <defaults>
</compile_context>

<pallas_src>
from typing import NamedTuple

import jax
import jax.numpy as jnp
from jax.experimental import pallas as pl
from jax.experimental.pallas import tpu as pltpu


def _round_up(n, m):
    return ((n + m - 1) // m) * m


def _pad2(a, rows, cols):
    r, c = a.shape
    if r == rows and c == cols:
        return a
    return jnp.pad(a, ((0, rows - r), (0, cols - c)))


class EncoderParams(NamedTuple):
    """Pre-fused / pre-padded weights. Build once with prepare_encoder_params()."""
    w1: jax.Array   # (D_in, H)  compute dtype
    b1: jax.Array   # (1, H)     float32
    wh: jax.Array   # (H, Np)    compute dtype, [Wmu | Wvar | zero-pad]
    bh: jax.Array   # (1, Np)    float32,      [bmu | bvar | zero-pad]
    z_dim: int      # static latent size


def prepare_encoder_params(w1, b1, wmu, bmu, wvar, bvar, *,
                           compute_dtype=jnp.bfloat16):
    """One-time weight prep (call at init, reuse every forward).

    compute_dtype=jnp.bfloat16 (default) targets the bf16-native MXU on v6e/v7x
    with f32 accumulation; compute_dtype=jnp.float32 matches the PyTorch module's
    numerics exactly.
    """
    H = w1.shape[1]
    Z = wmu.shape[1]
    Np = _round_up(2 * Z, 128)   # lane-dense output store is the one that matters

    w_heads = jnp.concatenate([wmu, wvar], axis=1)                       # (H, 2Z)
    b_heads = jnp.concatenate([bmu.reshape(1, -1), bvar.reshape(1, -1)], axis=1)

    return EncoderParams(
        w1=w1.astype(compute_dtype),                       # H left un-padded
        b1=b1.reshape(1, -1).astype(jnp.float32),
        wh=_pad2(w_heads.astype(compute_dtype), H, Np),
        bh=_pad2(b_heads.astype(jnp.float32), 1, Np),
        z_dim=int(Z),
    )


def encoder_kernel(x_ref, w1_ref, b1_ref, wh_ref, bh_ref, out_ref):
    # Cast x in-kernel (free on the VPU, avoids a wrapper-side HBM round trip).
    x = x_ref[...].astype(w1_ref.dtype)
    # hidden = relu(x @ W1 + b1); f32 accumulation on the MXU, f32 bias/ReLU.
    h = jnp.dot(x, w1_ref[...], preferred_element_type=jnp.float32)
    h = jnp.maximum(h + b1_ref[...], 0.0)
    # Fused heads: one lane-dense matmul producing [mu | var] side by side.
    h = h.astype(wh_ref.dtype)
    out = jnp.dot(h, wh_ref[...], preferred_element_type=jnp.float32)
    out_ref[...] = (out + bh_ref[...]).astype(out_ref.dtype)


def encoder_forward(x, params: EncoderParams, *, tb=None, split_heads=True,
                    single_buffer_weights=False):
    """x: (B, D_in). Returns (z_mu, z_var), each (B, Z); or the fused (B, 2Z)
    [mu | var] block if split_heads=False (handy for reparameterize)."""
    B, D_in = x.shape
    H = params.w1.shape[1]
    Np = params.wh.shape[1]
    Z = params.z_dim
    out_dtype = x.dtype

    # --- Batch tile: fewer/larger steps. One step up to B=512 (weights resident,
    # per-step overhead dominates at these sizes); beyond that, 256-row full-MXU
    # tiles so the "parallel" axis has >=2 steps to shard across v7x's 2 TCs.
    sub = 16  # sublane multiple safe for f32/bf16 batch tiling
    if tb is None:
        tb = _round_up(B, sub) if B <= 512 else 256
    tb = _round_up(tb, sub)
    Bp = _round_up(B, tb)

    # Only the batch dim is (maybe) padded; the feature dim rides as a full-dim block.
    x_in = x if Bp == B else jnp.pad(x, ((0, Bp - B), (0, 0)))

    grid = (Bp // tb,)

    isz = jnp.dtype(params.w1.dtype).itemsize
    cost = pl.CostEstimate(
        flops=2 * Bp * (D_in * H + H * Np),
        transcendentals=0,
        bytes_accessed=(x_in.size * jnp.dtype(x.dtype).itemsize
                        + params.w1.size * isz + params.wh.size * isz
                        + (params.b1.size + params.bh.size) * 4
                        + Bp * Np * jnp.dtype(out_dtype).itemsize),
    )

    def _invariant_spec(shape):
        if single_buffer_weights:
            # Invariant blocks are fetched once; single-buffering halves their VMEM
            # footprint (headroom for v7x's 32 MiB scoped VMEM at large D_in/H).
            return pl.BlockSpec(shape, lambda i: (0, 0), pipeline_mode=pl.Buffered(1))
        return pl.BlockSpec(shape, lambda i: (0, 0))

    # TODO(synk): for very large D_in/H (v7x: W1 approaching ~20 MiB) add a K-reduction
    # grid axis over D_in with an f32 accumulator scratch instead of one full-K block.
    out = pl.pallas_call(
        encoder_kernel,
        out_shape=jax.ShapeDtypeStruct((Bp, Np), out_dtype),
        grid_spec=pltpu.PrefetchScalarGridSpec(
            num_scalar_prefetch=0,
            grid=grid,
            in_specs=[
                pl.BlockSpec((tb, D_in), lambda i: (i, 0)),   # x tile (streams, full-K)
                _invariant_spec((D_in, H)),                   # W1 (resident)
                _invariant_spec((1, H)),                      # b1
                _invariant_spec((H, Np)),                     # [Wmu | Wvar]
                _invariant_spec((1, Np)),                     # [bmu | bvar]
            ],
            out_specs=pl.BlockSpec((tb, Np), lambda i: (i, 0)),  # lane-dense store
        ),
        compiler_params=pltpu.CompilerParams(
            dimension_semantics=("parallel",)),
        cost_estimate=cost,
    )(x_in, params.w1, params.b1, params.wh, params.bh)

    fused = out[:B, :2 * Z]          # single slice off the padded kernel output
    if not split_heads:
        return fused                 # [mu | var], ready for reparameterize
    return fused[:, :Z], fused[:, Z:]


def _init_linear(key, fan_in, fan_out, dtype=jnp.float32):
    """Deterministic PyTorch-style Linear init; returns (W_transposed, bias)."""
    kw, kb = jax.random.split(key)
    bound = 1.0 / jnp.sqrt(fan_in)
    # PyTorch stores W as (out, in); we keep it pre-transposed as (in, out).
    w = jax.random.uniform(kw, (fan_in, fan_out), dtype, minval=-bound, maxval=bound)
    b = jax.random.uniform(kb, (1, fan_out), dtype, minval=-bound, maxval=bound)
    return w, b


if __name__ == "__main__":
    # MNIST-like VAE encoder shapes: Encoder(784, 400, 20).
    batch, input_dim, hidden_dim, z_dim = 256, 784, 400, 20

    key = jax.random.PRNGKey(0)
    kx, k1, k2, k3 = jax.random.split(key, 4)

    x = jax.random.normal(kx, (batch, input_dim), jnp.float32)
    w1, b1 = _init_linear(k1, input_dim, hidden_dim)
    wmu, bmu = _init_linear(k2, hidden_dim, z_dim)
    wvar, bvar = _init_linear(k3, hidden_dim, z_dim)

    # Reference in plain JAX (same math as the PyTorch module).
    hidden_ref = jnp.maximum(x @ w1 + b1, 0.0)
    mu_ref = hidden_ref @ wmu + bmu
    var_ref = hidden_ref @ wvar + bvar

    # 1) Exact f32 path — matches the nn.Module's numerics (tight tolerance).
    params_f32 = prepare_encoder_params(w1, b1, wmu, bmu, wvar, bvar,
                                        compute_dtype=jnp.float32)
    z_mu, z_var = encoder_forward(x, params_f32)
    jax.block_until_ready((z_mu, z_var))
    assert z_mu.shape == (batch, z_dim) and z_var.shape == (batch, z_dim)
    assert jnp.allclose(z_mu, mu_ref, atol=1e-4, rtol=1e-4)
    assert jnp.allclose(z_var, var_ref, atol=1e-4, rtol=1e-4)

    # 2) Default bf16-weights path (v6e/v7x MXU throughput; f32 accumulation).
    params_bf16 = prepare_encoder_params(w1, b1, wmu, bmu, wvar, bvar)
    z_mu_bf, z_var_bf = encoder_forward(x, params_bf16)
    jax.block_until_ready((z_mu_bf, z_var_bf))
    assert jnp.allclose(z_mu_bf, mu_ref, atol=5e-2, rtol=5e-2)
    assert jnp.allclose(z_var_bf, var_ref, atol=5e-2, rtol=5e-2)

    print("KERNEL_OK")
</pallas_src>

<mosaic_0001>
module attributes {stable_mosaic.version = 11 : i64} {
  func.func @encoder_kernel(%arg0: i32, %arg1: memref<256x784xf32, #tpu.memory_space<vmem>>, %arg2: memref<784x400xf32, #tpu.memory_space<vmem>>, %arg3: memref<1x400xf32, #tpu.memory_space<vmem>>, %arg4: memref<400x128xf32, #tpu.memory_space<vmem>>, %arg5: memref<1x128xf32, #tpu.memory_space<vmem>>, %arg6: memref<256x128xf32, #tpu.memory_space<vmem>>) attributes {dimension_semantics = [#tpu.dimension_semantics<parallel>], iteration_bounds = array<i64: 1>, scalar_prefetch = 0 : i64, scratch_operands = 0 : i64, tpu.core_type = #tpu.core_type<tc>, window_params = [{transform_indices = @transform_0, window_bounds = array<i64: 256, 784>}, {pipeline_mode = #tpu.pipeline_mode<synchronous>, transform_indices = @transform_1, window_bounds = array<i64: 784, 400>}, {pipeline_mode = #tpu.pipeline_mode<synchronous>, transform_indices = @transform_2, window_bounds = array<i64: 1, 400>}, {pipeline_mode = #tpu.pipeline_mode<synchronous>, transform_indices = @transform_3, window_bounds = array<i64: 400, 128>}, {pipeline_mode = #tpu.pipeline_mode<synchronous>, transform_indices = @transform_4, window_bounds = array<i64: 1, 128>}, {transform_indices = @transform_5, window_bounds = array<i64: 256, 128>}]} {
    %c0 = arith.constant 0 : index
    %c0_0 = arith.constant 0 : index
    %0 = vector.load %arg1[%c0, %c0_0] : memref<256x784xf32, #tpu.memory_space<vmem>>, vector<256x784xf32>
    %c0_1 = arith.constant 0 : index
    %c0_2 = arith.constant 0 : index
    %1 = vector.load %arg2[%c0_1, %c0_2] : memref<784x400xf32, #tpu.memory_space<vmem>>, vector<784x400xf32>
    %cst = arith.constant dense<0.000000e+00> : vector<256x400xf32>
    %2 = tpu.matmul %0, %1, %cst {dimension_numbers = #tpu.dot_dimension_numbers<[1], [0], [0], [1], [0, 0, 1, 1], [], []>} : vector<256x784xf32>, vector<784x400xf32>, vector<256x400xf32> -> vector<256x400xf32>
    %c0_3 = arith.constant 0 : index
    %c0_4 = arith.constant 0 : index
    %3 = vector.load %arg3[%c0_3, %c0_4] : memref<1x400xf32, #tpu.memory_space<vmem>>, vector<1x400xf32>
    %4 = vector.broadcast %3 : vector<1x400xf32> to vector<256x400xf32>
    %5 = arith.addf %2, %4 : vector<256x400xf32>
    %cst_5 = arith.constant 0.000000e+00 : f32
    %6 = vector.broadcast %cst_5 : f32 to vector<256x400xf32>
    %7 = arith.maximumf %5, %6 : vector<256x400xf32>
    %c0_6 = arith.constant 0 : index
    %c0_7 = arith.constant 0 : index
    %8 = vector.load %arg4[%c0_6, %c0_7] : memref<400x128xf32, #tpu.memory_space<vmem>>, vector<400x128xf32>
    %cst_8 = arith.constant dense<0.000000e+00> : vector<256x128xf32>
    %9 = tpu.matmul %7, %8, %cst_8 {dimension_numbers = #tpu.dot_dimension_numbers<[1], [0], [0], [1], [0, 0, 1, 1], [], []>} : vector<256x400xf32>, vector<400x128xf32>, vector<256x128xf32> -> vector<256x128xf32>
    %c0_9 = arith.constant 0 : index
    %c0_10 = arith.constant 0 : index
    %10 = vector.load %arg5[%c0_9, %c0_10] : memref<1x128xf32, #tpu.memory_space<vmem>>, vector<1x128xf32>
    %11 = vector.broadcast %10 : vector<1x128xf32> to vector<256x128xf32>
    %12 = arith.addf %9, %11 : vector<256x128xf32>
    %c0_11 = arith.constant 0 : index
    %c0_12 = arith.constant 0 : index
    %13 = vector.load %arg6[%c0_11, %c0_12] : memref<256x128xf32, #tpu.memory_space<vmem>>, vector<256x128xf32>
    tpu.vector_store %arg6[%c0_11, %c0_12], %12 {strides = array<i32>} : memref<256x128xf32, #tpu.memory_space<vmem>>, vector<256x128xf32>,
    return
  }
  func.func @transform_0(%arg0: i32) -> (i32, i32) {
    %c0_i32 = arith.constant 0 : i32
    %c0_i32_0 = arith.constant 0 : i32
    return %arg0, %c0_i32 : i32, i32
  }
  func.func @transform_1(%arg0: i32) -> (i32, i32) {
    %c0_i32 = arith.constant 0 : i32
    %c0_i32_0 = arith.constant 0 : i32
    %c0_i32_1 = arith.constant 0 : i32
    return %c0_i32, %c0_i32_0 : i32, i32
  }
  func.func @transform_2(%arg0: i32) -> (i32, i32) {
    %c0_i32 = arith.constant 0 : i32
    %c0_i32_0 = arith.constant 0 : i32
    %c0_i32_1 = arith.constant 0 : i32
    return %c0_i32, %c0_i32_0 : i32, i32
  }
  func.func @transform_3(%arg0: i32) -> (i32, i32) {
    %c0_i32 = arith.constant 0 : i32
    %c0_i32_0 = arith.constant 0 : i32
    %c0_i32_1 = arith.constant 0 : i32
    return %c0_i32, %c0_i32_0 : i32, i32
  }
  func.func @transform_4(%arg0: i32) -> (i32, i32) {
    %c0_i32 = arith.constant 0 : i32
    %c0_i32_0 = arith.constant 0 : i32
    %c0_i32_1 = arith.constant 0 : i32
    return %c0_i32, %c0_i32_0 : i32, i32
  }
  func.func @transform_5(%arg0: i32) -> (i32, i32) {
    %c0_i32 = arith.constant 0 : i32
    %c0_i32_0 = arith.constant 0 : i32
    return %arg0, %c0_i32 : i32, i32
  }
}

</mosaic_0001>

<bundles_post_ra>
// kernel: tpu_custom_call.1
= control target key start
LH: loop header
LB: loop body
LE: loop exit
PB: predicated region body
PF: predicated region fallthrough
CT: control target
= control target key end

     0   :  { %s7767_s0 = inlined_call_operand.vmem [shape: f32[256,784], index: 0, kind: input, shape index: {}]   ;;  %s7768_s1 = inlined_call_operand.vmem [shape: f32[784,400], index: 1, kind: input, shape index: {}]   ;;  %s7769_s2 = inlined_call_operand.vmem [shape: f32[1,400], index: 2, kind: input, shape index: {}]   ;;  %s7770_s3 = inlined_call_operand.vmem [shape: f32[400,128], index: 3, kind: input, shape index: {}]   ;;  %s7771_s4 = inlined_call_operand.vmem [shape: f32[1,128], index: 4, kind: input, shape index: {}]   ;;  %s7772_s5 = inlined_call_operand.hbm [shape: f32[256,128], index: 5, kind: output, shape index: {}]  }
   0x1   :  { %v306_v0 = vld [vmem:[%s7768_s1 + $0x1e8] sm:$0xff]  ;;  %v305_v1 = vld [vmem:[%s7768_s1 + $0x1e0] sm:$0xff] }
   0x2   :  { %v434_v2 = vld [vmem:[%s7768_s1 + $0x5e8] sm:$0xff]  ;;  %756 = vmatprep.subr.mxu0 %v306_v0  ;;  %v433_v4 = vld [vmem:[%s7768_s1 + $0x5e0] sm:$0xff] }
   0x3   :  { %1013 = vmatprep.subr.mxu1 %v434_v2  ;;  %v302_v3 = vld [vmem:[%s7768_s1 + $0x1c8] sm:$0xff]  ;;  %v301_v5 = vld [vmem:[%s7768_s1 + $0x1c0] sm:$0xff]  ;;  %757 = vmatpush1.msra.mxu0 %v305_v1 }
   0x4   :  { %1014 = vmatpush1.msra.mxu1 %v433_v4  ;;  %v430_v6 = vld [vmem:[%s7768_s1 + $0x5c8] sm:$0xff]  ;;  %v429_v8 = vld [vmem:[%s7768_s1 + $0x5c0] sm:$0xff]  ;;  %758 = vmatprep.subr.mxu0 %v302_v3 }
   0x5   :  { %v298_v7 = vld [vmem:[%s7768_s1 + $0x1a8] sm:$0xff]  ;;  %1015 = vmatprep.subr.mxu1 %v430_v6  ;;  %v297_v9 = vld [vmem:[%s7768_s1 + $0x1a0] sm:$0xff]  ;;  %759 = vmatpush1.msra.mxu0 %v301_v5 }
   0x6   :  { %v426_v10 = vld [vmem:[%s7768_s1 + $0x5a8] sm:$0xff]  ;;  %1016 = vmatpush1.msra.mxu1 %v429_v8  ;;  %v425_v12 = vld [vmem:[%s7768_s1 + $0x5a0] sm:$0xff]  ;;  %760 = vmatprep.subr.mxu0 %v298_v7 }
   0x7   :  { %v294_v11 = vld [vmem:[%s7768_s1 + $0x188] sm:$0xff]  ;;  %1017 = vmatprep.subr.mxu1 %v426_v10  ;;  %v293_v14 = vld [vmem:[%s7768_s1 + $0x180] sm:$0xff]  ;;  %761 = vmatpush1.msra.mxu0 %v297_v9 }
   0x8   :  { %v422_v13 = vld [vmem:[%s7768_s1 + $0x588] sm:$0xff]  ;;  %v421_v15 = vld [vmem:[%s7768_s1 + $0x580] sm:$0xff]  ;;  %1018 = vmatpush1.msra.mxu1 %v425_v12  ;;  %762 = vmatprep.subr.mxu0 %v294_v11 }
   0x9   :  { %v290_v16 = vld [vmem:[%s7768_s1 + $0x168] sm:$0xff]  ;;  %1019 = vmatprep.subr.mxu1 %v422_v13  ;;  %v289_v18 = vld [vmem:[%s7768_s1 + $0x160] sm:$0xff]  ;;  %763 = vmatpush1.msra.mxu0 %v293_v14 }
   0xa   :  { %v418_v17 = vld [vmem:[%s7768_s1 + $0x568] sm:$0xff]  ;;  %v417_v19 = vld [vmem:[%s7768_s1 + $0x560] sm:$0xff]  ;;  %1020 = vmatpush1.msra.mxu1 %v421_v15  ;;  %764 = vmatprep.subr.mxu0 %v290_v16 }
   0xb   :  { %v286_v20 = vld [vmem:[%s7768_s1 + $0x148] sm:$0xff]  ;;  %1021 = vmatprep.subr.mxu1 %v418_v17  ;;  %v285_v22 = vld [vmem:[%s7768_s1 + $0x140] sm:$0xff]  ;;  %765 = vmatpush1.msra.mxu0 %v289_v18 }
   0xc   :  { %v414_v21 = vld [vmem:[%s7768_s1 + $0x548] sm:$0xff]  ;;  %v413_v23 = vld [vmem:[%s7768_s1 + $0x540] sm:$0xff]  ;;  %1022 = vmatpush1.msra.mxu1 %v417_v19  ;;  %766 = vmatprep.subr.mxu0 %v286_v20 }
   0xd   :  { %v282_v24 = vld [vmem:[%s7768_s1 + $0x128] sm:$0xff]  ;;  %1023 = vmatprep.subr.mxu1 %v414_v21  ;;  %v281_v26 = vld [vmem:[%s7768_s1 + $0x120] sm:$0xff]  ;;  %767 = vmatpush1.msra.mxu0 %v285_v22 }
   0xe   :  { %v410_v25 = vld [vmem:[%s7768_s1 + $0x528] sm:$0xff]  ;;  %v409_v27 = vld [vmem:[%s7768_s1 + $0x520] sm:$0xff]  ;;  %1024 = vmatpush1.msra.mxu1 %v413_v23  ;;  %768 = vmatprep.subr.mxu0 %v282_v24 }
   0xf   :  { %v278_v28 = vld [vmem:[%s7768_s1 + $0x108] sm:$0xff]  ;;  %1025 = vmatprep.subr.mxu1 %v410_v25  ;;  %v277_v30 = vld [vmem:[%s7768_s1 + $0x100] sm:$0xff]  ;;  %769 = vmatpush1.msra.mxu0 %v281_v26 }
  0x10   :  { %v406_v29 = vld [vmem:[%s7768_s1 + $0x508] sm:$0xff]  ;;  %v405_v31 = vld [vmem:[%s7768_s1 + $0x500] sm:$0xff]  ;;  %1026 = vmatpush1.msra.mxu1 %v409_v27  ;;  %770 = vmatprep.subr.mxu0 %v278_v28 }
  0x11   :  { %v274_v32 = vld [vmem:[%s7768_s1 + $0xe8] sm:$0xff]  ;;  %1027 = vmatprep.subr.mxu1 %v406_v29  ;;  %v273_v34 = vld [vmem:[%s7768_s1 + $0xe0] sm:$0xff]  ;;  %771 = vmatpush1.msra.mxu0 %v277_v30 }
  0x12   :  { %v402_v33 = vld [vmem:[%s7768_s1 + $0x4e8] sm:$0xff]  ;;  %v401_v35 = vld [vmem:[%s7768_s1 + $0x4e0] sm:$0xff]  ;;  %1028 = vmatpush1.msra.mxu1 %v405_v31  ;;  %772 = vmatprep.subr.mxu0 %v274_v32 }
  0x13   :  { %v270_v36 = vld [vmem:[%s7768_s1 + $0xc8] sm:$0xff]  ;;  %1029 = vmatprep.subr.mxu1 %v402_v33  ;;  %v269_v38 = vld [vmem:[%s7768_s1 + $0xc0] sm:$0xff]  ;;  %773 = vmatpush1.msra.mxu0 %v273_v34 }
  0x14   :  { %v398_v37 = vld [vmem:[%s7768_s1 + $0x4c8] sm:$0xff]  ;;  %v397_v39 = vld [vmem:[%s7768_s1 + $0x4c0] sm:$0xff]  ;;  %1030 = vmatpush1.msra.mxu1 %v401_v35  ;;  %774 = vmatprep.subr.mxu0 %v270_v36 }
  0x15   :  { %v266_v40 = vld [vmem:[%s7768_s1 + $0xa8] sm:$0xff]  ;;  %1031 = vmatprep.subr.mxu1 %v398_v37  ;;  %v265_v42 = vld [vmem:[%s7768_s1 + $0xa0] sm:$0xff]  ;;  %775 = vmatpush1.msra.mxu0 %v269_v38 }
  0x16   :  { %v394_v41 = vld [vmem:[%s7768_s1 + $0x4a8] sm:$0xff]  ;;  %v393_v43 = vld [vmem:[%s7768_s1 + $0x4a0] sm:$0xff]  ;;  %1032 = vmatpush1.msra.mxu1 %v397_v39  ;;  %776 = vmatprep.subr.mxu0 %v266_v40 }
  0x17   :  { %v262_v44 = vld [vmem:[%s7768_s1 + $0x88] sm:$0xff]  ;;  %1033 = vmatprep.subr.mxu1 %v394_v41  ;;  %v261_v46 = vld [vmem:[%s7768_s1 + $0x80] sm:$0xff]  ;;  %777 = vmatpush1.msra.mxu0 %v265_v42 }
  0x18   :  { %v390_v45 = vld [vmem:[%s7768_s1 + $0x488] sm:$0xff]  ;;  %v389_v47 = vld [vmem:[%s7768_s1 + $0x480] sm:$0xff]  ;;  %1034 = vmatpush1.msra.mxu1 %v393_v43  ;;  %778 = vmatprep.subr.mxu0 %v262_v44 }
  0x19   :  { %v258_v48 = vld [vmem:[%s7768_s1 + $0x68] sm:$0xff]  ;;  %1035 = vmatprep.subr.mxu1 %v390_v45  ;;  %v257_v50 = vld [vmem:[%s7768_s1 + $0x60] sm:$0xff]  ;;  %779 = vmatpush1.msra.mxu0 %v261_v46 }
  0x1a   :  { %v386_v49 = vld [vmem:[%s7768_s1 + $0x468] sm:$0xff]  ;;  %v385_v51 = vld [vmem:[%s7768_s1 + $0x460] sm:$0xff]  ;;  %1036 = vmatpush1.msra.mxu1 %v389_v47  ;;  %780 = vmatprep.subr.mxu0 %v258_v48 }
  0x1b   :  { %v254_v52 = vld [vmem:[%s7768_s1 + $0x48] sm:$0xff]  ;;  %1037 = vmatprep.subr.mxu1 %v386_v49  ;;  %v253_v54 = vld [vmem:[%s7768_s1 + $0x40] sm:$0xff]  ;;  %781 = vmatpush1.msra.mxu0 %v257_v50 }
  0x1c   :  { %v382_v53 = vld [vmem:[%s7768_s1 + $0x448] sm:$0xff]  ;;  %v381_v55 = vld [vmem:[%s7768_s1 + $0x440] sm:$0xff]  ;;  %1038 = vmatpush1.msra.mxu1 %v385_v51  ;;  %782 = vmatprep.subr.mxu0 %v254_v52 }
  0x1d   :  { %v250_v56 = vld [vmem:[%s7768_s1 + $0x28] sm:$0xff]  ;;  %1039 = vmatprep.subr.mxu1 %v382_v53  ;;  %v249_v58 = vld [vmem:[%s7768_s1 + $0x20] sm:$0xff]  ;;  %783 = vmatpush1.msra.mxu0 %v253_v54 }
  0x1e   :  { %v378_v57 = vld [vmem:[%s7768_s1 + $0x428] sm:$0xff]  ;;  %v377_v59 = vld [vmem:[%s7768_s1 + $0x420] sm:$0xff]  ;;  %1040 = vmatpush1.msra.mxu1 %v381_v55  ;;  %784 = vmatprep.subr.mxu0 %v250_v56 }
  0x1f   :  { %v246_v60 = vld [vmem:[%s7768_s1 + $0x8] sm:$0xff]  ;;  %1041 = vmatprep.subr.mxu1 %v378_v57  ;;  %v245_v62 = vld [vmem:[%s7768_s1] sm:$0xff]  ;;  %785 = vmatpush1.msra.mxu0 %v249_v58 }
  0x20   :  { %v374_v61 = vld [vmem:[%s7768_s1 + $0x408] sm:$0xff]  ;;  %v373_v63 = vld [vmem:[%s7768_s1 + $0x400] sm:$0xff]  ;;  %1042 = vmatpush1.msra.mxu1 %v377_v59  ;;  %786 = vmatprep.subr.mxu0 %v246_v60 }
  0x21   :  { %v370_v0 = vld [vmem:[%s7768_s1 + $0x3e8] sm:$0xff]  ;;  %1043 = vmatprep.subr.mxu1 %v374_v61  ;;  %v369_v2 = vld [vmem:[%s7768_s1 + $0x3e0] sm:$0xff]  ;;  %787 = vmatpush1.msra.mxu0 %v245_v62 }
  0x22   :  { %v498_v1 = vld [vmem:[%s7768_s1 + $0x7e8] sm:$0xff]  ;;  %v497_v3 = vld [vmem:[%s7768_s1 + $0x7e0] sm:$0xff]  ;;  %1044 = vmatpush1.msra.mxu1 %v373_v63  ;;  %788 = vmatprep.subr.mxu0 %v370_v0 }
  0x23   :  { %v366_v4 = vld [vmem:[%s7768_s1 + $0x3c8] sm:$0xff]  ;;  %1045 = vmatprep.subr.mxu1 %v498_v1  ;;  %v365_v6 = vld [vmem:[%s7768_s1 + $0x3c0] sm:$0xff]  ;;  %789 = vmatpush2.msra.mxu0 %v369_v2  ;;  %v24_v2 = vld [vmem:[%s7767_s0 + $0x18] sm:$0xff] }
  0x24   :  { %v494_v5 = vld [vmem:[%s7768_s1 + $0x7c8] sm:$0xff]  ;;  %v493_v7 = vld [vmem:[%s7768_s1 + $0x7c0] sm:$0xff]  ;;  %1046 = vmatpush2.msra.mxu1 %v497_v3  ;;  %790 = vmatprep.subr.mxu0 %v366_v4  ;;  %v23_v4 = vld [vmem:[%s7767_s0 + $0x10] sm:$0xff] }
  0x25   :  { %v362_v8 = vld [vmem:[%s7768_s1 + $0x3a8] sm:$0xff]  ;;  %1047 = vmatprep.subr.mxu1 %v494_v5  ;;  %v361_v10 = vld [vmem:[%s7768_s1 + $0x3a0] sm:$0xff]  ;;  %791 = vmatpush2.msra.mxu0 %v365_v6 }
  0x26   :  { %v490_v9 = vld [vmem:[%s7768_s1 + $0x7a8] sm:$0xff]  ;;  %v489_v11 = vld [vmem:[%s7768_s1 + $0x7a0] sm:$0xff]  ;;  %1048 = vmatpush2.msra.mxu1 %v493_v7  ;;  %792 = vmatprep.subr.mxu0 %v362_v8 }
  0x27   :  { %v358_v12 = vld [vmem:[%s7768_s1 + $0x388] sm:$0xff]  ;;  %1049 = vmatprep.subr.mxu1 %v490_v9  ;;  %v357_v14 = vld [vmem:[%s7768_s1 + $0x380] sm:$0xff]  ;;  %793 = vmatpush2.msra.mxu0 %v361_v10  ;;  %v28_v9 = vld [vmem:[%s7767_s0 + $0x38] sm:$0xff] }
  0x28   :  { %v486_v13 = vld [vmem:[%s7768_s1 + $0x788] sm:$0xff]  ;;  %v485_v15 = vld [vmem:[%s7768_s1 + $0x780] sm:$0xff]  ;;  %1050 = vmatpush2.msra.mxu1 %v489_v11  ;;  %794 = vmatprep.subr.mxu0 %v358_v12  ;;  %v31_v10 = vld [vmem:[%s7767_s0 + $0x50] sm:$0xff] }
  0x29   :  { %v354_v16 = vld [vmem:[%s7768_s1 + $0x368] sm:$0xff]  ;;  %1051 = vmatprep.subr.mxu1 %v486_v13  ;;  %v353_v18 = vld [vmem:[%s7768_s1 + $0x360] sm:$0xff]  ;;  %795 = vmatpush2.msra.mxu0 %v357_v14  ;;  %v36_v14 = vld [vmem:[%s7767_s0 + $0x78] sm:$0xff] }
  0x2a   :  { %v482_v17 = vld [vmem:[%s7768_s1 + $0x768] sm:$0xff]  ;;  %v481_v19 = vld [vmem:[%s7768_s1 + $0x760] sm:$0xff]  ;;  %1052 = vmatpush2.msra.mxu1 %v485_v15  ;;  %796 = vmatprep.subr.mxu0 %v354_v16  ;;  %v35_v16 = vld [vmem:[%s7767_s0 + $0x70] sm:$0xff] }
  0x2b   :  { %v350_v20 = vld [vmem:[%s7768_s1 + $0x348] sm:$0xff]  ;;  %1053 = vmatprep.subr.mxu1 %v482_v17  ;;  %v349_v22 = vld [vmem:[%s7768_s1 + $0x340] sm:$0xff]  ;;  %797 = vmatpush2.msra.mxu0 %v353_v18 }
  0x2c   :  { %v478_v21 = vld [vmem:[%s7768_s1 + $0x748] sm:$0xff]  ;;  %v477_v23 = vld [vmem:[%s7768_s1 + $0x740] sm:$0xff]  ;;  %1054 = vmatpush2.msra.mxu1 %v481_v19  ;;  %798 = vmatprep.subr.mxu0 %v350_v20  ;;  %v43_v19 = vld [vmem:[%s7767_s0 + $0xb0] sm:$0xff] }
  0x2d   :  { %v346_v24 = vld [vmem:[%s7768_s1 + $0x328] sm:$0xff]  ;;  %1055 = vmatprep.subr.mxu1 %v478_v21  ;;  %v345_v26 = vld [vmem:[%s7768_s1 + $0x320] sm:$0xff]  ;;  %799 = vmatpush2.msra.mxu0 %v349_v22 }
  0x2e   :  { %v474_v25 = vld [vmem:[%s7768_s1 + $0x728] sm:$0xff]  ;;  %v473_v27 = vld [vmem:[%s7768_s1 + $0x720] sm:$0xff]  ;;  %1056 = vmatpush2.msra.mxu1 %v477_v23  ;;  %800 = vmatprep.subr.mxu0 %v346_v24 }
  0x2f   :  { %v342_v28 = vld [vmem:[%s7768_s1 + $0x308] sm:$0xff]  ;;  %1057 = vmatprep.subr.mxu1 %v474_v25  ;;  %v341_v30 = vld [vmem:[%s7768_s1 + $0x300] sm:$0xff]  ;;  %801 = vmatpush2.msra.mxu0 %v345_v26 }
  0x30   :  { %v470_v29 = vld [vmem:[%s7768_s1 + $0x708] sm:$0xff]  ;;  %v469_v31 = vld [vmem:[%s7768_s1 + $0x700] sm:$0xff]  ;;  %1058 = vmatpush2.msra.mxu1 %v473_v27  ;;  %802 = vmatprep.subr.mxu0 %v342_v28  ;;  %v44_v28 = vld [vmem:[%s7767_s0 + $0xb8] sm:$0xff] }
  0x31   :  { %v338_v32 = vld [vmem:[%s7768_s1 + $0x2e8] sm:$0xff]  ;;  %1059 = vmatprep.subr.mxu1 %v470_v29  ;;  %v337_v34 = vld [vmem:[%s7768_s1 + $0x2e0] sm:$0xff]  ;;  %803 = vmatpush2.msra.mxu0 %v341_v30  ;;  %v52_v30 = vld [vmem:[%s7767_s0 + $0xf8] sm:$0xff] }
  0x32   :  { %v466_v33 = vld [vmem:[%s7768_s1 + $0x6e8] sm:$0xff]  ;;  %v465_v35 = vld [vmem:[%s7768_s1 + $0x6e0] sm:$0xff]  ;;  %1060 = vmatpush2.msra.mxu1 %v469_v31  ;;  %804 = vmatprep.subr.mxu0 %v338_v32 }
  0x33   :  { %v334_v36 = vld [vmem:[%s7768_s1 + $0x2c8] sm:$0xff]  ;;  %1061 = vmatprep.subr.mxu1 %v466_v33  ;;  %v333_v38 = vld [vmem:[%s7768_s1 + $0x2c0] sm:$0xff]  ;;  %805 = vmatpush2.msra.mxu0 %v337_v34 }
  0x34   :  { %v462_v37 = vld [vmem:[%s7768_s1 + $0x6c8] sm:$0xff]  ;;  %v461_v39 = vld [vmem:[%s7768_s1 + $0x6c0] sm:$0xff]  ;;  %1062 = vmatpush2.msra.mxu1 %v465_v35  ;;  %806 = vmatprep.subr.mxu0 %v334_v36  ;;  %v51_v36 = vld [vmem:[%s7767_s0 + $0xf0] sm:$0xff] }
  0x35   :  { %v330_v40 = vld [vmem:[%s7768_s1 + $0x2a8] sm:$0xff]  ;;  %1063 = vmatprep.subr.mxu1 %v462_v37  ;;  %v329_v42 = vld [vmem:[%s7768_s1 + $0x2a0] sm:$0xff]  ;;  %807 = vmatpush2.msra.mxu0 %v333_v38  ;;  %v59_v38 = vld [vmem:[%s7767_s0 + $0x130] sm:$0xff] }
  0x36   :  { %v458_v41 = vld [vmem:[%s7768_s1 + $0x6a8] sm:$0xff]  ;;  %v457_v43 = vld [vmem:[%s7768_s1 + $0x6a0] sm:$0xff]  ;;  %1064 = vmatpush2.msra.mxu1 %v461_v39  ;;  %808 = vmatprep.subr.mxu0 %v330_v40  ;;  %v56_v40 = vld [vmem:[%s7767_s0 + $0x118] sm:$0xff] }
  0x37   :  { %v326_v44 = vld [vmem:[%s7768_s1 + $0x288] sm:$0xff]  ;;  %1065 = vmatprep.subr.mxu1 %v458_v41  ;;  %v325_v46 = vld [vmem:[%s7768_s1 + $0x280] sm:$0xff]  ;;  %809 = vmatpush2.msra.mxu0 %v329_v42  ;;  %v64_v42 = vld [vmem:[%s7767_s0 + $0x158] sm:$0xff] }
  0x38   :  { %v454_v45 = vld [vmem:[%s7768_s1 + $0x688] sm:$0xff]  ;;  %v453_v47 = vld [vmem:[%s7768_s1 + $0x680] sm:$0xff]  ;;  %1066 = vmatpush2.msra.mxu1 %v457_v43  ;;  %810 = vmatprep.subr.mxu0 %v326_v44 }
  0x39   :  { %v322_v48 = vld [vmem:[%s7768_s1 + $0x268] sm:$0xff]  ;;  %1067 = vmatprep.subr.mxu1 %v454_v45  ;;  %v321_v50 = vld [vmem:[%s7768_s1 + $0x260] sm:$0xff]  ;;  %811 = vmatpush2.msra.mxu0 %v325_v46 }
  0x3a   :  { %v450_v49 = vld [vmem:[%s7768_s1 + $0x668] sm:$0xff]  ;;  %v449_v51 = vld [vmem:[%s7768_s1 + $0x660] sm:$0xff]  ;;  %1068 = vmatpush2.msra.mxu1 %v453_v47  ;;  %812 = vmatprep.subr.mxu0 %v322_v48  ;;  %v63_v48 = vld [vmem:[%s7767_s0 + $0x150] sm:$0xff] }
  0x3b   :  { %v318_v52 = vld [vmem:[%s7768_s1 + $0x248] sm:$0xff]  ;;  %1069 = vmatprep.subr.mxu1 %v450_v49  ;;  %v317_v54 = vld [vmem:[%s7768_s1 + $0x240] sm:$0xff]  ;;  %813 = vmatpush2.msra.mxu0 %v321_v50  ;;  %v71_v50 = vld [vmem:[%s7767_s0 + $0x190] sm:$0xff] }
  0x3c   :  { %v446_v53 = vld [vmem:[%s7768_s1 + $0x648] sm:$0xff]  ;;  %v445_v55 = vld [vmem:[%s7768_s1 + $0x640] sm:$0xff]  ;;  %1070 = vmatpush2.msra.mxu1 %v449_v51  ;;  %814 = vmatprep.subr.mxu0 %v318_v52 }
  0x3d   :  { %v314_v56 = vld [vmem:[%s7768_s1 + $0x228] sm:$0xff]  ;;  %1071 = vmatprep.subr.mxu1 %v446_v53  ;;  %v313_v58 = vld [vmem:[%s7768_s1 + $0x220] sm:$0xff]  ;;  %815 = vmatpush2.msra.mxu0 %v317_v54 }
  0x3e   :  { %v442_v57 = vld [vmem:[%s7768_s1 + $0x628] sm:$0xff]  ;;  %v441_v59 = vld [vmem:[%s7768_s1 + $0x620] sm:$0xff]  ;;  %1072 = vmatpush2.msra.mxu1 %v445_v55  ;;  %816 = vmatprep.subr.mxu0 %v314_v56 }
  0x3f   :  { %v310_v60 = vld [vmem:[%s7768_s1 + $0x208] sm:$0xff]  ;;  %1073 = vmatprep.subr.mxu1 %v442_v57  ;;  %v309_v62 = vld [vmem:[%s7768_s1 + $0x200] sm:$0xff]  ;;  %817 = vmatpush2.msra.mxu0 %v313_v58 }
  0x40   :  { %v22_v61 = vld [vmem:[%s7767_s0 + $0x8] sm:$0xff]  ;;  %1074 = vmatpush2.msra.mxu1 %v441_v59  ;;  %v21_v0 = vld [vmem:[%s7767_s0] sm:$0xff]  ;;  %818 = vmatprep.subr.mxu0 %v310_v60  ;;  %v72_v60 = vld [vmem:[%s7767_s0 + $0x198] sm:$0xff] }
  0x41   :  { %v438_v63 = vld [vmem:[%s7768_s1 + $0x608] sm:$0xff]  ;;  %v437_v1 = vld [vmem:[%s7768_s1 + $0x600] sm:$0xff]  ;;  %820 = vmatprep.mubr.f32.mxu0 %v22_v61  ;;  %819 = vmatpush2.msra.mxu0 %v309_v62  ;;  %v80_v62 = vld [vmem:[%s7767_s0 + $0x1d8] sm:$0xff] }
  0x42   :  { %v562_v3 = vld [vmem:[%s7768_s1 + $0x9e8] sm:$0xff]  ;;  %1075 = vmatprep.subr.mxu1 %v438_v63  ;;  %v561_v5 = vld [vmem:[%s7768_s1 + $0x9e0] sm:$0xff]  ;;  %821 = vmatmul.mubr.f32.vlgmr.msra.gmra.mxu0 %v21_v0 }
  0x43   :  { %1076 = vmatpush2.msra.mxu1 %v437_v1  ;;  %v634_v6 = vld [vmem:[%s7768_s1 + $0xc28] sm:$0xff]  ;;  %v29_v7 = vld [vmem:[%s7767_s0 + $0x40] sm:$0xff]  ;;  %1077 = vmatprep.mubr.f32.mxu1 %v24_v2 }
  0x44   :  { %1270 = vmatprep.subr.mxu0 %v562_v3  ;;  %v633_v8 = vld [vmem:[%s7768_s1 + $0xc20] sm:$0xff]  ;;  %1078 = vmatmul.mubr.f32.vlgmr.msra.gmra.mxu1 %v23_v4  ;;  %v558_v11 = vld [vmem:[%s7768_s1 + $0x9c8] sm:$0xff]  ;;  %v79_v4 = vld [vmem:[%s7767_s0 + $0x1d0] sm:$0xff] }
  0x45   :  { %1271 = vmatpush1.msra.mxu0 %v561_v5  ;;  %1555 = vmatprep.subr.mxu1 %v634_v6  ;;  %v30_v12 = vld [vmem:[%s7767_s0 + $0x48] sm:$0xff]  ;;  %v557_v13 = vld [vmem:[%s7768_s1 + $0x9c0] sm:$0xff]  ;;  %v87_v6 = vld [vmem:[%s7767_s0 + $0x210] sm:$0xff] }
  0x46   :  { %826 = vmatprep.mubr.f32.mxu0 %v29_v7  ;;  %1556 = vmatpush1.msra.mxu1 %v633_v8  ;;  %v38_v15 = vld [vmem:[%s7767_s0 + $0x88] sm:$0xff]  ;;  %v553_v18 = vld [vmem:[%s7768_s1 + $0x9a0] sm:$0xff]  ;;  %v84_v8 = vld [vmem:[%s7767_s0 + $0x1f8] sm:$0xff] }
  0x47   :  { %827 = vmatmul.mubr.f32.gmra.mxu0 %v28_v9  ;;  %1083 = vmatprep.mubr.f32.mxu1 %v31_v10  ;;  %v554_v17 = vld [vmem:[%s7768_s1 + $0x9a8] sm:$0xff]  ;;  %v37_v20 = vld [vmem:[%s7767_s0 + $0x80] sm:$0xff]  ;;  %v92_v10 = vld [vmem:[%s7767_s0 + $0x238] sm:$0xff] }
  0x48   :  { %1272 = vmatprep.subr.mxu0 %v558_v11  ;;  %1084 = vmatmul.mubr.f32.gmra.mxu1 %v30_v12  ;;  %v550_v21 = vld [vmem:[%s7768_s1 + $0x988] sm:$0xff]  ;;  %v45_v22 = vld [vmem:[%s7767_s0 + $0xc0] sm:$0xff] }
  0x49   :  { %1273 = vmatpush1.msra.mxu0 %v557_v13  ;;  %832 = vmatprep.mubr.f32.mxu0 %v36_v14  ;;  %v549_v23 = vld [vmem:[%s7768_s1 + $0x980] sm:$0xff]  ;;  %v42_v24 = vld [vmem:[%s7767_s0 + $0xa8] sm:$0xff] }
  0x4a   :  { %1089 = vmatprep.mubr.f32.mxu1 %v38_v15  ;;  %1274 = vmatprep.subr.mxu0 %v554_v17  ;;  %v546_v25 = vld [vmem:[%s7768_s1 + $0x968] sm:$0xff]  ;;  %v545_v27 = vld [vmem:[%s7768_s1 + $0x960] sm:$0xff] }
  0x4b   :  { %833 = vmatmul.mubr.f32.gmra.mxu0 %v35_v16  ;;  %v50_v26 = vld [vmem:[%s7767_s0 + $0xe8] sm:$0xff]  ;;  %v541_v31 = vld [vmem:[%s7768_s1 + $0x940] sm:$0xff]  ;;  %v91_v16 = vld [vmem:[%s7767_s0 + $0x230] sm:$0xff] }
  0x4c   :  { %1275 = vmatpush1.msra.mxu0 %v553_v18  ;;  %838 = vmatprep.mubr.f32.mxu0 %v43_v19  ;;  %v542_v29 = vld [vmem:[%s7768_s1 + $0x948] sm:$0xff]  ;;  %v49_v32 = vld [vmem:[%s7767_s0 + $0xe0] sm:$0xff]  ;;  %v99_v18 = vld [vmem:[%s7767_s0 + $0x270] sm:$0xff] }
  0x4d   :  { %1090 = vmatmul.mubr.f32.gmra.mxu1 %v37_v20  ;;  %1276 = vmatprep.subr.mxu0 %v550_v21  ;;  %v538_v33 = vld [vmem:[%s7768_s1 + $0x928] sm:$0xff]  ;;  %v57_v34 = vld [vmem:[%s7767_s0 + $0x120] sm:$0xff] }
  0x4e   :  { %1095 = vmatprep.mubr.f32.mxu1 %v45_v22  ;;  %1277 = vmatpush1.msra.mxu0 %v549_v23  ;;  %v537_v35 = vld [vmem:[%s7768_s1 + $0x920] sm:$0xff]  ;;  %v534_v37 = vld [vmem:[%s7768_s1 + $0x908] sm:$0xff] }
  0x4f   :  { %839 = vmatmul.mubr.f32.gmra.mxu0 %v42_v24  ;;  %1278 = vmatprep.subr.mxu0 %v546_v25  ;;  %v533_v39 = vld [vmem:[%s7768_s1 + $0x900] sm:$0xff]  ;;  %v530_v41 = vld [vmem:[%s7768_s1 + $0x8e8] sm:$0xff] }
  0x50   :  { %844 = vmatprep.mubr.f32.mxu0 %v50_v26  ;;  %1279 = vmatpush1.msra.mxu0 %v545_v27  ;;  %v529_v43 = vld [vmem:[%s7768_s1 + $0x8e0] sm:$0xff]  ;;  %v58_v44 = vld [vmem:[%s7767_s0 + $0x128] sm:$0xff] }
  0x51   :  { %1096 = vmatmul.mubr.f32.gmra.mxu1 %v44_v28  ;;  %1280 = vmatprep.subr.mxu0 %v542_v29  ;;  %v526_v45 = vld [vmem:[%s7768_s1 + $0x8c8] sm:$0xff]  ;;  %v525_v47 = vld [vmem:[%s7768_s1 + $0x8c0] sm:$0xff]  ;;  %v100_v28 = vld [vmem:[%s7767_s0 + $0x278] sm:$0xff] }
  0x52   :  { %1101 = vmatprep.mubr.f32.mxu1 %v52_v30  ;;  %1281 = vmatpush1.msra.mxu0 %v541_v31  ;;  %v66_v46 = vld [vmem:[%s7767_s0 + $0x168] sm:$0xff]  ;;  %v521_v51 = vld [vmem:[%s7768_s1 + $0x8a0] sm:$0xff]  ;;  %v108_v30 = vld [vmem:[%s7767_s0 + $0x2b8] sm:$0xff] }
  0x53   :  { %845 = vmatmul.mubr.f32.gmra.mxu0 %v49_v32  ;;  %1282 = vmatprep.subr.mxu0 %v538_v33  ;;  %v522_v49 = vld [vmem:[%s7768_s1 + $0x8a8] sm:$0xff]  ;;  %v65_v52 = vld [vmem:[%s7767_s0 + $0x160] sm:$0xff] }
  0x54   :  { %850 = vmatprep.mubr.f32.mxu0 %v57_v34  ;;  %1283 = vmatpush1.msra.mxu0 %v537_v35  ;;  %v518_v53 = vld [vmem:[%s7768_s1 + $0x888] sm:$0xff]  ;;  %v73_v54 = vld [vmem:[%s7767_s0 + $0x1a0] sm:$0xff] }
  0x55   :  { %1102 = vmatmul.mubr.f32.gmra.mxu1 %v51_v36  ;;  %1284 = vmatprep.subr.mxu0 %v534_v37  ;;  %v517_v55 = vld [vmem:[%s7768_s1 + $0x880] sm:$0xff]  ;;  %v70_v56 = vld [vmem:[%s7767_s0 + $0x188] sm:$0xff]  ;;  %v107_v36 = vld [vmem:[%s7767_s0 + $0x2b0] sm:$0xff] }
  0x56   :  { %1107 = vmatprep.mubr.f32.mxu1 %v59_v38  ;;  %1285 = vmatpush1.msra.mxu0 %v533_v39  ;;  %v514_v57 = vld [vmem:[%s7768_s1 + $0x868] sm:$0xff]  ;;  %v513_v59 = vld [vmem:[%s7768_s1 + $0x860] sm:$0xff]  ;;  %v115_v38 = vld [vmem:[%s7767_s0 + $0x2f0] sm:$0xff] }
  0x57   :  { %851 = vmatmul.mubr.f32.gmra.mxu0 %v56_v40  ;;  %1286 = vmatprep.subr.mxu0 %v530_v41  ;;  %v78_v58 = vld [vmem:[%s7767_s0 + $0x1c8] sm:$0xff]  ;;  %v509_v63 = vld [vmem:[%s7768_s1 + $0x840] sm:$0xff]  ;;  %v112_v40 = vld [vmem:[%s7767_s0 + $0x2d8] sm:$0xff] }
  0x58   :  { %856 = vmatprep.mubr.f32.mxu0 %v64_v42  ;;  %1287 = vmatpush1.msra.mxu0 %v529_v43  ;;  %v510_v61 = vld [vmem:[%s7768_s1 + $0x848] sm:$0xff]  ;;  %v77_v0 = vld [vmem:[%s7767_s0 + $0x1c0] sm:$0xff]  ;;  %v120_v42 = vld [vmem:[%s7767_s0 + $0x318] sm:$0xff] }
  0x59   :  { %1108 = vmatmul.mubr.f32.gmra.mxu1 %v58_v44  ;;  %1288 = vmatprep.subr.mxu0 %v526_v45  ;;  %v506_v1 = vld [vmem:[%s7768_s1 + $0x828] sm:$0xff]  ;;  %v85_v2 = vld [vmem:[%s7767_s0 + $0x200] sm:$0xff] }
  0x5a   :  { %1113 = vmatprep.mubr.f32.mxu1 %v66_v46  ;;  %1289 = vmatpush1.msra.mxu0 %v525_v47  ;;  %v505_v3 = vld [vmem:[%s7768_s1 + $0x820] sm:$0xff]  ;;  %v502_v5 = vld [vmem:[%s7768_s1 + $0x808] sm:$0xff] }
  0x5b   :  { %857 = vmatmul.mubr.f32.gmra.mxu0 %v63_v48  ;;  %1290 = vmatprep.subr.mxu0 %v522_v49  ;;  %v501_v7 = vld [vmem:[%s7768_s1 + $0x800] sm:$0xff]  ;;  %v626_v9 = vld [vmem:[%s7768_s1 + $0xbe8] sm:$0xff]  ;;  %v119_v48 = vld [vmem:[%s7767_s0 + $0x310] sm:$0xff] }
  0x5c   :  { %862 = vmatprep.mubr.f32.mxu0 %v71_v50  ;;  %1291 = vmatpush1.msra.mxu0 %v521_v51  ;;  %v625_v11 = vld [vmem:[%s7768_s1 + $0xbe0] sm:$0xff]  ;;  %v86_v12 = vld [vmem:[%s7767_s0 + $0x208] sm:$0xff]  ;;  %v127_v50 = vld [vmem:[%s7767_s0 + $0x350] sm:$0xff] }
  0x5d   :  { %1114 = vmatmul.mubr.f32.gmra.mxu1 %v65_v52  ;;  %1292 = vmatprep.subr.mxu0 %v518_v53  ;;  %v630_v13 = vld [vmem:[%s7768_s1 + $0xc08] sm:$0xff]  ;;  %v629_v15 = vld [vmem:[%s7768_s1 + $0xc00] sm:$0xff] }
  0x5e   :  { %1119 = vmatprep.mubr.f32.mxu1 %v73_v54  ;;  %1293 = vmatpush1.msra.mxu0 %v517_v55  ;;  %v94_v14 = vld [vmem:[%s7767_s0 + $0x248] sm:$0xff]  ;;  %v621_v19 = vld [vmem:[%s7768_s1 + $0xbc0] sm:$0xff] }
  0x5f   :  { %863 = vmatmul.mubr.f32.gmra.mxu0 %v70_v56  ;;  %1294 = vmatprep.subr.mxu0 %v514_v57  ;;  %v622_v17 = vld [vmem:[%s7768_s1 + $0xbc8] sm:$0xff]  ;;  %v93_v20 = vld [vmem:[%s7767_s0 + $0x240] sm:$0xff] }
  0x60   :  { %868 = vmatprep.mubr.f32.mxu0 %v78_v58  ;;  %1295 = vmatpush1.msra.mxu0 %v513_v59  ;;  %v618_v21 = vld [vmem:[%s7768_s1 + $0xba8] sm:$0xff]  ;;  %v101_v22 = vld [vmem:[%s7767_s0 + $0x280] sm:$0xff] }
  0x61   :  { %1120 = vmatmul.mubr.f32.gmra.mxu1 %v72_v60  ;;  %1296 = vmatprep.subr.mxu0 %v510_v61  ;;  %v617_v23 = vld [vmem:[%s7768_s1 + $0xba0] sm:$0xff]  ;;  %v98_v24 = vld [vmem:[%s7767_s0 + $0x268] sm:$0xff]  ;;  %v128_v60 = vld [vmem:[%s7767_s0 + $0x358] sm:$0xff] }
  0x62   :  { %1125 = vmatprep.mubr.f32.mxu1 %v80_v62  ;;  %1297 = vmatpush1.msra.mxu0 %v509_v63  ;;  %v614_v25 = vld [vmem:[%s7768_s1 + $0xb88] sm:$0xff]  ;;  %v613_v27 = vld [vmem:[%s7768_s1 + $0xb80] sm:$0xff]  ;;  %v136_v62 = vld [vmem:[%s7767_s0 + $0x398] sm:$0xff] }
  0x63   :  { %869 = vmatmul.mubr.f32.gmra.mxu0 %v77_v0  ;;  %1298 = vmatprep.subr.mxu0 %v506_v1  ;;  %v106_v26 = vld [vmem:[%s7767_s0 + $0x2a8] sm:$0xff]  ;;  %v609_v31 = vld [vmem:[%s7768_s1 + $0xb60] sm:$0xff] }
  0x64   :  { %874 = vmatprep.mubr.f32.mxu0 %v85_v2  ;;  %1299 = vmatpush1.msra.mxu0 %v505_v3  ;;  %v610_v29 = vld [vmem:[%s7768_s1 + $0xb68] sm:$0xff]  ;;  %v105_v32 = vld [vmem:[%s7767_s0 + $0x2a0] sm:$0xff] }
  0x65   :  { %1126 = vmatmul.mubr.f32.gmra.mxu1 %v79_v4  ;;  %1300 = vmatprep.subr.mxu0 %v502_v5  ;;  %v606_v33 = vld [vmem:[%s7768_s1 + $0xb48] sm:$0xff]  ;;  %v113_v34 = vld [vmem:[%s7767_s0 + $0x2e0] sm:$0xff]  ;;  %v135_v4 = vld [vmem:[%s7767_s0 + $0x390] sm:$0xff] }
  0x66   :  { %1131 = vmatprep.mubr.f32.mxu1 %v87_v6  ;;  %1301 = vmatpush1.msra.mxu0 %v501_v7  ;;  %v605_v35 = vld [vmem:[%s7768_s1 + $0xb40] sm:$0xff]  ;;  %v602_v37 = vld [vmem:[%s7768_s1 + $0xb28] sm:$0xff]  ;;  %v143_v6 = vld [vmem:[%s7767_s0 + $0x3d0] sm:$0xff] }
  0x67   :  { %875 = vmatmul.mubr.f32.gmra.mxu0 %v84_v8  ;;  %1302 = vmatprep.subr.mxu0 %v626_v9  ;;  %v601_v39 = vld [vmem:[%s7768_s1 + $0xb20] sm:$0xff]  ;;  %v598_v41 = vld [vmem:[%s7768_s1 + $0xb08] sm:$0xff]  ;;  %v140_v8 = vld [vmem:[%s7767_s0 + $0x3b8] sm:$0xff] }
  0x68   :  { %880 = vmatprep.mubr.f32.mxu0 %v92_v10  ;;  %1303 = vmatpush2.msra.mxu0 %v625_v11  ;;  %v597_v43 = vld [vmem:[%s7768_s1 + $0xb00] sm:$0xff]  ;;  %v114_v44 = vld [vmem:[%s7767_s0 + $0x2e8] sm:$0xff]  ;;  %v148_v10 = vld [vmem:[%s7767_s0 + $0x3f8] sm:$0xff] }
  0x69   :  { %1132 = vmatmul.mubr.f32.gmra.mxu1 %v86_v12  ;;  %1557 = vmatprep.subr.mxu1 %v630_v13  ;;  %v594_v45 = vld [vmem:[%s7768_s1 + $0xae8] sm:$0xff]  ;;  %v593_v47 = vld [vmem:[%s7768_s1 + $0xae0] sm:$0xff]  ;;  %v308_v13 = vld [vmem:[%s7768_s1 + $0x1f8] sm:$0xff] }
  0x6a   :  { %1137 = vmatprep.mubr.f32.mxu1 %v94_v14  ;;  %1558 = vmatpush1.msra.mxu1 %v629_v15  ;;  %v122_v46 = vld [vmem:[%s7767_s0 + $0x328] sm:$0xff]  ;;  %v589_v51 = vld [vmem:[%s7768_s1 + $0xac0] sm:$0xff]  ;;  %v436_v15 = vld [vmem:[%s7768_s1 + $0x5f8] sm:$0xff] }
  0x6b   :  { %881 = vmatmul.mubr.f32.gmra.mxu0 %v91_v16  ;;  %1304 = vmatprep.subr.mxu0 %v622_v17  ;;  %v590_v49 = vld [vmem:[%s7768_s1 + $0xac8] sm:$0xff]  ;;  %v121_v52 = vld [vmem:[%s7767_s0 + $0x320] sm:$0xff]  ;;  %v147_v16 = vld [vmem:[%s7767_s0 + $0x3f0] sm:$0xff] }
  0x6c   :  { %886 = vmatprep.mubr.f32.mxu0 %v99_v18  ;;  %1305 = vmatpush2.msra.mxu0 %v621_v19  ;;  %v586_v53 = vld [vmem:[%s7768_s1 + $0xaa8] sm:$0xff]  ;;  %v129_v54 = vld [vmem:[%s7767_s0 + $0x360] sm:$0xff]  ;;  %v155_v17 = vld [vmem:[%s7767_s0 + $0x430] sm:$0xff] }
  0x6d   :  { %1138 = vmatmul.mubr.f32.gmra.mxu1 %v93_v20  ;;  %1306 = vmatprep.subr.mxu0 %v618_v21  ;;  %v585_v55 = vld [vmem:[%s7768_s1 + $0xaa0] sm:$0xff]  ;;  %v126_v56 = vld [vmem:[%s7767_s0 + $0x348] sm:$0xff] }
  0x6e   :  { %1143 = vmatprep.mubr.f32.mxu1 %v101_v22  ;;  %1307 = vmatpush2.msra.mxu0 %v617_v23  ;;  %v582_v57 = vld [vmem:[%s7768_s1 + $0xa88] sm:$0xff]  ;;  %v581_v59 = vld [vmem:[%s7768_s1 + $0xa80] sm:$0xff]  ;;  %v156_v22 = vld [vmem:[%s7767_s0 + $0x438] sm:$0xff] }
  0x6f   :  { %887 = vmatmul.mubr.f32.gmra.mxu0 %v98_v24  ;;  %1308 = vmatprep.subr.mxu0 %v614_v25  ;;  %v134_v58 = vld [vmem:[%s7767_s0 + $0x388] sm:$0xff]  ;;  %v577_v63 = vld [vmem:[%s7768_s1 + $0xa60] sm:$0xff]  ;;  %v164_v23 = vld [vmem:[%s7767_s0 + $0x478] sm:$0xff] }
  0x70   :  { %892 = vmatprep.mubr.f32.mxu0 %v106_v26  ;;  %1309 = vmatpush2.msra.mxu0 %v613_v27  ;;  %v578_v61 = vld [vmem:[%s7768_s1 + $0xa68] sm:$0xff]  ;;  %v133_v0 = vld [vmem:[%s7767_s0 + $0x380] sm:$0xff]  ;;  %v163_v26 = vld [vmem:[%s7767_s0 + $0x470] sm:$0xff] }
  0x71   :  { %1144 = vmatmul.mubr.f32.gmra.mxu1 %v100_v28  ;;  %1310 = vmatprep.subr.mxu0 %v610_v29  ;;  %v574_v1 = vld [vmem:[%s7768_s1 + $0xa48] sm:$0xff]  ;;  %v141_v2 = vld [vmem:[%s7767_s0 + $0x3c0] sm:$0xff]  ;;  %v171_v27 = vld [vmem:[%s7767_s0 + $0x4b0] sm:$0xff] }
  0x72   :  { %1149 = vmatprep.mubr.f32.mxu1 %v108_v30  ;;  %1311 = vmatpush2.msra.mxu0 %v609_v31  ;;  %v573_v3 = vld [vmem:[%s7768_s1 + $0xa40] sm:$0xff]  ;;  %v570_v5 = vld [vmem:[%s7768_s1 + $0xa28] sm:$0xff]  ;;  %v168_v28 = vld [vmem:[%s7767_s0 + $0x498] sm:$0xff] }
  0x73   :  { %893 = vmatmul.mubr.f32.gmra.mxu0 %v105_v32  ;;  %1312 = vmatprep.subr.mxu0 %v606_v33  ;;  %v569_v7 = vld [vmem:[%s7768_s1 + $0xa20] sm:$0xff]  ;;  %v566_v9 = vld [vmem:[%s7768_s1 + $0xa08] sm:$0xff]  ;;  %v176_v29 = vld [vmem:[%s7767_s0 + $0x4d8] sm:$0xff] }
  0x74   :  { %898 = vmatprep.mubr.f32.mxu0 %v113_v34  ;;  %1313 = vmatpush2.msra.mxu0 %v605_v35  ;;  %v565_v11 = vld [vmem:[%s7768_s1 + $0xa00] sm:$0xff]  ;;  %v142_v12 = vld [vmem:[%s7767_s0 + $0x3c8] sm:$0xff]  ;;  %v175_v32 = vld [vmem:[%s7767_s0 + $0x4d0] sm:$0xff] }
  0x75   :  { %1150 = vmatmul.mubr.f32.gmra.mxu1 %v107_v36  ;;  %1314 = vmatprep.subr.mxu0 %v602_v37  ;;  %v150_v14 = vld [vmem:[%s7767_s0 + $0x408] sm:$0xff]  ;;  %v149_v18 = vld [vmem:[%s7767_s0 + $0x400] sm:$0xff]  ;;  %v183_v33 = vld [vmem:[%s7767_s0 + $0x510] sm:$0xff] }
  0x76   :  { %1155 = vmatprep.mubr.f32.mxu1 %v115_v38  ;;  %1315 = vmatpush2.msra.mxu0 %v601_v39  ;;  %v157_v19 = vld [vmem:[%s7767_s0 + $0x440] sm:$0xff]  ;;  %v154_v20 = vld [vmem:[%s7767_s0 + $0x428] sm:$0xff]  ;;  %v184_v38 = vld [vmem:[%s7767_s0 + $0x518] sm:$0xff] }
  0x77   :  { %899 = vmatmul.mubr.f32.gmra.mxu0 %v112_v40  ;;  %1316 = vmatprep.subr.mxu0 %v598_v41  ;;  %v162_v21 = vld [vmem:[%s7767_s0 + $0x468] sm:$0xff]  ;;  %v161_v24 = vld [vmem:[%s7767_s0 + $0x460] sm:$0xff]  ;;  %v192_v39 = vld [vmem:[%s7767_s0 + $0x558] sm:$0xff] }
  0x78   :  { %904 = vmatprep.mubr.f32.mxu0 %v120_v42  ;;  %1317 = vmatpush2.msra.mxu0 %v597_v43  ;;  %v169_v25 = vld [vmem:[%s7767_s0 + $0x4a0] sm:$0xff]  ;;  %v170_v30 = vld [vmem:[%s7767_s0 + $0x4a8] sm:$0xff]  ;;  %v191_v42 = vld [vmem:[%s7767_s0 + $0x550] sm:$0xff] }
  0x79   :  { %1156 = vmatmul.mubr.f32.gmra.mxu1 %v114_v44  ;;  %1318 = vmatprep.subr.mxu0 %v594_v45  ;;  %v178_v31 = vld [vmem:[%s7767_s0 + $0x4e8] sm:$0xff]  ;;  %v177_v34 = vld [vmem:[%s7767_s0 + $0x4e0] sm:$0xff]  ;;  %v199_v43 = vld [vmem:[%s7767_s0 + $0x590] sm:$0xff] }
  0x7a   :  { %1161 = vmatprep.mubr.f32.mxu1 %v122_v46  ;;  %1319 = vmatpush2.msra.mxu0 %v593_v47  ;;  %v185_v35 = vld [vmem:[%s7767_s0 + $0x520] sm:$0xff]  ;;  %v182_v36 = vld [vmem:[%s7767_s0 + $0x508] sm:$0xff]  ;;  %v196_v44 = vld [vmem:[%s7767_s0 + $0x578] sm:$0xff] }
  0x7b   :  { %905 = vmatmul.mubr.f32.gmra.mxu0 %v119_v48  ;;  %1320 = vmatprep.subr.mxu0 %v590_v49  ;;  %v190_v37 = vld [vmem:[%s7767_s0 + $0x548] sm:$0xff]  ;;  %v189_v40 = vld [vmem:[%s7767_s0 + $0x540] sm:$0xff]  ;;  %v204_v45 = vld [vmem:[%s7767_s0 + $0x5b8] sm:$0xff] }
  0x7c   :  { %910 = vmatprep.mubr.f32.mxu0 %v127_v50  ;;  %1321 = vmatpush2.msra.mxu0 %v589_v51  ;;  %v197_v41 = vld [vmem:[%s7767_s0 + $0x580] sm:$0xff]  ;;  %v198_v46 = vld [vmem:[%s7767_s0 + $0x588] sm:$0xff]  ;;  %v203_v48 = vld [vmem:[%s7767_s0 + $0x5b0] sm:$0xff] }
  0x7d   :  { %1162 = vmatmul.mubr.f32.gmra.mxu1 %v121_v52  ;;  %1322 = vmatprep.subr.mxu0 %v586_v53  ;;  %v206_v47 = vld [vmem:[%s7767_s0 + $0x5c8] sm:$0xff]  ;;  %v211_v49 = vld [vmem:[%s7767_s0 + $0x5f0] sm:$0xff]  ;;  %v205_v50 = vld [vmem:[%s7767_s0 + $0x5c0] sm:$0xff] }
  0x7e   :  { %1167 = vmatprep.mubr.f32.mxu1 %v129_v54  ;;  %1323 = vmatpush2.msra.mxu0 %v585_v55 }
  0x7f   :  { %911 = vmatmul.mubr.f32.gmra.mxu0 %v126_v56  ;;  %1324 = vmatprep.subr.mxu0 %v582_v57 }
  0x80   :  { %916 = vmatprep.mubr.f32.mxu0 %v134_v58  ;;  %1325 = vmatpush2.msra.mxu0 %v581_v59 }
  0x81   :  { %1168 = vmatmul.mubr.f32.gmra.mxu1 %v128_v60  ;;  %1326 = vmatprep.subr.mxu0 %v578_v61 }
  0x82   :  { %1173 = vmatprep.mubr.f32.mxu1 %v136_v62  ;;  %1327 = vmatpush2.msra.mxu0 %v577_v63 }
  0x83   :  { %917 = vmatmul.mubr.f32.gmra.mxu0 %v133_v0  ;;  %1328 = vmatprep.subr.mxu0 %v574_v1 }
  0x84   :  { %922 = vmatprep.mubr.f32.mxu0 %v141_v2  ;;  %1329 = vmatpush2.msra.mxu0 %v573_v3 }
  0x85   :  { %1174 = vmatmul.mubr.f32.gmra.mxu1 %v135_v4  ;;  %1330 = vmatprep.subr.mxu0 %v570_v5 }
  0x86   :  { %1179 = vmatprep.mubr.f32.mxu1 %v143_v6  ;;  %1331 = vmatpush2.msra.mxu0 %v569_v7 }
  0x87   :  { %923 = vmatmul.mubr.f32.gmra.mxu0 %v140_v8  ;;  %1332 = vmatprep.subr.mxu0 %v566_v9 }
  0x88   :  { %928 = vmatprep.mubr.f32.mxu0 %v148_v10  ;;  %1333 = vmatpush2.msra.mxu0 %v565_v11 }
  0x89   :  { %1180 = vmatmul.mubr.f32.gmra.mxu1 %v142_v12  ;;  %1784 = vmatprep.subr.mxu0 %v308_v13 }
  0x8a   :  { %1185 = vmatprep.mubr.f32.mxu1 %v150_v14  ;;  %2041 = vmatprep.subr.mxu1 %v436_v15 }
  0x8b   :  { %929 = vmatmul.mubr.f32.gmra.mxu0 %v147_v16 }
  0x8c   :  { %934 = vmatprep.mubr.f32.mxu0 %v155_v17 }
  0x8d   :  { %1186 = vmatmul.mubr.f32.gmra.mxu1 %v149_v18 }
  0x8e   :  { %1191 = vmatprep.mubr.f32.mxu1 %v157_v19 }
  0x8f   :  { %935 = vmatmul.mubr.f32.gmra.mxu0 %v154_v20 }
  0x90   :  { %940 = vmatprep.mubr.f32.mxu0 %v162_v21 }
  0x91   :  { %1192 = vmatmul.mubr.f32.gmra.mxu1 %v156_v22 }
  0x92   :  { %1197 = vmatprep.mubr.f32.mxu1 %v164_v23 }
  0x93   :  { %941 = vmatmul.mubr.f32.gmra.mxu0 %v161_v24 }
  0x94   :  { %946 = vmatprep.mubr.f32.mxu0 %v169_v25 }
  0x95   :  { %1198 = vmatmul.mubr.f32.gmra.mxu1 %v163_v26 }
  0x96   :  { %1203 = vmatprep.mubr.f32.mxu1 %v171_v27 }
  0x97   :  { %947 = vmatmul.mubr.f32.gmra.mxu0 %v168_v28 }
  0x98   :  { %952 = vmatprep.mubr.f32.mxu0 %v176_v29 }
  0x99   :  { %1204 = vmatmul.mubr.f32.gmra.mxu1 %v170_v30 }
  0x9a   :  { %1209 = vmatprep.mubr.f32.mxu1 %v178_v31 }
  0x9b   :  { %953 = vmatmul.mubr.f32.gmra.mxu0 %v175_v32 }
  0x9c   :  { %958 = vmatprep.mubr.f32.mxu0 %v183_v33 }
  0x9d   :  { %1210 = vmatmul.mubr.f32.gmra.mxu1 %v177_v34 }
  0x9e   :  { %1215 = vmatprep.mubr.f32.mxu1 %v185_v35 }
  0x9f   :  { %959 = vmatmul.mubr.f32.gmra.mxu0 %v182_v36 }
  0xa0   :  { %964 = vmatprep.mubr.f32.mxu0 %v190_v37 }
  0xa1   :  { %1216 = vmatmul.mubr.f32.gmra.mxu1 %v184_v38 }
  0xa2   :  { %1221 = vmatprep.mubr.f32.mxu1 %v192_v39 }
  0xa3   :  { %965 = vmatmul.mubr.f32.gmra.mxu0 %v189_v40 }
  0xa4   :  { %970 = vmatprep.mubr.f32.mxu0 %v197_v41 }
  0xa5   :  { %1222 = vmatmul.mubr.f32.gmra.mxu1 %v191_v42 }
  0xa6   :  { %1227 = vmatprep.mubr.f32.mxu1 %v199_v43 }
  0xa7   :  { %971 = vmatmul.mubr.f32.gmra.mxu0 %v196_v44 }
  0xa8   :  { %976 = vmatprep.mubr.f32.mxu0 %v204_v45 }
  0xa9   :  { %1228 = vmatmul.mubr.f32.gmra.mxu1 %v198_v46 }
  0xaa   :  { %1233 = vmatprep.mubr.f32.mxu1 %v206_v47 }
  0xab   :  { %10 = vsyncpa [#allocation3], 0  ;;  %977 = vmatmul.mubr.f32.gmra.mxu0 %v203_v48  ;;  %v213_v51 = vld [vmem:[%s7767_s0 + $0x600] sm:$0xff]  ;;  %v210_v52 = vld [vmem:[%s7767_s0 + $0x5e8] sm:$0xff]  ;;  %v7773_v10 = vmov 0.0   ;;  %vm659_vm0 = vcmask 130048  }
  0xac   :  { %982 = vmatprep.mubr.f32.mxu0 %v211_v49  ;;  %v218_v53 = vld [vmem:[%s7767_s0 + $0x628] sm:$0xff]  ;;  %v212_v54 = vld [vmem:[%s7767_s0 + $0x5f8] sm:$0xff]  ;;  %v217_v56 = vld [vmem:[%s7767_s0 + $0x620] sm:$0xff] }
  0xad   :  { %1234 = vmatmul.mubr.f32.gmra.mxu1 %v205_v50  ;;  %v220_v55 = vld [vmem:[%s7767_s0 + $0x638] sm:$0xff]  ;;  %v225_v57 = vld [vmem:[%s7767_s0 + $0x660] sm:$0xff]  ;;  %v219_v58 = vld [vmem:[%s7767_s0 + $0x630] sm:$0xff] }
  0xae   :  { %1239 = vmatprep.mubr.f32.mxu1 %v213_v51  ;;  %v227_v59 = vld [vmem:[%s7767_s0 + $0x670] sm:$0xff]  ;;  %v224_v60 = vld [vmem:[%s7767_s0 + $0x658] sm:$0xff]  ;;  %v226_v62 = vld [vmem:[%s7767_s0 + $0x668] sm:$0xff] }
  0xaf   :  { %983 = vmatmul.mubr.f32.gmra.mxu0 %v210_v52  ;;  %v232_v61 = vld [vmem:[%s7767_s0 + $0x698] sm:$0xff]  ;;  %v234_v63 = vld [vmem:[%s7767_s0 + $0x6a8] sm:$0xff]  ;;  %v231_v0 = vld [vmem:[%s7767_s0 + $0x690] sm:$0xff] }
  0xb0   :  { %988 = vmatprep.mubr.f32.mxu0 %v218_v53  ;;  %v239_v1 = vld [vmem:[%s7767_s0 + $0x6d0] sm:$0xff]  ;;  %v233_v2 = vld [vmem:[%s7767_s0 + $0x6a0] sm:$0xff]  ;;  %v238_v4 = vld [vmem:[%s7767_s0 + $0x6c8] sm:$0xff] }
  0xb1   :  { %1240 = vmatmul.mubr.f32.gmra.mxu1 %v212_v54  ;;  %v241_v3 = vld [vmem:[%s7767_s0 + $0x6e0] sm:$0xff]  ;;  %v26_v5 = vld [vmem:[%s7767_s0 + $0x28] sm:$0xff]  ;;  %v240_v6 = vld [vmem:[%s7767_s0 + $0x6d8] sm:$0xff] }
  0xb2   :  { %1245 = vmatprep.mubr.f32.mxu1 %v220_v55  ;;  %v25_v7 = vld [vmem:[%s7767_s0 + $0x20] sm:$0xff]  ;;  %v307_v8 = vld [vmem:[%s7768_s1 + $0x1f0] sm:$0xff]  ;;  %v304_v12 = vld [vmem:[%s7768_s1 + $0x1d8] sm:$0xff] }
  0xb3   :  { %989 = vmatmul.mubr.f32.gmra.mxu0 %v217_v56  ;;  %v33_v9 = vld [vmem:[%s7767_s0 + $0x60] sm:$0xff]  ;;  %v27_v11 = vld [vmem:[%s7767_s0 + $0x30] sm:$0xff]  ;;  %v32_v14 = vld [vmem:[%s7767_s0 + $0x58] sm:$0xff] }
  0xb4   :  { %994 = vmatprep.mubr.f32.mxu0 %v225_v57  ;;  %v435_v13 = vld [vmem:[%s7768_s1 + $0x5f0] sm:$0xff]  ;;  %v432_v15 = vld [vmem:[%s7768_s1 + $0x5d8] sm:$0xff]  ;;  %v34_v18 = vld [vmem:[%s7767_s0 + $0x68] sm:$0xff] }
  0xb5   :  { %1246 = vmatmul.mubr.f32.gmra.mxu1 %v219_v58  ;;  %v303_v16 = vld [vmem:[%s7768_s1 + $0x1d0] sm:$0xff]  ;;  %v40_v17 = vld [vmem:[%s7767_s0 + $0x98] sm:$0xff]  ;;  %v41_v25 = vld [vmem:[%s7767_s0 + $0xa0] sm:$0xff] }
  0xb6   :  { %1251 = vmatprep.mubr.f32.mxu1 %v227_v59  ;;  %v300_v19 = vld [vmem:[%s7768_s1 + $0x1b8] sm:$0xff]  ;;  %v431_v20 = vld [vmem:[%s7768_s1 + $0x5d0] sm:$0xff]  ;;  %v46_v28 = vld [vmem:[%s7767_s0 + $0xc8] sm:$0xff] }
  0xb7   :  { %995 = vmatmul.mubr.f32.gmra.mxu0 %v224_v60  ;;  %v39_v21 = vld [vmem:[%s7767_s0 + $0x90] sm:$0xff]  ;;  %v428_v22 = vld [vmem:[%s7768_s1 + $0x5b8] sm:$0xff]  ;;  %v54_v31 = vld [vmem:[%s7767_s0 + $0x108] sm:$0xff] }
  0xb8   :  { %1000 = vmatprep.mubr.f32.mxu0 %v232_v61  ;;  %v299_v23 = vld [vmem:[%s7768_s1 + $0x1b0] sm:$0xff]  ;;  %v296_v26 = vld [vmem:[%s7768_s1 + $0x198] sm:$0xff]  ;;  %v53_v35 = vld [vmem:[%s7767_s0 + $0x100] sm:$0xff] }
  0xb9   :  { %1252 = vmatmul.mubr.f32.gmra.mxu1 %v226_v62  ;;  %v47_v24 = vld [vmem:[%s7767_s0 + $0xd0] sm:$0xff]  ;;  %v424_v29 = vld [vmem:[%s7768_s1 + $0x598] sm:$0xff]  ;;  %v61_v38 = vld [vmem:[%s7767_s0 + $0x140] sm:$0xff] }
  0xba   :  { %1257 = vmatprep.mubr.f32.mxu1 %v234_v63  ;;  %v427_v27 = vld [vmem:[%s7768_s1 + $0x5b0] sm:$0xff]  ;;  %v48_v32 = vld [vmem:[%s7767_s0 + $0xd8] sm:$0xff]  ;;  %v62_v46 = vld [vmem:[%s7767_s0 + $0x148] sm:$0xff] }
  0xbb   :  { %1001 = vmatmul.mubr.f32.gmra.mxu0 %v231_v0  ;;  %v295_v30 = vld [vmem:[%s7768_s1 + $0x190] sm:$0xff]  ;;  %v292_v33 = vld [vmem:[%s7768_s1 + $0x178] sm:$0xff]  ;;  %v69_v53 = vld [vmem:[%s7767_s0 + $0x180] sm:$0xff] }
  0xbc   :  { %1006 = vmatprep.mubr.f32.mxu0 %v239_v1  ;;  %v423_v34 = vld [vmem:[%s7768_s1 + $0x590] sm:$0xff]  ;;  %v420_v36 = vld [vmem:[%s7768_s1 + $0x578] sm:$0xff]  ;;  %v74_v56 = vld [vmem:[%s7767_s0 + $0x1a8] sm:$0xff] }
  0xbd   :  { %1258 = vmatmul.mubr.f32.gmra.mxu1 %v233_v2  ;;  %v291_v37 = vld [vmem:[%s7768_s1 + $0x170] sm:$0xff]  ;;  %v288_v40 = vld [vmem:[%s7768_s1 + $0x158] sm:$0xff]  ;;  %v82_v59 = vld [vmem:[%s7767_s0 + $0x1e8] sm:$0xff] }
  0xbe   :  { %1263 = vmatprep.mubr.f32.mxu1 %v241_v3  ;;  %v55_v39 = vld [vmem:[%s7767_s0 + $0x110] sm:$0xff]  ;;  %v60_v42 = vld [vmem:[%s7767_s0 + $0x138] sm:$0xff]  ;;  %v81_v63 = vld [vmem:[%s7767_s0 + $0x1e0] sm:$0xff] }
  0xbf   :  { %1007 = vmatmul.mubr.f32.gmra.mxu0 %v238_v4  ;;  %v419_v41 = vld [vmem:[%s7768_s1 + $0x570] sm:$0xff]  ;;  %v416_v43 = vld [vmem:[%s7768_s1 + $0x558] sm:$0xff]  ;;  %v89_v2 = vld [vmem:[%s7767_s0 + $0x220] sm:$0xff] }
  0xc0   :  { %1334 = vmatprep.mubr.f32.mxu0 %v26_v5  ;;  %v287_v44 = vld [vmem:[%s7768_s1 + $0x150] sm:$0xff]  ;;  %v68_v45 = vld [vmem:[%s7767_s0 + $0x178] sm:$0xff] }
  0xc1   :  { %1264 = vmatmul.mubr.f32.gmra.mxu1 %v240_v6  ;;  %v284_v47 = vld [vmem:[%s7768_s1 + $0x138] sm:$0xff]  ;;  %v415_v48 = vld [vmem:[%s7768_s1 + $0x550] sm:$0xff] }
  0xc2   :  { %1591 = vmatprep.mubr.f32.mxu1 %v7773_v10  ;;  %v67_v49 = vld [vmem:[%s7767_s0 + $0x170] sm:$0xff]  ;;  %v412_v50 = vld [vmem:[%s7768_s1 + $0x538] sm:$0xff] }
  0xc3   :  { %1335 = vmatmul.mubr.f32.vlgmr.msra.gmra.mxu0 %v25_v7  ;;  %v283_v51 = vld [vmem:[%s7768_s1 + $0x130] sm:$0xff]  ;;  %v280_v54 = vld [vmem:[%s7768_s1 + $0x118] sm:$0xff] }
  0xc4   :  { %1785 = vmatpush1.msra.mxu0 %v307_v8  ;;  %1340 = vmatprep.mubr.f32.mxu0 %v33_v9  ;;  %v75_v52 = vld [vmem:[%s7767_s0 + $0x1b0] sm:$0xff]  ;;  %v408_v57 = vld [vmem:[%s7768_s1 + $0x518] sm:$0xff] }
  0xc5   :  { %3591 = vmatmul.mubr.msk.f32.vlgmr.msra.gmra.mxu1 %vm659_vm0, %v27_v11  ;;  %1786 = vmatprep.subr.mxu0 %v304_v12  ;;  %v411_v55 = vld [vmem:[%s7768_s1 + $0x530] sm:$0xff]  ;;  %v76_v60 = vld [vmem:[%s7767_s0 + $0x1b8] sm:$0xff]  ;;  %v90_v11 = vld [vmem:[%s7767_s0 + $0x228] sm:$0xff] }
  0xc6   :  { %2042 = vmatpush1.msra.mxu1 %v435_v13  ;;  %1597 = vmatprep.mubr.f32.mxu1 %v7773_v10  ;;  %v279_v58 = vld [vmem:[%s7768_s1 + $0x110] sm:$0xff]  ;;  %v276_v61 = vld [vmem:[%s7768_s1 + $0xf8] sm:$0xff] }
  0xc7   :  { %1341 = vmatmul.mubr.f32.gmra.mxu0 %v32_v14  ;;  %2043 = vmatprep.subr.mxu1 %v432_v15  ;;  %v407_v62 = vld [vmem:[%s7768_s1 + $0x510] sm:$0xff]  ;;  %v404_v0 = vld [vmem:[%s7768_s1 + $0x4f8] sm:$0xff] }
  0xc8   :  { %1787 = vmatpush1.msra.mxu0 %v303_v16  ;;  %1346 = vmatprep.mubr.f32.mxu0 %v40_v17  ;;  %v275_v1 = vld [vmem:[%s7768_s1 + $0xf0] sm:$0xff]  ;;  %v272_v4 = vld [vmem:[%s7768_s1 + $0xd8] sm:$0xff] }
  0xc9   :  { %3592 = vmatmul.mubr.msk.f32.gmra.mxu1 %vm659_vm0, %v34_v18  ;;  %1788 = vmatprep.subr.mxu0 %v300_v19  ;;  %v83_v3 = vld [vmem:[%s7767_s0 + $0x1f0] sm:$0xff]  ;;  %v88_v6 = vld [vmem:[%s7767_s0 + $0x218] sm:$0xff]  ;;  %v97_v18 = vld [vmem:[%s7767_s0 + $0x260] sm:$0xff] }
  0xca   :  { %2044 = vmatpush1.msra.mxu1 %v431_v20  ;;  %1603 = vmatprep.mubr.f32.mxu1 %v7773_v10  ;;  %v403_v5 = vld [vmem:[%s7768_s1 + $0x4f0] sm:$0xff]  ;;  %v400_v7 = vld [vmem:[%s7768_s1 + $0x4d8] sm:$0xff] }
  0xcb   :  { %1347 = vmatmul.mubr.f32.gmra.mxu0 %v39_v21  ;;  %2045 = vmatprep.subr.mxu1 %v428_v22  ;;  %v271_v8 = vld [vmem:[%s7768_s1 + $0xd0] sm:$0xff]  ;;  %v96_v9 = vld [vmem:[%s7767_s0 + $0x258] sm:$0xff]  ;;  %v102_v21 = vld [vmem:[%s7767_s0 + $0x288] sm:$0xff] }
  0xcc   :  { %1789 = vmatpush1.msra.mxu0 %v299_v23  ;;  %1352 = vmatprep.mubr.f32.mxu0 %v47_v24  ;;  %v268_v12 = vld [vmem:[%s7768_s1 + $0xb8] sm:$0xff]  ;;  %v399_v13 = vld [vmem:[%s7768_s1 + $0x4d0] sm:$0xff]  ;;  %v110_v24 = vld [vmem:[%s7767_s0 + $0x2c8] sm:$0xff] }
  0xcd   :  { %3593 = vmatmul.mubr.msk.f32.gmra.mxu1 %vm659_vm0, %v41_v25  ;;  %1790 = vmatprep.subr.mxu0 %v296_v26  ;;  %v95_v14 = vld [vmem:[%s7767_s0 + $0x250] sm:$0xff]  ;;  %v396_v15 = vld [vmem:[%s7768_s1 + $0x4b8] sm:$0xff] }
  0xce   :  { %2046 = vmatpush1.msra.mxu1 %v427_v27  ;;  %1609 = vmatprep.mubr.f32.mxu1 %v7773_v10  ;;  %v267_v16 = vld [vmem:[%s7768_s1 + $0xb0] sm:$0xff]  ;;  %v264_v19 = vld [vmem:[%s7768_s1 + $0x98] sm:$0xff] }
  0xcf   :  { %1353 = vmatmul.mubr.f32.gmra.mxu0 %v46_v28  ;;  %2047 = vmatprep.subr.mxu1 %v424_v29  ;;  %v103_v17 = vld [vmem:[%s7767_s0 + $0x290] sm:$0xff]  ;;  %v392_v22 = vld [vmem:[%s7768_s1 + $0x498] sm:$0xff]  ;;  %v109_v28 = vld [vmem:[%s7767_s0 + $0x2c0] sm:$0xff] }
  0xd0   :  { %1791 = vmatpush1.msra.mxu0 %v295_v30  ;;  %1358 = vmatprep.mubr.f32.mxu0 %v54_v31  ;;  %v395_v20 = vld [vmem:[%s7768_s1 + $0x4b0] sm:$0xff]  ;;  %v104_v25 = vld [vmem:[%s7767_s0 + $0x298] sm:$0xff]  ;;  %v117_v31 = vld [vmem:[%s7767_s0 + $0x300] sm:$0xff] }
  0xd1   :  { %3594 = vmatmul.mubr.msk.f32.gmra.mxu1 %vm659_vm0, %v48_v32  ;;  %1792 = vmatprep.subr.mxu0 %v292_v33  ;;  %v263_v23 = vld [vmem:[%s7768_s1 + $0x90] sm:$0xff]  ;;  %v260_v26 = vld [vmem:[%s7768_s1 + $0x78] sm:$0xff] }
  0xd2   :  { %2048 = vmatpush1.msra.mxu1 %v423_v34  ;;  %1615 = vmatprep.mubr.f32.mxu1 %v7773_v10  ;;  %v391_v27 = vld [vmem:[%s7768_s1 + $0x490] sm:$0xff]  ;;  %v388_v29 = vld [vmem:[%s7768_s1 + $0x478] sm:$0xff] }
  0xd3   :  { %1359 = vmatmul.mubr.f32.gmra.mxu0 %v53_v35  ;;  %2049 = vmatprep.subr.mxu1 %v420_v36  ;;  %v259_v30 = vld [vmem:[%s7768_s1 + $0x70] sm:$0xff]  ;;  %v256_v33 = vld [vmem:[%s7768_s1 + $0x58] sm:$0xff] }
  0xd4   :  { %1793 = vmatpush1.msra.mxu0 %v291_v37  ;;  %1364 = vmatprep.mubr.f32.mxu0 %v61_v38  ;;  %v111_v32 = vld [vmem:[%s7767_s0 + $0x2d0] sm:$0xff]  ;;  %v116_v35 = vld [vmem:[%s7767_s0 + $0x2f8] sm:$0xff]  ;;  %v639_v37 = vlaneseq }
  0xd5   :  { %3595 = vmatmul.mubr.msk.f32.gmra.mxu1 %vm659_vm0, %v55_v39  ;;  %1794 = vmatprep.subr.mxu0 %v288_v40  ;;  %v387_v34 = vld [vmem:[%s7768_s1 + $0x470] sm:$0xff]  ;;  %v384_v36 = vld [vmem:[%s7768_s1 + $0x458] sm:$0xff]  ;;  %v118_v40 = vld [vmem:[%s7767_s0 + $0x308] sm:$0xff] }
  0xd6   :  { %2050 = vmatpush1.msra.mxu1 %v419_v41  ;;  %1621 = vmatprep.mubr.f32.mxu1 %v7773_v10  ;;  %v255_v38 = vld [vmem:[%s7768_s1 + $0x50] sm:$0xff]  ;;  %v124_v39 = vld [vmem:[%s7767_s0 + $0x338] sm:$0xff] }
  0xd7   :  { %1365 = vmatmul.mubr.f32.gmra.mxu0 %v60_v42  ;;  %2051 = vmatprep.subr.mxu1 %v416_v43  ;;  %v252_v41 = vld [vmem:[%s7768_s1 + $0x38] sm:$0xff]  ;;  %v383_v42 = vld [vmem:[%s7768_s1 + $0x450] sm:$0xff] }
  0xd8   :  { %1795 = vmatpush1.msra.mxu0 %v287_v44  ;;  %1370 = vmatprep.mubr.f32.mxu0 %v68_v45  ;;  %v123_v43 = vld [vmem:[%s7767_s0 + $0x330] sm:$0xff]  ;;  %v380_v44 = vld [vmem:[%s7768_s1 + $0x438] sm:$0xff]  ;;  %v5278_v45 = vshrl.u32 %v639_v37, 7 }
  0xd9   :  { %3596 = vmatmul.mubr.msk.f32.gmra.mxu1 %vm659_vm0, %v62_v46  ;;  %1796 = vmatprep.subr.mxu0 %v284_v47  ;;  %v251_v46 = vld [vmem:[%s7768_s1 + $0x30] sm:$0xff] }
  0xda   :  { %2052 = vmatpush1.msra.mxu1 %v415_v48  ;;  %1627 = vmatprep.mubr.f32.mxu1 %v7773_v10  ;;  %7777 = vst [vmem:[#allocation5_spill] sm:$0xff] %v5278_v45  ;;  %v131_v47 = vld [vmem:[%s7767_s0 + $0x370] sm:$0xff]  ;;  %v125_v48 = vld [vmem:[%s7767_s0 + $0x340] sm:$0xff] }
  0xdb   :  { %1371 = vmatmul.mubr.f32.gmra.mxu0 %v67_v49  ;;  %2053 = vmatprep.subr.mxu1 %v412_v50  ;;  %v248_v49 = vld [vmem:[%s7768_s1 + $0x18] sm:$0xff]  ;;  %v379_v50 = vld [vmem:[%s7768_s1 + $0x430] sm:$0xff] }
  0xdc   :  { %1797 = vmatpush1.msra.mxu0 %v283_v51  ;;  %1376 = vmatprep.mubr.f32.mxu0 %v75_v52  ;;  %v130_v51 = vld [vmem:[%s7767_s0 + $0x368] sm:$0xff]  ;;  %v376_v52 = vld [vmem:[%s7768_s1 + $0x418] sm:$0xff] }
  0xdd   :  { %3597 = vmatmul.mubr.msk.f32.gmra.mxu1 %vm659_vm0, %v69_v53  ;;  %1798 = vmatprep.subr.mxu0 %v280_v54  ;;  %v641_v53 = vsub.s32 0, %v5278_v45  ;;  %v247_v54 = vld [vmem:[%s7768_s1 + $0x10] sm:$0xff] }
  0xde   :  { %2054 = vmatpush1.msra.mxu1 %v411_v55  ;;  %1633 = vmatprep.mubr.f32.mxu1 %v7773_v10  ;;  %v138_v55 = vld [vmem:[%s7767_s0 + $0x3a8] sm:$0xff] }
  0xdf   :  { %1377 = vmatmul.mubr.f32.gmra.mxu0 %v74_v56  ;;  %2055 = vmatprep.subr.mxu1 %v408_v57  ;;  %v637_v56 = vld [vmem:[%s7769_s2] sm:$0xf]  ;;  %v132_v57 = vld [vmem:[%s7767_s0 + $0x378] sm:$0xff] }
  0xe0   :  { %1799 = vmatpush1.msra.mxu0 %v279_v58  ;;  %1382 = vmatprep.mubr.f32.mxu0 %v82_v59  ;;  %v372_v58 = vld [vmem:[%s7768_s1 + $0x3f8] sm:$0xff]  ;;  %v645_v59 = vsub.s32 1, %v5278_v45  ;;  %v3734_v45 = vld [vmem:[%s7767_s0 + $0x230] sm:$0xff] }
  0xe1   :  { %3598 = vmatmul.mubr.msk.f32.gmra.mxu1 %vm659_vm0, %v76_v60  ;;  %1800 = vmatprep.subr.mxu0 %v276_v61  ;;  %v375_v60 = vld [vmem:[%s7768_s1 + $0x410] sm:$0xff]  ;;  %v5325_v61 = vrot.slane %v637_v56, %v641_v53 }
  0xe2   :  { %2056 = vmatpush1.msra.mxu1 %v407_v62  ;;  %1639 = vmatprep.mubr.f32.mxu1 %v7773_v10  ;;  %v137_v62 = vld [vmem:[%s7767_s0 + $0x3a0] sm:$0xff] }
  0xe3   :  { %1383 = vmatmul.mubr.f32.gmra.mxu0 %v81_v63  ;;  %2057 = vmatprep.subr.mxu1 %v404_v0  ;;  %v500_v63 = vld [vmem:[%s7768_s1 + $0x7f8] sm:$0xff]  ;;  %v371_v0 = vld [vmem:[%s7768_s1 + $0x3f0] sm:$0xff] }
  0xe4   :  { %1801 = vmatpush1.msra.mxu0 %v275_v1  ;;  %1388 = vmatprep.mubr.f32.mxu0 %v89_v2  ;;  %v145_v1 = vld [vmem:[%s7767_s0 + $0x3e0] sm:$0xff]  ;;  %v139_v2 = vld [vmem:[%s7767_s0 + $0x3b0] sm:$0xff] }
  0xe5   :  { %3599 = vmatmul.mubr.msk.f32.gmra.mxu1 %vm659_vm0, %v83_v3  ;;  %1802 = vmatprep.subr.mxu0 %v272_v4  ;;  %v5344_v3 = vrot.slane %v637_v56, %v645_v59  ;;  %v368_v4 = vld [vmem:[%s7768_s1 + $0x3d8] sm:$0xff]  ;;  %v355_v59 = vld [vmem:[%s7768_s1 + $0x370] sm:$0xff] }
  0xe6   :  { %2058 = vmatpush1.msra.mxu1 %v403_v5  ;;  %1645 = vmatprep.mubr.f32.mxu1 %v7773_v10  ;;  %v484_v56 = vld [vmem:[%s7768_s1 + $0x778] sm:$0xff] }
  0xe7   :  { %1389 = vmatmul.mubr.f32.gmra.mxu0 %v88_v6  ;;  %2059 = vmatprep.subr.mxu1 %v400_v7  ;;  %v499_v6 = vld [vmem:[%s7768_s1 + $0x7f0] sm:$0xff] }
  0xe8   :  { %1803 = vmatpush1.msra.mxu0 %v271_v8  ;;  %1394 = vmatprep.mubr.f32.mxu0 %v96_v9  ;;  %v144_v8 = vld [vmem:[%s7767_s0 + $0x3d8] sm:$0xff] }
  0xe9   :  { %3600 = vmatmul.mubr.msk.f32.gmra.mxu1 %vm659_vm0, %v90_v11  ;;  %1804 = vmatprep.subr.mxu0 %v268_v12  ;;  %v496_v9 = vld [vmem:[%s7768_s1 + $0x7d8] sm:$0xff] }
  0xea   :  { %2060 = vmatpush1.msra.mxu1 %v399_v13  ;;  %1651 = vmatprep.mubr.f32.mxu1 %v7773_v10  ;;  %v367_v13 = vld [vmem:[%s7768_s1 + $0x3d0] sm:$0xff] }
  0xeb   :  { %1395 = vmatmul.mubr.f32.gmra.mxu0 %v95_v14  ;;  %2061 = vmatprep.subr.mxu1 %v396_v15  ;;  %v152_v14 = vld [vmem:[%s7767_s0 + $0x418] sm:$0xff] }
  0xec   :  { %1805 = vmatpush1.msra.mxu0 %v267_v16  ;;  %1400 = vmatprep.mubr.f32.mxu0 %v103_v17  ;;  %v146_v17 = vld [vmem:[%s7767_s0 + $0x3e8] sm:$0xff] }
  0xed   :  { %3601 = vmatmul.mubr.msk.f32.gmra.mxu1 %vm659_vm0, %v97_v18  ;;  %1806 = vmatprep.subr.mxu0 %v264_v19  ;;  %v364_v18 = vld [vmem:[%s7768_s1 + $0x3b8] sm:$0xff] }
  0xee   :  { %2062 = vmatpush1.msra.mxu1 %v395_v20  ;;  %1657 = vmatprep.mubr.f32.mxu1 %v7773_v10 }
  0xef   :  { %1401 = vmatmul.mubr.f32.gmra.mxu0 %v102_v21  ;;  %2063 = vmatprep.subr.mxu1 %v392_v22  ;;  %v495_v21 = vld [vmem:[%s7768_s1 + $0x7d0] sm:$0xff] }
  0xf0   :  { %1807 = vmatpush1.msra.mxu0 %v263_v23  ;;  %1406 = vmatprep.mubr.f32.mxu0 %v110_v24  ;;  %v151_v24 = vld [vmem:[%s7767_s0 + $0x410] sm:$0xff] }
  0xf1   :  { %3602 = vmatmul.mubr.msk.f32.gmra.mxu1 %vm659_vm0, %v104_v25  ;;  %1808 = vmatprep.subr.mxu0 %v260_v26  ;;  %v492_v25 = vld [vmem:[%s7768_s1 + $0x7b8] sm:$0xff] }
  0xf2   :  { %2064 = vmatpush1.msra.mxu1 %v391_v27  ;;  %1663 = vmatprep.mubr.f32.mxu1 %v7773_v10 }
  0xf3   :  { %1407 = vmatmul.mubr.f32.gmra.mxu0 %v109_v28  ;;  %2065 = vmatprep.subr.mxu1 %v388_v29  ;;  %v363_v28 = vld [vmem:[%s7768_s1 + $0x3b0] sm:$0xff] }
  0xf4   :  { %1809 = vmatpush1.msra.mxu0 %v259_v30  ;;  %1412 = vmatprep.mubr.f32.mxu0 %v117_v31  ;;  %v159_v29 = vld [vmem:[%s7767_s0 + $0x450] sm:$0xff] }
  0xf5   :  { %3603 = vmatmul.mubr.msk.f32.gmra.mxu1 %vm659_vm0, %v111_v32  ;;  %1810 = vmatprep.subr.mxu0 %v256_v33  ;;  %v153_v32 = vld [vmem:[%s7767_s0 + $0x420] sm:$0xff]  ;;  %v360_v33 = vld [vmem:[%s7768_s1 + $0x398] sm:$0xff] }
  0xf6   :  { %2066 = vmatpush1.msra.mxu1 %v387_v34  ;;  %1669 = vmatprep.mubr.f32.mxu1 %v7773_v10 }
  0xf7   :  { %1413 = vmatmul.mubr.f32.gmra.mxu0 %v116_v35  ;;  %2067 = vmatprep.subr.mxu1 %v384_v36  ;;  %v491_v36 = vld [vmem:[%s7768_s1 + $0x7b0] sm:$0xff] }
  0xf8   :  { %1811 = vmatpush1.msra.mxu0 %v255_v38  ;;  %1418 = vmatprep.mubr.f32.mxu0 %v124_v39  ;;  %v158_v39 = vld [vmem:[%s7767_s0 + $0x448] sm:$0xff] }
  0xf9   :  { %3604 = vmatmul.mubr.msk.f32.gmra.mxu1 %vm659_vm0, %v118_v40  ;;  %1812 = vmatprep.subr.mxu0 %v252_v41  ;;  %v488_v40 = vld [vmem:[%s7768_s1 + $0x798] sm:$0xff] }
  0xfa   :  { %2068 = vmatpush1.msra.mxu1 %v383_v42  ;;  %1675 = vmatprep.mubr.f32.mxu1 %v7773_v10 }
  0xfb   :  { %1419 = vmatmul.mubr.f32.gmra.mxu0 %v123_v43  ;;  %2069 = vmatprep.subr.mxu1 %v380_v44  ;;  %v359_v43 = vld [vmem:[%s7768_s1 + $0x390] sm:$0xff]  ;;  %v166_v44 = vld [vmem:[%s7767_s0 + $0x488] sm:$0xff] }
  0xfc   :  { %1813 = vmatpush1.msra.mxu0 %v251_v46  ;;  %1424 = vmatprep.mubr.f32.mxu0 %v131_v47 }
  0xfd   :  { %3605 = vmatmul.mubr.msk.f32.gmra.mxu1 %vm659_vm0, %v125_v48  ;;  %1814 = vmatprep.subr.mxu0 %v248_v49  ;;  %v160_v48 = vld [vmem:[%s7767_s0 + $0x458] sm:$0xff] }
  0xfe   :  { %2070 = vmatpush1.msra.mxu1 %v379_v50  ;;  %1681 = vmatprep.mubr.f32.mxu1 %v7773_v10  ;;  %v356_v49 = vld [vmem:[%s7768_s1 + $0x378] sm:$0xff] }
  0xff   :  { %1425 = vmatmul.mubr.f32.gmra.mxu0 %v130_v51  ;;  %2071 = vmatprep.subr.mxu1 %v376_v52  ;;  %v487_v52 = vld [vmem:[%s7768_s1 + $0x790] sm:$0xff] }
 0x100   :  { %1815 = vmatpush1.msra.mxu0 %v247_v54  ;;  %1430 = vmatprep.mubr.f32.mxu0 %v138_v55  ;;  %v165_v55 = vld [vmem:[%s7767_s0 + $0x480] sm:$0xff] }
 0x101   :  { %3606 = vmatmul.mubr.msk.f32.gmra.mxu1 %vm659_vm0, %v132_v57  ;;  %1816 = vmatprep.subr.mxu0 %v372_v58 }
 0x102   :  { %2072 = vmatpush1.msra.mxu1 %v375_v60  ;;  %1687 = vmatprep.mubr.f32.mxu1 %v7773_v10  ;;  %v822_v5 = vpop.f32.mrf.mxu0  ;;  %v173_v60 = vld [vmem:[%s7767_s0 + $0x4c0] sm:$0xff] }
 0x103   :  { %1431 = vmatmul.mubr.f32.gmra.mxu0 %v137_v62  ;;  %2073 = vmatprep.subr.mxu1 %v500_v63  ;;  %v823_v7 = vadd.f32 %v822_v5, %v5325_v61  ;;  %v483_v5 = vld [vmem:[%s7768_s1 + $0x770] sm:$0xff] }
 0x104   :  { %1817 = vmatpush2.msra.mxu0 %v371_v0  ;;  %1436 = vmatprep.mubr.f32.mxu0 %v145_v1  ;;  %v1079_v11 = vpop.f32.mrf.mxu1  ;;  %v824_v12 = vpop.f32.mrf.mxu0  ;;  %v167_v0 = vld [vmem:[%s7767_s0 + $0x490] sm:$0xff]  ;;  %v352_v1 = vld [vmem:[%s7768_s1 + $0x358] sm:$0xff] }
 0x105   :  { %3607 = vmatmul.mubr.msk.f32.gmra.mxu1 %vm659_vm0, %v139_v2  ;;  %1818 = vmatprep.subr.mxu0 %v368_v4  ;;  %v5366_v15 = vadd.f32 %v1079_v11, %v823_v7  ;;  %v825_v16 = vadd.f32 %v824_v12, %v5344_v3 }
 0x106   :  { %2074 = vmatpush2.msra.mxu1 %v499_v6  ;;  %1693 = vmatprep.mubr.f32.mxu1 %v7773_v10  ;;  %v1081_v19 = vpop.f32.mrf.mxu1 }
 0x107   :  { %v828_v20 = vpop.f32.mrf.mxu0  ;;  %1437 = vmatmul.mubr.f32.gmra.mxu0 %v144_v8  ;;  %2075 = vmatprep.subr.mxu1 %v496_v9  ;;  %v5379_v22 = vadd.f32 %v1081_v19, %v825_v16  ;;  %v172_v8 = vld [vmem:[%s7767_s0 + $0x4b8] sm:$0xff] }
 0x108   :  { %v829_v23 = vadd.f32 %v828_v20, %v5325_v61  ;;  %1819 = vmatpush2.msra.mxu0 %v367_v13  ;;  %1442 = vmatprep.mubr.f32.mxu0 %v152_v14  ;;  %v1085_v26 = vpop.f32.mrf.mxu1  ;;  %v480_v9 = vld [vmem:[%s7768_s1 + $0x758] sm:$0xff]  ;;  %v351_v13 = vld [vmem:[%s7768_s1 + $0x350] sm:$0xff] }
 0x109   :  { %3608 = vmatmul.mubr.msk.f32.gmra.mxu1 %vm659_vm0, %v146_v17  ;;  %v830_v27 = vpop.f32.mrf.mxu0  ;;  %1820 = vmatprep.subr.mxu0 %v364_v18  ;;  %v180_v14 = vld [vmem:[%s7767_s0 + $0x4f8] sm:$0xff]  ;;  %v174_v18 = vld [vmem:[%s7767_s0 + $0x4c8] sm:$0xff] }
 0x10a   :  { %v5395_v30 = vadd.f32 %v1085_v26, %v829_v23  ;;  %v831_v31 = vadd.f32 %v830_v27, %v5344_v3  ;;  %2076 = vmatpush2.msra.mxu1 %v495_v21  ;;  %1699 = vmatprep.mubr.f32.mxu1 %v7773_v10  ;;  %v1087_v34 = vpop.f32.mrf.mxu1  ;;  %v348_v19 = vld [vmem:[%s7768_s1 + $0x338] sm:$0xff]  ;;  %v479_v23 = vld [vmem:[%s7768_s1 + $0x750] sm:$0xff] }
 0x10b   :  { %v834_v35 = vpop.f32.mrf.mxu0  ;;  %1443 = vmatmul.mubr.f32.gmra.mxu0 %v151_v24  ;;  %2077 = vmatprep.subr.mxu1 %v492_v25  ;;  %v179_v26 = vld [vmem:[%s7767_s0 + $0x4f0] sm:$0xff]  ;;  %v476_v27 = vld [vmem:[%s7768_s1 + $0x738] sm:$0xff] }
 0x10c   :  { %v5408_v37 = vadd.f32 %v1087_v34, %v831_v31  ;;  %v835_v38 = vadd.f32 %v834_v35, %v5325_v61  ;;  %1821 = vmatpush2.msra.mxu0 %v363_v28  ;;  %1448 = vmatprep.mubr.f32.mxu0 %v159_v29  ;;  %v347_v31 = vld [vmem:[%s7768_s1 + $0x330] sm:$0xff]  ;;  %v181_v35 = vld [vmem:[%s7767_s0 + $0x500] sm:$0xff] }
 0x10d   :  { %v1091_v41 = vpop.f32.mrf.mxu1  ;;  %3609 = vmatmul.mubr.msk.f32.gmra.mxu1 %vm659_vm0, %v153_v32  ;;  %v836_v42 = vpop.f32.mrf.mxu0  ;;  %1822 = vmatprep.subr.mxu0 %v360_v33  ;;  %v187_v32 = vld [vmem:[%s7767_s0 + $0x530] sm:$0xff] }
 0x10e   :  { %v5424_v46 = vadd.f32 %v1091_v41, %v835_v38  ;;  %v837_v47 = vadd.f32 %v836_v42, %v5344_v3  ;;  %2078 = vmatpush2.msra.mxu1 %v491_v36  ;;  %1705 = vmatprep.mubr.f32.mxu1 %v7773_v10  ;;  %v344_v36 = vld [vmem:[%s7768_s1 + $0x318] sm:$0xff] }
 0x10f   :  { %v1093_v50 = vpop.f32.mrf.mxu1  ;;  %v840_v51 = vpop.f32.mrf.mxu0  ;;  %1449 = vmatmul.mubr.f32.gmra.mxu0 %v158_v39  ;;  %2079 = vmatprep.subr.mxu1 %v488_v40  ;;  %v475_v40 = vld [vmem:[%s7768_s1 + $0x730] sm:$0xff] }
 0x110   :  { %v5437_v53 = vadd.f32 %v1093_v50, %v837_v47  ;;  %v841_v54 = vadd.f32 %v840_v51, %v5325_v61  ;;  %1823 = vmatpush2.msra.mxu0 %v359_v43  ;;  %1454 = vmatprep.mubr.f32.mxu0 %v166_v44  ;;  %v186_v43 = vld [vmem:[%s7767_s0 + $0x528] sm:$0xff]  ;;  %v472_v44 = vld [vmem:[%s7768_s1 + $0x718] sm:$0xff] }
 0x111   :  { %v1097_v57 = vpop.f32.mrf.mxu1  ;;  %3610 = vmatmul.mubr.msk.f32.gmra.mxu1 %vm659_vm0, %v160_v48  ;;  %v842_v58 = vpop.f32.mrf.mxu0  ;;  %1824 = vmatprep.subr.mxu0 %v356_v49  ;;  %v343_v49 = vld [vmem:[%s7768_s1 + $0x310] sm:$0xff]  ;;  %v194_v50 = vld [vmem:[%s7767_s0 + $0x568] sm:$0xff] }
 0x112   :  { %v5453_v62 = vadd.f32 %v1097_v57, %v841_v54  ;;  %v843_v63 = vadd.f32 %v842_v58, %v5344_v3  ;;  %2080 = vmatpush2.msra.mxu1 %v487_v52  ;;  %1711 = vmatprep.mubr.f32.mxu1 %v7773_v10  ;;  %v188_v54 = vld [vmem:[%s7767_s0 + $0x538] sm:$0xff]  ;;  %v471_v58 = vld [vmem:[%s7768_s1 + $0x710] sm:$0xff] }
 0x113   :  { %v1099_v2 = vpop.f32.mrf.mxu1  ;;  %v846_v4 = vpop.f32.mrf.mxu0  ;;  %1455 = vmatmul.mubr.f32.gmra.mxu0 %v165_v55  ;;  %2081 = vmatprep.subr.mxu1 %v484_v56  ;;  %v340_v55 = vld [vmem:[%s7768_s1 + $0x2f8] sm:$0xff] }
 0x114   :  { %v5466_v6 = vadd.f32 %v1099_v2, %v843_v63  ;;  %v847_v7 = vadd.f32 %v846_v4, %v5325_v61  ;;  %1825 = vmatpush2.msra.mxu0 %v355_v59  ;;  %1460 = vmatprep.mubr.f32.mxu0 %v173_v60  ;;  %v193_v63 = vld [vmem:[%s7767_s0 + $0x560] sm:$0xff]  ;;  %v339_v4 = vld [vmem:[%s7768_s1 + $0x2f0] sm:$0xff] }
 0x115   :  { %v1103_v11 = vpop.f32.mrf.mxu1  ;;  %3611 = vmatmul.mubr.msk.f32.gmra.mxu1 %vm659_vm0, %v167_v0  ;;  %v848_v12 = vpop.f32.mrf.mxu0  ;;  %1826 = vmatprep.subr.mxu0 %v352_v1  ;;  %v468_v0 = vld [vmem:[%s7768_s1 + $0x6f8] sm:$0xff] }
 0x116   :  { %v5482_v16 = vadd.f32 %v1103_v11, %v847_v7  ;;  %v849_v17 = vadd.f32 %v848_v12, %v5344_v3  ;;  %2082 = vmatpush2.msra.mxu1 %v483_v5  ;;  %1717 = vmatprep.mubr.f32.mxu1 %v7773_v10  ;;  %v201_v5 = vld [vmem:[%s7767_s0 + $0x5a0] sm:$0xff]  ;;  %v336_v11 = vld [vmem:[%s7768_s1 + $0x2d8] sm:$0xff] }
 0x117   :  { %v1105_v20 = vpop.f32.mrf.mxu1  ;;  %v852_v21 = vpop.f32.mrf.mxu0  ;;  %1461 = vmatmul.mubr.f32.gmra.mxu0 %v172_v8  ;;  %2083 = vmatprep.subr.mxu1 %v480_v9  ;;  %v195_v9 = vld [vmem:[%s7767_s0 + $0x570] sm:$0xff] }
 0x118   :  { %v5495_v24 = vadd.f32 %v1105_v20, %v849_v17  ;;  %v853_v25 = vadd.f32 %v852_v21, %v5325_v61  ;;  %1827 = vmatpush2.msra.mxu0 %v351_v13  ;;  %1466 = vmatprep.mubr.f32.mxu0 %v180_v14  ;;  %v467_v14 = vld [vmem:[%s7768_s1 + $0x6f0] sm:$0xff]  ;;  %v464_v20 = vld [vmem:[%s7768_s1 + $0x6d8] sm:$0xff] }
 0x119   :  { %v1109_v28 = vpop.f32.mrf.mxu1  ;;  %3612 = vmatmul.mubr.msk.f32.gmra.mxu1 %vm659_vm0, %v174_v18  ;;  %v854_v29 = vpop.f32.mrf.mxu0  ;;  %1828 = vmatprep.subr.mxu0 %v348_v19  ;;  %v200_v19 = vld [vmem:[%s7767_s0 + $0x598] sm:$0xff] }
 0x11a   :  { %v5511_v33 = vadd.f32 %v1109_v28, %v853_v25  ;;  %v855_v34 = vadd.f32 %v854_v29, %v5344_v3  ;;  %2084 = vmatpush2.msra.mxu1 %v479_v23  ;;  %1723 = vmatprep.mubr.f32.mxu1 %v7773_v10  ;;  %v335_v25 = vld [vmem:[%s7768_s1 + $0x2d0] sm:$0xff]  ;;  %v202_v29 = vld [vmem:[%s7767_s0 + $0x5a8] sm:$0xff] }
 0x11b   :  { %v1111_v38 = vpop.f32.mrf.mxu1  ;;  %v858_v39 = vpop.f32.mrf.mxu0  ;;  %1467 = vmatmul.mubr.f32.gmra.mxu0 %v179_v26  ;;  %2085 = vmatprep.subr.mxu1 %v476_v27  ;;  %v208_v26 = vld [vmem:[%s7767_s0 + $0x5d8] sm:$0xff] }
 0x11c   :  { %v5524_v41 = vadd.f32 %v1111_v38, %v855_v34  ;;  %v859_v42 = vadd.f32 %v858_v39, %v5325_v61  ;;  %1829 = vmatpush2.msra.mxu0 %v347_v31  ;;  %1472 = vmatprep.mubr.f32.mxu0 %v187_v32  ;;  %v332_v31 = vld [vmem:[%s7768_s1 + $0x2b8] sm:$0xff]  ;;  %v207_v39 = vld [vmem:[%s7767_s0 + $0x5d0] sm:$0xff] }
 0x11d   :  { %v1115_v47 = vpop.f32.mrf.mxu1  ;;  %3613 = vmatmul.mubr.msk.f32.gmra.mxu1 %vm659_vm0, %v181_v35  ;;  %v860_v48 = vpop.f32.mrf.mxu0  ;;  %1830 = vmatprep.subr.mxu0 %v344_v36  ;;  %v463_v35 = vld [vmem:[%s7768_s1 + $0x6d0] sm:$0xff] }
 0x11e   :  { %v5540_v51 = vadd.f32 %v1115_v47, %v859_v42  ;;  %v861_v52 = vadd.f32 %v860_v48, %v5344_v3  ;;  %2086 = vmatpush2.msra.mxu1 %v475_v40  ;;  %1729 = vmatprep.mubr.f32.mxu1 %v7773_v10  ;;  %v460_v40 = vld [vmem:[%s7768_s1 + $0x6b8] sm:$0xff]  ;;  %v215_v47 = vld [vmem:[%s7767_s0 + $0x610] sm:$0xff] }
 0x11f   :  { %v1117_v56 = vpop.f32.mrf.mxu1  ;;  %v864_v57 = vpop.f32.mrf.mxu0  ;;  %1473 = vmatmul.mubr.f32.gmra.mxu0 %v186_v43  ;;  %2087 = vmatprep.subr.mxu1 %v472_v44  ;;  %v331_v44 = vld [vmem:[%s7768_s1 + $0x2b0] sm:$0xff] }
 0x120   :  { %v5553_v59 = vadd.f32 %v1117_v56, %v861_v52  ;;  %v865_v60 = vadd.f32 %v864_v57, %v5325_v61  ;;  %1831 = vmatpush2.msra.mxu0 %v343_v49  ;;  %1478 = vmatprep.mubr.f32.mxu0 %v194_v50  ;;  %v209_v50 = vld [vmem:[%s7767_s0 + $0x5e0] sm:$0xff]  ;;  %v328_v52 = vld [vmem:[%s7768_s1 + $0x298] sm:$0xff]  ;;  %v459_v56 = vld [vmem:[%s7768_s1 + $0x6b0] sm:$0xff] }
 0x121   :  { %v1121_v1 = vpop.f32.mrf.mxu1  ;;  %3614 = vmatmul.mubr.msk.f32.gmra.mxu1 %vm659_vm0, %v188_v54  ;;  %v866_v2 = vpop.f32.mrf.mxu0  ;;  %1832 = vmatprep.subr.mxu0 %v340_v55 }
 0x122   :  { %v5569_v7 = vadd.f32 %v1121_v1, %v865_v60  ;;  %v867_v8 = vadd.f32 %v866_v2, %v5344_v3  ;;  %2088 = vmatpush2.msra.mxu1 %v471_v58  ;;  %1735 = vmatprep.mubr.f32.mxu1 %v7773_v10  ;;  %v214_v60 = vld [vmem:[%s7767_s0 + $0x608] sm:$0xff]  ;;  %v327_v2 = vld [vmem:[%s7768_s1 + $0x290] sm:$0xff] }
 0x123   :  { %v1123_v12 = vpop.f32.mrf.mxu1  ;;  %v870_v13 = vpop.f32.mrf.mxu0  ;;  %1479 = vmatmul.mubr.f32.gmra.mxu0 %v193_v63  ;;  %2089 = vmatprep.subr.mxu1 %v468_v0  ;;  %v456_v63 = vld [vmem:[%s7768_s1 + $0x698] sm:$0xff] }
 0x124   :  { %v5582_v17 = vadd.f32 %v1123_v12, %v867_v8  ;;  %v871_v18 = vadd.f32 %v870_v13, %v5325_v61  ;;  %1833 = vmatpush2.msra.mxu0 %v339_v4  ;;  %1484 = vmatprep.mubr.f32.mxu0 %v201_v5  ;;  %v222_v4 = vld [vmem:[%s7767_s0 + $0x648] sm:$0xff] }
 0x125   :  { %v1127_v21 = vpop.f32.mrf.mxu1  ;;  %3615 = vmatmul.mubr.msk.f32.gmra.mxu1 %vm659_vm0, %v195_v9  ;;  %v872_v23 = vpop.f32.mrf.mxu0  ;;  %1834 = vmatprep.subr.mxu0 %v336_v11  ;;  %v216_v9 = vld [vmem:[%s7767_s0 + $0x618] sm:$0xff] }
 0x126   :  { %v5598_v27 = vadd.f32 %v1127_v21, %v871_v18  ;;  %v873_v28 = vadd.f32 %v872_v23, %v5344_v3  ;;  %2090 = vmatpush2.msra.mxu1 %v467_v14  ;;  %1741 = vmatprep.mubr.f32.mxu1 %v7773_v10  ;;  %v324_v11 = vld [vmem:[%s7768_s1 + $0x278] sm:$0xff]  ;;  %v455_v14 = vld [vmem:[%s7768_s1 + $0x690] sm:$0xff] }
 0x127   :  { %v1129_v32 = vpop.f32.mrf.mxu1  ;;  %v876_v34 = vpop.f32.mrf.mxu0  ;;  %1485 = vmatmul.mubr.f32.gmra.mxu0 %v200_v19  ;;  %2091 = vmatprep.subr.mxu1 %v464_v20  ;;  %v221_v20 = vld [vmem:[%s7767_s0 + $0x640] sm:$0xff]  ;;  %v452_v21 = vld [vmem:[%s7768_s1 + $0x678] sm:$0xff] }
 0x128   :  { %v5611_v36 = vadd.f32 %v1129_v32, %v873_v28  ;;  %v877_v38 = vadd.f32 %v876_v34, %v5325_v61  ;;  %1835 = vmatpush2.msra.mxu0 %v335_v25  ;;  %1490 = vmatprep.mubr.f32.mxu0 %v208_v26  ;;  %v323_v26 = vld [vmem:[%s7768_s1 + $0x270] sm:$0xff]  ;;  %v229_v28 = vld [vmem:[%s7767_s0 + $0x680] sm:$0xff]  ;;  %v320_v34 = vld [vmem:[%s7768_s1 + $0x258] sm:$0xff] }
 0x129   :  { %v1133_v42 = vpop.f32.mrf.mxu1  ;;  %3616 = vmatmul.mubr.msk.f32.gmra.mxu1 %vm659_vm0, %v202_v29  ;;  %v878_v43 = vpop.f32.mrf.mxu0  ;;  %1836 = vmatprep.subr.mxu0 %v332_v31  ;;  %v223_v32 = vld [vmem:[%s7767_s0 + $0x650] sm:$0xff] }
 0x12a   :  { %v5627_v48 = vadd.f32 %v1133_v42, %v877_v38  ;;  %v879_v49 = vadd.f32 %v878_v43, %v5344_v3  ;;  %2092 = vmatpush2.msra.mxu1 %v463_v35  ;;  %1747 = vmatprep.mubr.f32.mxu1 %v7773_v10  ;;  %v228_v43 = vld [vmem:[%s7767_s0 + $0x678] sm:$0xff] }
 0x12b   :  { %v1135_v54 = vpop.f32.mrf.mxu1  ;;  %v882_v55 = vpop.f32.mrf.mxu0  ;;  %1491 = vmatmul.mubr.f32.gmra.mxu0 %v207_v39  ;;  %2093 = vmatprep.subr.mxu1 %v460_v40  ;;  %v451_v39 = vld [vmem:[%s7768_s1 + $0x670] sm:$0xff] }
 0x12c   :  { %v5640_v57 = vadd.f32 %v1135_v54, %v879_v49  ;;  %v883_v58 = vadd.f32 %v882_v55, %v5325_v61  ;;  %1837 = vmatpush2.msra.mxu0 %v331_v44  ;;  %1496 = vmatprep.mubr.f32.mxu0 %v215_v47  ;;  %v448_v44 = vld [vmem:[%s7768_s1 + $0x658] sm:$0xff] }
 0x12d   :  { %v1139_v0 = vpop.f32.mrf.mxu1  ;;  %3617 = vmatmul.mubr.msk.f32.gmra.mxu1 %vm659_vm0, %v209_v50  ;;  %v884_v1 = vpop.f32.mrf.mxu0  ;;  %1838 = vmatprep.subr.mxu0 %v328_v52  ;;  %v319_v50 = vld [vmem:[%s7768_s1 + $0x250] sm:$0xff]  ;;  %v236_v52 = vld [vmem:[%s7767_s0 + $0x6b8] sm:$0xff] }
 0x12e   :  { %v5656_v5 = vadd.f32 %v1139_v0, %v883_v58  ;;  %v885_v8 = vadd.f32 %v884_v1, %v5344_v3  ;;  %2094 = vmatpush2.msra.mxu1 %v459_v56  ;;  %1753 = vmatprep.mubr.f32.mxu1 %v7773_v10  ;;  %v230_v56 = vld [vmem:[%s7767_s0 + $0x688] sm:$0xff]  ;;  %v316_v58 = vld [vmem:[%s7768_s1 + $0x238] sm:$0xff]  ;;  %v447_v0 = vld [vmem:[%s7768_s1 + $0x650] sm:$0xff] }
 0x12f   :  { %v1141_v12 = vpop.f32.mrf.mxu1  ;;  %v888_v13 = vpop.f32.mrf.mxu0  ;;  %1497 = vmatmul.mubr.f32.gmra.mxu0 %v214_v60  ;;  %2095 = vmatprep.subr.mxu1 %v456_v63 }
 0x130   :  { %v5669_v18 = vadd.f32 %v1141_v12, %v885_v8  ;;  %v889_v19 = vadd.f32 %v888_v13, %v5325_v61  ;;  %1839 = vmatpush2.msra.mxu0 %v327_v2  ;;  %1502 = vmatprep.mubr.f32.mxu0 %v222_v4  ;;  %v235_v4 = vld [vmem:[%s7767_s0 + $0x6b0] sm:$0xff]  ;;  %v444_v8 = vld [vmem:[%s7768_s1 + $0x638] sm:$0xff] }
 0x131   :  { %v1145_v23 = vpop.f32.mrf.mxu1  ;;  %3618 = vmatmul.mubr.msk.f32.gmra.mxu1 %vm659_vm0, %v216_v9  ;;  %v890_v25 = vpop.f32.mrf.mxu0  ;;  %1840 = vmatprep.subr.mxu0 %v324_v11  ;;  %v315_v12 = vld [vmem:[%s7768_s1 + $0x230] sm:$0xff] }
 0x132   :  { %v5685_v29 = vadd.f32 %v1145_v23, %v889_v19  ;;  %v891_v31 = vadd.f32 %v890_v25, %v5344_v3  ;;  %2096 = vmatpush2.msra.mxu1 %v455_v14  ;;  %1759 = vmatprep.mubr.f32.mxu1 %v7773_v10  ;;  %v243_v13 = vld [vmem:[%s7767_s0 + $0x6f0] sm:$0xff] }
 0x133   :  { %v1147_v35 = vpop.f32.mrf.mxu1  ;;  %v894_v38 = vpop.f32.mrf.mxu0  ;;  %1503 = vmatmul.mubr.f32.gmra.mxu0 %v221_v20  ;;  %2097 = vmatprep.subr.mxu1 %v452_v21  ;;  %v237_v20 = vld [vmem:[%s7767_s0 + $0x6c0] sm:$0xff]  ;;  %v312_v21 = vld [vmem:[%s7768_s1 + $0x218] sm:$0xff] }
 0x134   :  { %v5698_v40 = vadd.f32 %v1147_v35, %v891_v31  ;;  %v895_v42 = vadd.f32 %v894_v38, %v5325_v61  ;;  %1841 = vmatpush2.msra.mxu0 %v323_v26  ;;  %1508 = vmatprep.mubr.f32.mxu0 %v229_v28  ;;  %v443_v26 = vld [vmem:[%s7768_s1 + $0x630] sm:$0xff] }
 0x135   :  { %v1151_v47 = vpop.f32.mrf.mxu1  ;;  %3619 = vmatmul.mubr.msk.f32.gmra.mxu1 %vm659_vm0, %v223_v32  ;;  %v896_v49 = vpop.f32.mrf.mxu0  ;;  %1842 = vmatprep.subr.mxu0 %v320_v34  ;;  %v242_v32 = vld [vmem:[%s7767_s0 + $0x6e8] sm:$0xff]  ;;  %v440_v34 = vld [vmem:[%s7768_s1 + $0x618] sm:$0xff] }
 0x136   :  { %v5714_v54 = vadd.f32 %v1151_v47, %v895_v42  ;;  %v897_v55 = vadd.f32 %v896_v49, %v5344_v3  ;;  %2098 = vmatpush2.msra.mxu1 %v451_v39  ;;  %1765 = vmatprep.mubr.f32.mxu1 %v7773_v10  ;;  %v311_v39 = vld [vmem:[%s7768_s1 + $0x210] sm:$0xff]  ;;  %v564_v47 = vld [vmem:[%s7768_s1 + $0x9f8] sm:$0xff] }
 0x137   :  { %v1153_v60 = vpop.f32.mrf.mxu1  ;;  %v900_v63 = vpop.f32.mrf.mxu0  ;;  %1509 = vmatmul.mubr.f32.gmra.mxu0 %v228_v43  ;;  %2099 = vmatprep.subr.mxu1 %v448_v44  ;;  %v244_v44 = vld [vmem:[%s7767_s0 + $0x6f8] sm:$0xff] }
 0x138   :  { %v5727_v1 = vadd.f32 %v1153_v60, %v897_v55  ;;  %v901_v2 = vadd.f32 %v900_v63, %v5325_v61  ;;  %1843 = vmatpush2.msra.mxu0 %v319_v50  ;;  %1514 = vmatprep.mubr.f32.mxu0 %v236_v52  ;;  %v439_v52 = vld [vmem:[%s7768_s1 + $0x610] sm:$0xff]  ;;  %v636_v60 = vld [vmem:[%s7768_s1 + $0xc38] sm:$0xff] }
 0x139   :  { %v1157_v9 = vpop.f32.mrf.mxu1  ;;  %3620 = vmatmul.mubr.msk.f32.gmra.mxu1 %vm659_vm0, %v230_v56  ;;  %v902_v11 = vpop.f32.mrf.mxu0  ;;  %1844 = vmatprep.subr.mxu0 %v316_v58  ;;  %v3692_v58 = vld [vmem:[%s7767_s0 + $0x8] sm:$0xff] }
 0x13a   :  { %v5743_v14 = vadd.f32 %v1157_v9, %v901_v2  ;;  %v903_v19 = vadd.f32 %v902_v11, %v5344_v3  ;;  %2100 = vmatpush2.msra.mxu1 %v447_v0  ;;  %1771 = vmatprep.mubr.f32.mxu1 %v7773_v10  ;;  %v563_v2 = vld [vmem:[%s7768_s1 + $0x9f0] sm:$0xff]  ;;  %v3693_v9 = vld [vmem:[%s7767_s0 + $0x18] sm:$0xff] }
 0x13b   :  { %v1159_v23 = vpop.f32.mrf.mxu1  ;;  %v906_v25 = vpop.f32.mrf.mxu0  ;;  %1515 = vmatmul.mubr.f32.gmra.mxu0 %v235_v4  ;;  %2101 = vmatprep.subr.mxu1 %v444_v8  ;;  %v560_v11 = vld [vmem:[%s7768_s1 + $0x9d8] sm:$0xff] }
 0x13c   :  { %v5756_v28 = vadd.f32 %v1159_v23, %v903_v19  ;;  %v907_v31 = vadd.f32 %v906_v25, %v5325_v61  ;;  %1845 = vmatpush2.msra.mxu0 %v315_v12  ;;  %1520 = vmatprep.mubr.f32.mxu0 %v243_v13  ;;  %v3694_v19 = vld [vmem:[%s7767_s0] sm:$0xff] }
 0x13d   :  { %v1163_v35 = vpop.f32.mrf.mxu1  ;;  %3621 = vmatmul.mubr.msk.f32.gmra.mxu1 %vm659_vm0, %v237_v20  ;;  %v908_v38 = vpop.f32.mrf.mxu0  ;;  %1846 = vmatprep.subr.mxu0 %v312_v21  ;;  %v635_v20 = vld [vmem:[%s7768_s1 + $0xc30] sm:$0xff]  ;;  %v3695_v25 = vld [vmem:[%s7767_s0 + $0x40] sm:$0xff] }
 0x13e   :  { %v5769_v42 = vadd.f32 %v1163_v35, %v907_v31  ;;  %v909_v43 = vadd.f32 %v908_v38, %v5344_v3  ;;  %2102 = vmatpush2.msra.mxu1 %v443_v26  ;;  %1777 = vmatprep.mubr.f32.mxu1 %v7773_v10  ;;  %v632_v26 = vld [vmem:[%s7768_s1 + $0xc18] sm:$0xff]  ;;  %v559_v35 = vld [vmem:[%s7768_s1 + $0x9d0] sm:$0xff] }
 0x13f   :  { %v1165_v49 = vpop.f32.mrf.mxu1  ;;  %v912_v50 = vpop.f32.mrf.mxu0  ;;  %1521 = vmatmul.mubr.f32.gmra.mxu0 %v242_v32  ;;  %2103 = vmatprep.subr.mxu1 %v440_v34  ;;  %v3696_v32 = vld [vmem:[%s7767_s0 + $0x10] sm:$0xff]  ;;  %v3730_v10 = vld [vmem:[%s7767_s0 + $0x1f8] sm:$0xff] }
 0x140   :  { %v5782_v55 = vadd.f32 %v1165_v49, %v909_v43  ;;  %v913_v56 = vadd.f32 %v912_v50, %v5325_v61  ;;  %1847 = vmatpush2.msra.mxu0 %v311_v39  ;;  %1848 = vmatprep.mubr.f32.mxu0 %v3692_v58  ;;  %v3697_v43 = vld [vmem:[%s7767_s0 + $0x50] sm:$0xff]  ;;  %v3698_v50 = vld [vmem:[%s7767_s0 + $0x38] sm:$0xff] }
 0x141   :  { %v1169_v63 = vpop.f32.mrf.mxu1  ;;  %3622 = vmatmul.mubr.msk.f32.gmra.mxu1 %vm659_vm0, %v244_v44  ;;  %v914_v0 = vpop.f32.mrf.mxu0  ;;  %2298 = vmatprep.subr.mxu0 %v564_v47  ;;  %v556_v44 = vld [vmem:[%s7768_s1 + $0x9b8] sm:$0xff] }
 0x142   :  { %v5795_v4 = vadd.f32 %v1169_v63, %v913_v56  ;;  %v915_v8 = vadd.f32 %v914_v0, %v5344_v3  ;;  %2104 = vmatpush2.msra.mxu1 %v439_v52  ;;  %2105 = vmatprep.mubr.f32.mxu1 %v3693_v9  ;;  %v555_v52 = vld [vmem:[%s7768_s1 + $0x9b0] sm:$0xff]  ;;  %v552_v63 = vld [vmem:[%s7768_s1 + $0x998] sm:$0xff] }
 0x143   :  { %v1171_v12 = vpop.f32.mrf.mxu1  ;;  %v918_v13 = vpop.f32.mrf.mxu0  ;;  %1849 = vmatmul.mubr.f32.vlgmr.msra.gmra.mxu0 %v3694_v19  ;;  %2583 = vmatprep.subr.mxu1 %v636_v60  ;;  %v3699_v60 = vld [vmem:[%s7767_s0 + $0x78] sm:$0xff]  ;;  %v551_v9 = vld [vmem:[%s7768_s1 + $0x990] sm:$0xff] }
 0x144   :  { %v5810_v21 = vadd.f32 %v1171_v12, %v915_v8  ;;  %v919_v23 = vadd.f32 %v918_v13, %v5325_v61  ;;  %2299 = vmatpush1.msra.mxu0 %v563_v2  ;;  %1854 = vmatprep.mubr.f32.mxu0 %v3695_v25  ;;  %v3700_v2 = vld [vmem:[%s7767_s0 + $0x48] sm:$0xff]  ;;  %v548_v19 = vld [vmem:[%s7768_s1 + $0x978] sm:$0xff]  ;;  %v3702_v25 = vld [vmem:[%s7767_s0 + $0x70] sm:$0xff] }
 0x145   :  { %v1175_v31 = vpop.f32.mrf.mxu1  ;;  %2106 = vmatmul.mubr.f32.vlgmr.msra.gmra.mxu1 %v3696_v32  ;;  %v920_v34 = vpop.f32.mrf.mxu0  ;;  %2300 = vmatprep.subr.mxu0 %v560_v11  ;;  %v3701_v13 = vld [vmem:[%s7767_s0 + $0x88] sm:$0xff] }
 0x146   :  { %v5825_v38 = vadd.f32 %v1175_v31, %v919_v23  ;;  %v921_v39 = vadd.f32 %v920_v34, %v5344_v3  ;;  %2584 = vmatpush1.msra.mxu1 %v635_v20  ;;  %2111 = vmatprep.mubr.f32.mxu1 %v3697_v43  ;;  %v3703_v34 = vld [vmem:[%s7767_s0 + $0xb0] sm:$0xff]  ;;  %v3704_v43 = vld [vmem:[%s7767_s0 + $0x80] sm:$0xff] }
 0x147   :  { %v1177_v47 = vpop.f32.mrf.mxu1  ;;  %v924_v49 = vpop.f32.mrf.mxu0  ;;  %1855 = vmatmul.mubr.f32.gmra.mxu0 %v3698_v50  ;;  %2585 = vmatprep.subr.mxu1 %v632_v26  ;;  %v547_v26 = vld [vmem:[%s7768_s1 + $0x970] sm:$0xff] }
 0x148   :  { %v5840_v56 = vadd.f32 %v1177_v47, %v921_v39  ;;  %v925_v58 = vadd.f32 %v924_v49, %v5325_v61  ;;  %2301 = vmatpush1.msra.mxu0 %v559_v35  ;;  %1860 = vmatprep.mubr.f32.mxu0 %v3699_v60  ;;  %v544_v35 = vld [vmem:[%s7768_s1 + $0x958] sm:$0xff]  ;;  %v543_v47 = vld [vmem:[%s7768_s1 + $0x950] sm:$0xff] }
 0x149   :  { %v1181_v0 = vpop.f32.mrf.mxu1  ;;  %2112 = vmatmul.mubr.f32.gmra.mxu1 %v3700_v2  ;;  %v926_v8 = vpop.f32.mrf.mxu0  ;;  %2302 = vmatprep.subr.mxu0 %v556_v44  ;;  %v539_v2 = vld [vmem:[%s7768_s1 + $0x930] sm:$0xff] }
 0x14a   :  { %v5855_v11 = vadd.f32 %v1181_v0, %v925_v58  ;;  %v927_v12 = vadd.f32 %v926_v8, %v5344_v3  ;;  %2117 = vmatprep.mubr.f32.mxu1 %v3701_v13  ;;  %2303 = vmatpush1.msra.mxu0 %v555_v52  ;;  %v3705_v52 = vld [vmem:[%s7767_s0 + $0xc0] sm:$0xff]  ;;  %v540_v58 = vld [vmem:[%s7768_s1 + $0x938] sm:$0xff]  ;;  %v3706_v0 = vld [vmem:[%s7767_s0 + $0xa8] sm:$0xff] }
 0x14b   :  { %v1183_v20 = vpop.f32.mrf.mxu1  ;;  %v930_v23 = vpop.f32.mrf.mxu0  ;;  %1861 = vmatmul.mubr.f32.gmra.mxu0 %v3702_v25  ;;  %2304 = vmatprep.subr.mxu0 %v552_v63  ;;  %v536_v13 = vld [vmem:[%s7768_s1 + $0x918] sm:$0xff]  ;;  %v535_v25 = vld [vmem:[%s7768_s1 + $0x910] sm:$0xff] }
 0x14c   :  { %v5870_v31 = vadd.f32 %v1183_v20, %v927_v12  ;;  %v931_v32 = vadd.f32 %v930_v23, %v5325_v61  ;;  %1866 = vmatprep.mubr.f32.mxu0 %v3703_v34  ;;  %2305 = vmatpush1.msra.mxu0 %v551_v9  ;;  %v3707_v12 = vld [vmem:[%s7767_s0 + $0xe8] sm:$0xff]  ;;  %v3708_v20 = vld [vmem:[%s7767_s0 + $0xb8] sm:$0xff] }
 0x14d   :  { %v1187_v39 = vpop.f32.mrf.mxu1  ;;  %2118 = vmatmul.mubr.f32.gmra.mxu1 %v3704_v43  ;;  %v932_v44 = vpop.f32.mrf.mxu0  ;;  %2306 = vmatprep.subr.mxu0 %v548_v19  ;;  %v3709_v34 = vld [vmem:[%s7767_s0 + $0xf8] sm:$0xff] }
 0x14e   :  { %v5885_v49 = vadd.f32 %v1187_v39, %v931_v32  ;;  %v933_v50 = vadd.f32 %v932_v44, %v5344_v3  ;;  %2123 = vmatprep.mubr.f32.mxu1 %v3705_v52  ;;  %2307 = vmatpush1.msra.mxu0 %v547_v26  ;;  %v3710_v44 = vld [vmem:[%s7767_s0 + $0xe0] sm:$0xff] }
 0x14f   :  { %v1189_v60 = vpop.f32.mrf.mxu1  ;;  %v936_v63 = vpop.f32.mrf.mxu0  ;;  %1867 = vmatmul.mubr.f32.gmra.mxu0 %v3706_v0  ;;  %2308 = vmatprep.subr.mxu0 %v544_v35  ;;  %v532_v35 = vld [vmem:[%s7768_s1 + $0x8f8] sm:$0xff]  ;;  %v3712_v0 = vld [vmem:[%s7767_s0 + $0xf0] sm:$0xff] }
 0x150   :  { %v5900_v8 = vadd.f32 %v1189_v60, %v933_v50  ;;  %v937_v9 = vadd.f32 %v936_v63, %v5325_v61  ;;  %1872 = vmatprep.mubr.f32.mxu0 %v3707_v12  ;;  %2309 = vmatpush1.msra.mxu0 %v543_v47  ;;  %v531_v47 = vld [vmem:[%s7768_s1 + $0x8f0] sm:$0xff]  ;;  %v528_v60 = vld [vmem:[%s7768_s1 + $0x8d8] sm:$0xff] }
 0x151   :  { %v1193_v19 = vpop.f32.mrf.mxu1  ;;  %2124 = vmatmul.mubr.f32.gmra.mxu1 %v3708_v20  ;;  %v938_v23 = vpop.f32.mrf.mxu0  ;;  %2310 = vmatprep.subr.mxu0 %v540_v58  ;;  %v3711_v58 = vld [vmem:[%s7767_s0 + $0x120] sm:$0xff]  ;;  %v524_v20 = vld [vmem:[%s7768_s1 + $0x8b8] sm:$0xff] }
 0x152   :  { %v5915_v26 = vadd.f32 %v1193_v19, %v937_v9  ;;  %v939_v32 = vadd.f32 %v938_v23, %v5344_v3  ;;  %2129 = vmatprep.mubr.f32.mxu1 %v3709_v34  ;;  %2311 = vmatpush1.msra.mxu0 %v539_v2  ;;  %v527_v9 = vld [vmem:[%s7768_s1 + $0x8d0] sm:$0xff] }
 0x153   :  { %v1195_v39 = vpop.f32.mrf.mxu1  ;;  %v942_v43 = vpop.f32.mrf.mxu0  ;;  %1873 = vmatmul.mubr.f32.gmra.mxu0 %v3710_v44  ;;  %2312 = vmatprep.subr.mxu0 %v536_v13  ;;  %v3713_v19 = vld [vmem:[%s7767_s0 + $0x130] sm:$0xff]  ;;  %v520_v44 = vld [vmem:[%s7768_s1 + $0x898] sm:$0xff] }
 0x154   :  { %v5930_v50 = vadd.f32 %v1195_v39, %v939_v32  ;;  %v943_v52 = vadd.f32 %v942_v43, %v5325_v61  ;;  %1878 = vmatprep.mubr.f32.mxu0 %v3711_v58  ;;  %2313 = vmatpush1.msra.mxu0 %v535_v25  ;;  %v3714_v32 = vld [vmem:[%s7767_s0 + $0x118] sm:$0xff]  ;;  %v523_v34 = vld [vmem:[%s7768_s1 + $0x8b0] sm:$0xff] }
 0x155   :  { %v1199_v63 = vpop.f32.mrf.mxu1  ;;  %2130 = vmatmul.mubr.f32.gmra.mxu1 %v3712_v0  ;;  %v944_v2 = vpop.f32.mrf.mxu0  ;;  %2314 = vmatprep.subr.mxu0 %v532_v35  ;;  %v3715_v43 = vld [vmem:[%s7767_s0 + $0x158] sm:$0xff] }
 0x156   :  { %v5945_v12 = vadd.f32 %v1199_v63, %v943_v52  ;;  %v945_v13 = vadd.f32 %v944_v2, %v5344_v3  ;;  %2135 = vmatprep.mubr.f32.mxu1 %v3713_v19  ;;  %2315 = vmatpush1.msra.mxu0 %v531_v47  ;;  %v3716_v52 = vld [vmem:[%s7767_s0 + $0x128] sm:$0xff] }
 0x157   :  { %v1201_v23 = vpop.f32.mrf.mxu1  ;;  %v948_v25 = vpop.f32.mrf.mxu0  ;;  %1879 = vmatmul.mubr.f32.gmra.mxu0 %v3714_v32  ;;  %2316 = vmatprep.subr.mxu0 %v528_v60  ;;  %v519_v60 = vld [vmem:[%s7768_s1 + $0x890] sm:$0xff]  ;;  %v3717_v2 = vld [vmem:[%s7767_s0 + $0x168] sm:$0xff] }
 0x158   :  { %v5960_v35 = vadd.f32 %v1201_v23, %v945_v13  ;;  %v949_v39 = vadd.f32 %v948_v25, %v5325_v61  ;;  %1884 = vmatprep.mubr.f32.mxu0 %v3715_v43  ;;  %2317 = vmatpush1.msra.mxu0 %v527_v9  ;;  %v516_v9 = vld [vmem:[%s7768_s1 + $0x878] sm:$0xff]  ;;  %v515_v23 = vld [vmem:[%s7768_s1 + $0x870] sm:$0xff] }
 0x159   :  { %v1205_v47 = vpop.f32.mrf.mxu1  ;;  %2136 = vmatmul.mubr.f32.gmra.mxu1 %v3716_v52  ;;  %v950_v58 = vpop.f32.mrf.mxu0  ;;  %2318 = vmatprep.subr.mxu0 %v524_v20  ;;  %v3718_v20 = vld [vmem:[%s7767_s0 + $0x150] sm:$0xff] }
 0x15a   :  { %v5975_v63 = vadd.f32 %v1205_v47, %v949_v39  ;;  %v951_v0 = vadd.f32 %v950_v58, %v5344_v3  ;;  %2141 = vmatprep.mubr.f32.mxu1 %v3717_v2  ;;  %2319 = vmatpush1.msra.mxu0 %v523_v34  ;;  %v3719_v34 = vld [vmem:[%s7767_s0 + $0x190] sm:$0xff]  ;;  %v512_v39 = vld [vmem:[%s7768_s1 + $0x858] sm:$0xff] }
 0x15b   :  { %v1207_v13 = vpop.f32.mrf.mxu1  ;;  %v954_v19 = vpop.f32.mrf.mxu0  ;;  %1885 = vmatmul.mubr.f32.gmra.mxu0 %v3718_v20  ;;  %2320 = vmatprep.subr.mxu0 %v520_v44  ;;  %v3720_v44 = vld [vmem:[%s7767_s0 + $0x160] sm:$0xff]  ;;  %v511_v52 = vld [vmem:[%s7768_s1 + $0x850] sm:$0xff]  ;;  %v508_v2 = vld [vmem:[%s7768_s1 + $0x838] sm:$0xff] }
 0x15c   :  { %v5990_v25 = vadd.f32 %v1207_v13, %v951_v0  ;;  %v955_v32 = vadd.f32 %v954_v19, %v5325_v61  ;;  %1890 = vmatprep.mubr.f32.mxu0 %v3719_v34  ;;  %2321 = vmatpush1.msra.mxu0 %v519_v60  ;;  %v3721_v0 = vld [vmem:[%s7767_s0 + $0x1a0] sm:$0xff]  ;;  %v3722_v19 = vld [vmem:[%s7767_s0 + $0x188] sm:$0xff]  ;;  %v507_v20 = vld [vmem:[%s7768_s1 + $0x830] sm:$0xff] }
 0x15d   :  { %v1211_v43 = vpop.f32.mrf.mxu1  ;;  %2142 = vmatmul.mubr.f32.gmra.mxu1 %v3720_v44  ;;  %v956_v47 = vpop.f32.mrf.mxu0  ;;  %2322 = vmatprep.subr.mxu0 %v516_v9  ;;  %v3723_v34 = vld [vmem:[%s7767_s0 + $0x1c8] sm:$0xff] }
 0x15e   :  { %v6005_v58 = vadd.f32 %v1211_v43, %v955_v32  ;;  %v957_v60 = vadd.f32 %v956_v47, %v5344_v3  ;;  %2147 = vmatprep.mubr.f32.mxu1 %v3721_v0  ;;  %2323 = vmatpush1.msra.mxu0 %v515_v23  ;;  %v504_v43 = vld [vmem:[%s7768_s1 + $0x818] sm:$0xff] }
 0x15f   :  { %v1213_v13 = vpop.f32.mrf.mxu1  ;;  %v960_v9 = vpop.f32.mrf.mxu0  ;;  %1891 = vmatmul.mubr.f32.gmra.mxu0 %v3722_v19  ;;  %2324 = vmatprep.subr.mxu0 %v512_v39  ;;  %v3724_v39 = vld [vmem:[%s7767_s0 + $0x198] sm:$0xff] }
 0x160   :  { %v6020_v32 = vadd.f32 %v1213_v13, %v957_v60  ;;  %v961_v23 = vadd.f32 %v960_v9, %v5325_v61  ;;  %1896 = vmatprep.mubr.f32.mxu0 %v3723_v34  ;;  %2325 = vmatpush1.msra.mxu0 %v511_v52  ;;  %v503_v60 = vld [vmem:[%s7768_s1 + $0x810] sm:$0xff]  ;;  %v3725_v13 = vld [vmem:[%s7767_s0 + $0x1d8] sm:$0xff]  ;;  %v3726_v34 = vld [vmem:[%s7767_s0 + $0x1c0] sm:$0xff] }
 0x161   :  { %v1217_v44 = vpop.f32.mrf.mxu1  ;;  %2148 = vmatmul.mubr.f32.gmra.mxu1 %v3724_v39  ;;  %v962_v47 = vpop.f32.mrf.mxu0  ;;  %2326 = vmatprep.subr.mxu0 %v508_v2  ;;  %v628_v9 = vld [vmem:[%s7768_s1 + $0xbf8] sm:$0xff]  ;;  %v3727_v39 = vld [vmem:[%s7767_s0 + $0x200] sm:$0xff] }
 0x162   :  { %v6035_v0 = vadd.f32 %v1217_v44, %v961_v23  ;;  %v963_v52 = vadd.f32 %v962_v47, %v5344_v3  ;;  %2153 = vmatprep.mubr.f32.mxu1 %v3725_v13  ;;  %2327 = vmatpush1.msra.mxu0 %v507_v20  ;;  %v627_v23 = vld [vmem:[%s7768_s1 + $0xbf0] sm:$0xff] }
 0x163   :  { %v1219_v19 = vpop.f32.mrf.mxu1  ;;  %v966_v2 = vpop.f32.mrf.mxu0  ;;  %1897 = vmatmul.mubr.f32.gmra.mxu0 %v3726_v34  ;;  %2328 = vmatprep.subr.mxu0 %v504_v43  ;;  %v631_v47 = vld [vmem:[%s7768_s1 + $0xc10] sm:$0xff] }
 0x164   :  { %v6050_v44 = vadd.f32 %v1219_v19, %v963_v52  ;;  %v967_v20 = vadd.f32 %v966_v2, %v5325_v61  ;;  %1902 = vmatprep.mubr.f32.mxu0 %v3727_v39  ;;  %2329 = vmatpush1.msra.mxu0 %v503_v60  ;;  %v3728_v43 = vld [vmem:[%s7767_s0 + $0x1d0] sm:$0xff]  ;;  %v624_v19 = vld [vmem:[%s7768_s1 + $0xbd8] sm:$0xff] }
 0x165   :  { %v1223_v13 = vpop.f32.mrf.mxu1  ;;  %2154 = vmatmul.mubr.f32.gmra.mxu1 %v3728_v43  ;;  %v968_v52 = vpop.f32.mrf.mxu0  ;;  %2330 = vmatprep.subr.mxu0 %v628_v9  ;;  %v3729_v34 = vld [vmem:[%s7767_s0 + $0x210] sm:$0xff] }
 0x166   :  { %v6065_v2 = vadd.f32 %v1223_v13, %v967_v20  ;;  %v969_v60 = vadd.f32 %v968_v52, %v5344_v3  ;;  %2159 = vmatprep.mubr.f32.mxu1 %v3729_v34  ;;  %2331 = vmatpush2.msra.mxu0 %v627_v23  ;;  %v623_v39 = vld [vmem:[%s7768_s1 + $0xbd0] sm:$0xff]  ;;  %v620_v20 = vld [vmem:[%s7768_s1 + $0xbb8] sm:$0xff] }
 0x167   :  { %v1225_v43 = vpop.f32.mrf.mxu1  ;;  %v972_v9 = vpop.f32.mrf.mxu0  ;;  %1903 = vmatmul.mubr.f32.gmra.mxu0 %v3730_v10  ;;  %2586 = vmatpush1.msra.mxu1 %v631_v47  ;;  %v3731_v52 = vld [vmem:[%s7767_s0 + $0x238] sm:$0xff]  ;;  %v3732_v10 = vld [vmem:[%s7767_s0 + $0x208] sm:$0xff] }
 0x168   :  { %7778 = vst [vmem:[#allocation6_spill] sm:$0xff] %v6065_v2  ;;  %v6080_v13 = vadd.f32 %v1225_v43, %v969_v60  ;;  %v973_v23 = vadd.f32 %v972_v9, %v5325_v61  ;;  %1908 = vmatprep.mubr.f32.mxu0 %v3731_v52  ;;  %2332 = vmatprep.subr.mxu0 %v624_v19  ;;  %v619_v60 = vld [vmem:[%s7768_s1 + $0xbb0] sm:$0xff]  ;;  %v3733_v19 = vld [vmem:[%s7767_s0 + $0x248] sm:$0xff]  ;;  %v616_v52 = vld [vmem:[%s7768_s1 + $0xb98] sm:$0xff] }
 0x169   :  { %v1229_v34 = vpop.f32.mrf.mxu1  ;;  %2160 = vmatmul.mubr.f32.gmra.mxu1 %v3732_v10  ;;  %v974_v47 = vpop.f32.mrf.mxu0  ;;  %2333 = vmatpush2.msra.mxu0 %v623_v39  ;;  %v3738_v2 = vld [vmem:[%s7767_s0 + $0x268] sm:$0xff] }
 0x16a   :  { %7779 = vst [vmem:[#allocation7_spill] sm:$0xff] %v6080_v13  ;;  %v6092_v43 = vadd.f32 %v1229_v34, %v973_v23  ;;  %v975_v9 = vadd.f32 %v974_v47, %v5344_v3  ;;  %2165 = vmatprep.mubr.f32.mxu1 %v3733_v19  ;;  %2334 = vmatprep.subr.mxu0 %v620_v20  ;;  %v615_v23 = vld [vmem:[%s7768_s1 + $0xb90] sm:$0xff]  ;;  %v7781_v34 = vmov 0.0   ;;  %v3736_v13 = vld [vmem:[%s7767_s0 + $0x240] sm:$0xff] }
 0x16b   :  { %v1231_v10 = vpop.f32.mrf.mxu1  ;;  %v978_v39 = vpop.f32.mrf.mxu0  ;;  %1909 = vmatmul.mubr.f32.gmra.mxu0 %v3734_v45  ;;  %3318 = vmatprep.subr.mxu1 %v7781_v34  ;;  %v3735_v19 = vld [vmem:[%s7767_s0 + $0x270] sm:$0xff]  ;;  %v612_v45 = vld [vmem:[%s7768_s1 + $0xb78] sm:$0xff] }
 0x16c   :  { %7780 = vst [vmem:[#allocation8_spill] sm:$0xff] %v6092_v43  ;;  %v6108_v47 = vadd.f32 %v1231_v10, %v975_v9  ;;  %v979_v20 = vadd.f32 %v978_v39, %v5325_v61  ;;  %1914 = vmatprep.mubr.f32.mxu0 %v3735_v19  ;;  %2335 = vmatpush2.msra.mxu0 %v619_v60  ;;  %v611_v10 = vld [vmem:[%s7768_s1 + $0xb70] sm:$0xff]  ;;  %v3737_v19 = vld [vmem:[%s7767_s0 + $0x280] sm:$0xff] }
 0x16d   :  { %v1235_v43 = vpop.f32.mrf.mxu1  ;;  %2166 = vmatmul.mubr.f32.gmra.mxu1 %v3736_v13  ;;  %v980_v9 = vpop.f32.mrf.mxu0  ;;  %2336 = vmatprep.subr.mxu0 %v616_v52  ;;  %v608_v13 = vld [vmem:[%s7768_s1 + $0xb58] sm:$0xff] }
 0x16e   :  { %7782 = vst [vmem:[#allocation9_spill] sm:$0xff] %v6108_v47  ;;  %v6123_v39 = vadd.f32 %v1235_v43, %v979_v20  ;;  %v981_v60 = vadd.f32 %v980_v9, %v5344_v3  ;;  %2171 = vmatprep.mubr.f32.mxu1 %v3737_v19  ;;  %2337 = vmatpush2.msra.mxu0 %v615_v23  ;;  %v607_v43 = vld [vmem:[%s7768_s1 + $0xb50] sm:$0xff]  ;;  %v3739_v9 = vld [vmem:[%s7767_s0 + $0x2a8] sm:$0xff]  ;;  %v604_v19 = vld [vmem:[%s7768_s1 + $0xb38] sm:$0xff] }
 0x16f   :  { %v1237_v47 = vpop.f32.mrf.mxu1  ;;  %v984_v52 = vpop.f32.mrf.mxu0  ;;  %1915 = vmatmul.mubr.f32.gmra.mxu0 %v3738_v2  ;;  %2338 = vmatprep.subr.mxu0 %v612_v45  ;;  %v3740_v45 = vld [vmem:[%s7767_s0 + $0x278] sm:$0xff] }
 0x170   :  { %7783 = vst [vmem:[#allocation10_spill] sm:$0xff] %v6123_v39  ;;  %v6138_v20 = vadd.f32 %v1237_v47, %v981_v60  ;;  %v985_v23 = vadd.f32 %v984_v52, %v5325_v61  ;;  %1920 = vmatprep.mubr.f32.mxu0 %v3739_v9  ;;  %2339 = vmatpush2.msra.mxu0 %v611_v10  ;;  %v603_v60 = vld [vmem:[%s7768_s1 + $0xb30] sm:$0xff]  ;;  %v3741_v9 = vld [vmem:[%s7767_s0 + $0x2b8] sm:$0xff]  ;;  %v3742_v39 = vld [vmem:[%s7767_s0 + $0x2a0] sm:$0xff] }
 0x171   :  { %v1241_v2 = vpop.f32.mrf.mxu1  ;;  %2172 = vmatmul.mubr.f32.gmra.mxu1 %v3740_v45  ;;  %v986_v47 = vpop.f32.mrf.mxu0  ;;  %2340 = vmatprep.subr.mxu0 %v608_v13  ;;  %v600_v45 = vld [vmem:[%s7768_s1 + $0xb18] sm:$0xff] }
 0x172   :  { %7784 = vst [vmem:[#allocation11_spill] sm:$0xff] %v6138_v20  ;;  %v6153_v52 = vadd.f32 %v1241_v2, %v985_v23  ;;  %v987_v10 = vadd.f32 %v986_v47, %v5344_v3  ;;  %2177 = vmatprep.mubr.f32.mxu1 %v3741_v9  ;;  %2341 = vmatpush2.msra.mxu0 %v607_v43  ;;  %v599_v23 = vld [vmem:[%s7768_s1 + $0xb10] sm:$0xff]  ;;  %v3743_v47 = vld [vmem:[%s7767_s0 + $0x2e0] sm:$0xff]  ;;  %v596_v9 = vld [vmem:[%s7768_s1 + $0xaf8] sm:$0xff] }
 0x173   :  { %v1243_v20 = vpop.f32.mrf.mxu1  ;;  %v990_v13 = vpop.f32.mrf.mxu0  ;;  %1921 = vmatmul.mubr.f32.gmra.mxu0 %v3742_v39  ;;  %2342 = vmatprep.subr.mxu0 %v604_v19  ;;  %v3744_v19 = vld [vmem:[%s7767_s0 + $0x2b0] sm:$0xff] }
 0x174   :  { %7785 = vst [vmem:[#allocation12_spill] sm:$0xff] %v6153_v52  ;;  %v6168_v2 = vadd.f32 %v1243_v20, %v987_v10  ;;  %v991_v43 = vadd.f32 %v990_v13, %v5325_v61  ;;  %1926 = vmatprep.mubr.f32.mxu0 %v3743_v47  ;;  %2343 = vmatpush2.msra.mxu0 %v603_v60  ;;  %v595_v10 = vld [vmem:[%s7768_s1 + $0xaf0] sm:$0xff]  ;;  %v3746_v52 = vld [vmem:[%s7767_s0 + $0x2d8] sm:$0xff] }
 0x175   :  { %v1247_v39 = vpop.f32.mrf.mxu1  ;;  %2178 = vmatmul.mubr.f32.gmra.mxu1 %v3744_v19  ;;  %v992_v20 = vpop.f32.mrf.mxu0  ;;  %2344 = vmatprep.subr.mxu0 %v600_v45  ;;  %v3745_v47 = vld [vmem:[%s7767_s0 + $0x2f0] sm:$0xff]  ;;  %v592_v19 = vld [vmem:[%s7768_s1 + $0xad8] sm:$0xff] }
 0x176   :  { %7786 = vst [vmem:[#allocation13_spill] sm:$0xff] %v6168_v2  ;;  %v6183_v13 = vadd.f32 %v1247_v39, %v991_v43  ;;  %v993_v60 = vadd.f32 %v992_v20, %v5344_v3  ;;  %2183 = vmatprep.mubr.f32.mxu1 %v3745_v47  ;;  %2345 = vmatpush2.msra.mxu0 %v599_v23  ;;  %v591_v43 = vld [vmem:[%s7768_s1 + $0xad0] sm:$0xff]  ;;  %v3747_v20 = vld [vmem:[%s7767_s0 + $0x318] sm:$0xff] }
 0x177   :  { %v1249_v2 = vpop.f32.mrf.mxu1  ;;  %v996_v45 = vpop.f32.mrf.mxu0  ;;  %1927 = vmatmul.mubr.f32.gmra.mxu0 %v3746_v52  ;;  %2346 = vmatprep.subr.mxu0 %v596_v9  ;;  %v588_v47 = vld [vmem:[%s7768_s1 + $0xab8] sm:$0xff]  ;;  %v3748_v9 = vld [vmem:[%s7767_s0 + $0x2e8] sm:$0xff] }
 0x178   :  { %7787 = vst [vmem:[#allocation14_spill] sm:$0xff] %v6183_v13  ;;  %v6198_v39 = vadd.f32 %v1249_v2, %v993_v60  ;;  %v997_v23 = vadd.f32 %v996_v45, %v5325_v61  ;;  %1932 = vmatprep.mubr.f32.mxu0 %v3747_v20  ;;  %2347 = vmatpush2.msra.mxu0 %v595_v10  ;;  %v587_v60 = vld [vmem:[%s7768_s1 + $0xab0] sm:$0xff]  ;;  %v3749_v20 = vld [vmem:[%s7767_s0 + $0x328] sm:$0xff] }
 0x179   :  { %v1253_v52 = vpop.f32.mrf.mxu1  ;;  %2184 = vmatmul.mubr.f32.gmra.mxu1 %v3748_v9  ;;  %v998_v2 = vpop.f32.mrf.mxu0  ;;  %2348 = vmatprep.subr.mxu0 %v592_v19  ;;  %v584_v9 = vld [vmem:[%s7768_s1 + $0xa98] sm:$0xff]  ;;  %v3750_v13 = vld [vmem:[%s7767_s0 + $0x310] sm:$0xff] }
 0x17a   :  { %7788 = vst [vmem:[#allocation15_spill] sm:$0xff] %v6198_v39  ;;  %v6213_v45 = vadd.f32 %v1253_v52, %v997_v23  ;;  %v999_v10 = vadd.f32 %v998_v2, %v5344_v3  ;;  %2189 = vmatprep.mubr.f32.mxu1 %v3749_v20  ;;  %2349 = vmatpush2.msra.mxu0 %v591_v43  ;;  %v583_v23 = vld [vmem:[%s7768_s1 + $0xa90] sm:$0xff]  ;;  %v580_v20 = vld [vmem:[%s7768_s1 + $0xa78] sm:$0xff] }
 0x17b   :  { %v1255_v39 = vpop.f32.mrf.mxu1  ;;  %v1002_v19 = vpop.f32.mrf.mxu0  ;;  %1933 = vmatmul.mubr.f32.gmra.mxu0 %v3750_v13  ;;  %2350 = vmatprep.subr.mxu0 %v588_v47  ;;  %v3751_v2 = vld [vmem:[%s7767_s0 + $0x350] sm:$0xff]  ;;  %v3752_v47 = vld [vmem:[%s7767_s0 + $0x320] sm:$0xff] }
 0x17c   :  { %7789 = vst [vmem:[#allocation16_spill] sm:$0xff] %v6213_v45  ;;  %v6228_v52 = vadd.f32 %v1255_v39, %v999_v10  ;;  %v1003_v43 = vadd.f32 %v1002_v19, %v5325_v61  ;;  %1938 = vmatprep.mubr.f32.mxu0 %v3751_v2  ;;  %2351 = vmatpush2.msra.mxu0 %v587_v60  ;;  %v579_v10 = vld [vmem:[%s7768_s1 + $0xa70] sm:$0xff]  ;;  %v3753_v2 = vld [vmem:[%s7767_s0 + $0x360] sm:$0xff]  ;;  %v3754_v45 = vld [vmem:[%s7767_s0 + $0x348] sm:$0xff] }
 0x17d   :  { %v1259_v13 = vpop.f32.mrf.mxu1  ;;  %2190 = vmatmul.mubr.f32.gmra.mxu1 %v3752_v47  ;;  %v1004_v39 = vpop.f32.mrf.mxu0  ;;  %2352 = vmatprep.subr.mxu0 %v584_v9  ;;  %v576_v47 = vld [vmem:[%s7768_s1 + $0xa58] sm:$0xff] }
 0x17e   :  { %7790 = vst [vmem:[#allocation17_spill] sm:$0xff] %v6228_v52  ;;  %v6243_v19 = vadd.f32 %v1259_v13, %v1003_v43  ;;  %v1005_v60 = vadd.f32 %v1004_v39, %v5344_v3  ;;  %2195 = vmatprep.mubr.f32.mxu1 %v3753_v2  ;;  %2353 = vmatpush2.msra.mxu0 %v583_v23  ;;  %v575_v43 = vld [vmem:[%s7768_s1 + $0xa50] sm:$0xff]  ;;  %v3755_v39 = vld [vmem:[%s7767_s0 + $0x388] sm:$0xff]  ;;  %v572_v2 = vld [vmem:[%s7768_s1 + $0xa38] sm:$0xff] }
 0x17f   :  { %v1261_v52 = vpop.f32.mrf.mxu1  ;;  %v1008_v9 = vpop.f32.mrf.mxu0  ;;  %1939 = vmatmul.mubr.f32.gmra.mxu0 %v3754_v45  ;;  %2354 = vmatprep.subr.mxu0 %v580_v20  ;;  %v3756_v20 = vld [vmem:[%s7767_s0 + $0x358] sm:$0xff] }
 0x180   :  { %v6258_v13 = vadd.f32 %v1261_v52, %v1005_v60  ;;  %v1009_v23 = vadd.f32 %v1008_v9, %v5325_v61  ;;  %1944 = vmatprep.mubr.f32.mxu0 %v3755_v39  ;;  %2355 = vmatpush2.msra.mxu0 %v579_v10  ;;  %v571_v61 = vld [vmem:[%s7768_s1 + $0xa30] sm:$0xff]  ;;  %v3757_v9 = vld [vmem:[%s7767_s0 + $0x398] sm:$0xff] }
 0x181   :  { %v1265_v45 = vpop.f32.mrf.mxu1  ;;  %2196 = vmatmul.mubr.f32.gmra.mxu1 %v3756_v20  ;;  %v1010_v52 = vpop.f32.mrf.mxu0  ;;  %2356 = vmatprep.subr.mxu0 %v576_v47  ;;  %v568_v39 = vld [vmem:[%s7768_s1 + $0xa18] sm:$0xff] }
 0x182   :  { %7791 = vst [vmem:[#allocation18_spill] sm:$0xff] %v6258_v13  ;;  %v6273_v60 = vadd.f32 %v1265_v45, %v1009_v23  ;;  %v1011_v10 = vadd.f32 %v1010_v52, %v5344_v3  ;;  %2201 = vmatprep.mubr.f32.mxu1 %v3757_v9  ;;  %2357 = vmatpush2.msra.mxu0 %v575_v43  ;;  %v3758_v13 = vld [vmem:[%s7767_s0 + $0x380] sm:$0xff]  ;;  %v567_v3 = vld [vmem:[%s7768_s1 + $0xa10] sm:$0xff] }
 0x183   :  { %v1267_v20 = vpop.f32.mrf.mxu1  ;;  %v1336_v47 = vpop.f32.mrf.mxu0  ;;  %1945 = vmatmul.mubr.f32.gmra.mxu0 %v3758_v13  ;;  %2358 = vmatprep.subr.mxu0 %v572_v2  ;;  %v3759_v45 = vld [vmem:[%s7767_s0 + $0x3c0] sm:$0xff]  ;;  %v3760_v13 = vld [vmem:[%s7767_s0 + $0x390] sm:$0xff] }
 0x184   :  { %v6288_v23 = vadd.f32 %v1267_v20, %v1011_v10  ;;  %v1337_v43 = vadd.f32 %v1336_v47, %v5366_v15  ;;  %1950 = vmatprep.mubr.f32.mxu0 %v3759_v45  ;;  %2359 = vmatpush2.msra.mxu0 %v571_v61  ;;  %v3761_v15 = vld [vmem:[%s7767_s0 + $0x3d0] sm:$0xff]  ;;  %v3762_v47 = vld [vmem:[%s7767_s0 + $0x3b8] sm:$0xff] }
 0x185   :  { %v1593_v52 = vpop.f32.mrf.mxu1  ;;  %2202 = vmatmul.mubr.f32.gmra.mxu1 %v3760_v13  ;;  %v1338_v2 = vpop.f32.mrf.mxu0  ;;  %2360 = vmatprep.subr.mxu0 %v568_v39 }
 0x186   :  { %v6297_v9 = vadd.f32 %v1593_v52, %v1337_v43  ;;  %v1339_v10 = vadd.f32 %v1338_v2, %v5379_v22  ;;  %2207 = vmatprep.mubr.f32.mxu1 %v3761_v15  ;;  %2361 = vmatpush2.msra.mxu0 %v567_v3  ;;  %v3763_v22 = vld [vmem:[%s7767_s0 + $0x3f8] sm:$0xff]  ;;  %v3764_v3 = vld [vmem:[%s7767_s0 + $0x3c8] sm:$0xff] }
 0x187   :  { %v1595_v20 = vpop.f32.mrf.mxu1  ;;  %v1342_v61 = vpop.f32.mrf.mxu0  ;;  %1951 = vmatmul.mubr.f32.gmra.mxu0 %v3762_v47  ;;  %3093 = vmatprep.subr.mxu0 %v7781_v34 }
 0x188   :  { %v6307_v39 = vadd.f32 %v1595_v20, %v1339_v10  ;;  %v1343_v43 = vadd.f32 %v1342_v61, %v5395_v30  ;;  %1956 = vmatprep.mubr.f32.mxu0 %v3763_v22  ;;  %v3765_v30 = vld [vmem:[%s7767_s0 + $0x408] sm:$0xff]  ;;  %v3766_v20 = vld [vmem:[%s7767_s0 + $0x3f0] sm:$0xff]  ;;  %v3768_v22 = vld [vmem:[%s7767_s0 + $0x400] sm:$0xff] }
 0x189   :  { %v1599_v45 = vpop.f32.mrf.mxu1  ;;  %2208 = vmatmul.mubr.f32.gmra.mxu1 %v3764_v3  ;;  %v1344_v52 = vpop.f32.mrf.mxu0 }
 0x18a   :  { %v6316_v13 = vadd.f32 %v1599_v45, %v1343_v43  ;;  %v1345_v2 = vadd.f32 %v1344_v52, %v5408_v37  ;;  %2213 = vmatprep.mubr.f32.mxu1 %v3765_v30  ;;  %v3767_v37 = vld [vmem:[%s7767_s0 + $0x430] sm:$0xff] }
 0x18b   :  { %v1601_v10 = vpop.f32.mrf.mxu1  ;;  %v1348_v15 = vpop.f32.mrf.mxu0  ;;  %1957 = vmatmul.mubr.f32.gmra.mxu0 %v3766_v20 }
 0x18c   :  { %v6325_v61 = vadd.f32 %v1601_v10, %v1345_v2  ;;  %v1349_v47 = vadd.f32 %v1348_v15, %v5424_v46  ;;  %1962 = vmatprep.mubr.f32.mxu0 %v3767_v37  ;;  %v3769_v46 = vld [vmem:[%s7767_s0 + $0x440] sm:$0xff]  ;;  %v3770_v10 = vld [vmem:[%s7767_s0 + $0x428] sm:$0xff]  ;;  %v3772_v37 = vld [vmem:[%s7767_s0 + $0x438] sm:$0xff] }
 0x18d   :  { %v1605_v43 = vpop.f32.mrf.mxu1  ;;  %2214 = vmatmul.mubr.f32.gmra.mxu1 %v3768_v22  ;;  %v1350_v45 = vpop.f32.mrf.mxu0 }
 0x18e   :  { %v6334_v3 = vadd.f32 %v1605_v43, %v1349_v47  ;;  %v1351_v52 = vadd.f32 %v1350_v45, %v5437_v53  ;;  %2219 = vmatprep.mubr.f32.mxu1 %v3769_v46  ;;  %v3771_v53 = vld [vmem:[%s7767_s0 + $0x468] sm:$0xff] }
 0x18f   :  { %v1607_v2 = vpop.f32.mrf.mxu1  ;;  %v1354_v30 = vpop.f32.mrf.mxu0  ;;  %1963 = vmatmul.mubr.f32.gmra.mxu0 %v3770_v10 }
 0x190   :  { %v6343_v15 = vadd.f32 %v1607_v2, %v1351_v52  ;;  %v1355_v20 = vadd.f32 %v1354_v30, %v5453_v62  ;;  %1968 = vmatprep.mubr.f32.mxu0 %v3771_v53  ;;  %v3773_v62 = vld [vmem:[%s7767_s0 + $0x478] sm:$0xff]  ;;  %v3774_v2 = vld [vmem:[%s7767_s0 + $0x460] sm:$0xff]  ;;  %v3776_v53 = vld [vmem:[%s7767_s0 + $0x470] sm:$0xff] }
 0x191   :  { %v1611_v47 = vpop.f32.mrf.mxu1  ;;  %2220 = vmatmul.mubr.f32.gmra.mxu1 %v3772_v37  ;;  %v1356_v43 = vpop.f32.mrf.mxu0 }
 0x192   :  { %v6352_v22 = vadd.f32 %v1611_v47, %v1355_v20  ;;  %v1357_v45 = vadd.f32 %v1356_v43, %v5466_v6  ;;  %2225 = vmatprep.mubr.f32.mxu1 %v3773_v62  ;;  %v3775_v6 = vld [vmem:[%s7767_s0 + $0x4a0] sm:$0xff] }
 0x193   :  { %v1613_v52 = vpop.f32.mrf.mxu1  ;;  %v1360_v46 = vpop.f32.mrf.mxu0  ;;  %1969 = vmatmul.mubr.f32.gmra.mxu0 %v3774_v2 }
 0x194   :  { %v6361_v30 = vadd.f32 %v1613_v52, %v1357_v45  ;;  %v1361_v10 = vadd.f32 %v1360_v46, %v5482_v16  ;;  %1974 = vmatprep.mubr.f32.mxu0 %v3775_v6  ;;  %v3777_v16 = vld [vmem:[%s7767_s0 + $0x4b0] sm:$0xff]  ;;  %v3778_v52 = vld [vmem:[%s7767_s0 + $0x498] sm:$0xff]  ;;  %v3780_v6 = vld [vmem:[%s7767_s0 + $0x4a8] sm:$0xff] }
 0x195   :  { %v1617_v20 = vpop.f32.mrf.mxu1  ;;  %2226 = vmatmul.mubr.f32.gmra.mxu1 %v3776_v53  ;;  %v1362_v47 = vpop.f32.mrf.mxu0 }
 0x196   :  { %v6370_v37 = vadd.f32 %v1617_v20, %v1361_v10  ;;  %v1363_v43 = vadd.f32 %v1362_v47, %v5495_v24  ;;  %2231 = vmatprep.mubr.f32.mxu1 %v3777_v16  ;;  %v3779_v24 = vld [vmem:[%s7767_s0 + $0x4d8] sm:$0xff] }
 0x197   :  { %v1619_v45 = vpop.f32.mrf.mxu1  ;;  %v1366_v62 = vpop.f32.mrf.mxu0  ;;  %1975 = vmatmul.mubr.f32.gmra.mxu0 %v3778_v52 }
 0x198   :  { %v6379_v46 = vadd.f32 %v1619_v45, %v1363_v43  ;;  %v1367_v2 = vadd.f32 %v1366_v62, %v5511_v33  ;;  %1980 = vmatprep.mubr.f32.mxu0 %v3779_v24  ;;  %v3781_v33 = vld [vmem:[%s7767_s0 + $0x4e8] sm:$0xff]  ;;  %v3782_v45 = vld [vmem:[%s7767_s0 + $0x4d0] sm:$0xff]  ;;  %v3784_v24 = vld [vmem:[%s7767_s0 + $0x4e0] sm:$0xff] }
 0x199   :  { %v1623_v10 = vpop.f32.mrf.mxu1  ;;  %2232 = vmatmul.mubr.f32.gmra.mxu1 %v3780_v6  ;;  %v1368_v20 = vpop.f32.mrf.mxu0 }
 0x19a   :  { %v6388_v53 = vadd.f32 %v1623_v10, %v1367_v2  ;;  %v1369_v47 = vadd.f32 %v1368_v20, %v5524_v41  ;;  %2237 = vmatprep.mubr.f32.mxu1 %v3781_v33  ;;  %v3783_v41 = vld [vmem:[%s7767_s0 + $0x510] sm:$0xff] }
 0x19b   :  { %v1625_v43 = vpop.f32.mrf.mxu1  ;;  %v1372_v16 = vpop.f32.mrf.mxu0  ;;  %1981 = vmatmul.mubr.f32.gmra.mxu0 %v3782_v45 }
 0x19c   :  { %v6397_v62 = vadd.f32 %v1625_v43, %v1369_v47  ;;  %v1373_v52 = vadd.f32 %v1372_v16, %v5540_v51  ;;  %1986 = vmatprep.mubr.f32.mxu0 %v3783_v41  ;;  %v3785_v51 = vld [vmem:[%s7767_s0 + $0x520] sm:$0xff]  ;;  %v3786_v43 = vld [vmem:[%s7767_s0 + $0x508] sm:$0xff]  ;;  %v3788_v41 = vld [vmem:[%s7767_s0 + $0x518] sm:$0xff] }
 0x19d   :  { %v1629_v2 = vpop.f32.mrf.mxu1  ;;  %2238 = vmatmul.mubr.f32.gmra.mxu1 %v3784_v24  ;;  %v1374_v10 = vpop.f32.mrf.mxu0 }
 0x19e   :  { %v6406_v6 = vadd.f32 %v1629_v2, %v1373_v52  ;;  %v1375_v20 = vadd.f32 %v1374_v10, %v5553_v59  ;;  %2243 = vmatprep.mubr.f32.mxu1 %v3785_v51  ;;  %v3787_v59 = vld [vmem:[%s7767_s0 + $0x548] sm:$0xff] }
 0x19f   :  { %v1631_v47 = vpop.f32.mrf.mxu1  ;;  %v1378_v33 = vpop.f32.mrf.mxu0  ;;  %1987 = vmatmul.mubr.f32.gmra.mxu0 %v3786_v43 }
 0x1a0   :  { %v6415_v16 = vadd.f32 %v1631_v47, %v1375_v20  ;;  %v1379_v45 = vadd.f32 %v1378_v33, %v5569_v7  ;;  %1992 = vmatprep.mubr.f32.mxu0 %v3787_v59  ;;  %v3789_v7 = vld [vmem:[%s7767_s0 + $0x558] sm:$0xff]  ;;  %v3790_v47 = vld [vmem:[%s7767_s0 + $0x540] sm:$0xff]  ;;  %v3792_v59 = vld [vmem:[%s7767_s0 + $0x550] sm:$0xff] }
 0x1a1   :  { %v1635_v52 = vpop.f32.mrf.mxu1  ;;  %2244 = vmatmul.mubr.f32.gmra.mxu1 %v3788_v41  ;;  %v1380_v2 = vpop.f32.mrf.mxu0 }
 0x1a2   :  { %v6424_v24 = vadd.f32 %v1635_v52, %v1379_v45  ;;  %v1381_v10 = vadd.f32 %v1380_v2, %v5582_v17  ;;  %2249 = vmatprep.mubr.f32.mxu1 %v3789_v7  ;;  %v3791_v17 = vld [vmem:[%s7767_s0 + $0x580] sm:$0xff] }
 0x1a3   :  { %v1637_v20 = vpop.f32.mrf.mxu1  ;;  %v1384_v51 = vpop.f32.mrf.mxu0  ;;  %1993 = vmatmul.mubr.f32.gmra.mxu0 %v3790_v47 }
 0x1a4   :  { %v6433_v33 = vadd.f32 %v1637_v20, %v1381_v10  ;;  %v1385_v43 = vadd.f32 %v1384_v51, %v5598_v27  ;;  %1998 = vmatprep.mubr.f32.mxu0 %v3791_v17  ;;  %v3793_v27 = vld [vmem:[%s7767_s0 + $0x590] sm:$0xff]  ;;  %v3794_v20 = vld [vmem:[%s7767_s0 + $0x578] sm:$0xff]  ;;  %v3796_v17 = vld [vmem:[%s7767_s0 + $0x588] sm:$0xff] }
 0x1a5   :  { %v1641_v45 = vpop.f32.mrf.mxu1  ;;  %2250 = vmatmul.mubr.f32.gmra.mxu1 %v3792_v59  ;;  %v1386_v52 = vpop.f32.mrf.mxu0 }
 0x1a6   :  { %v6442_v41 = vadd.f32 %v1641_v45, %v1385_v43  ;;  %v1387_v2 = vadd.f32 %v1386_v52, %v5611_v36  ;;  %2255 = vmatprep.mubr.f32.mxu1 %v3793_v27  ;;  %v3795_v36 = vld [vmem:[%s7767_s0 + $0x5b8] sm:$0xff] }
 0x1a7   :  { %v1643_v10 = vpop.f32.mrf.mxu1  ;;  %v1390_v7 = vpop.f32.mrf.mxu0  ;;  %1999 = vmatmul.mubr.f32.gmra.mxu0 %v3794_v20 }
 0x1a8   :  { %v6451_v51 = vadd.f32 %v1643_v10, %v1387_v2  ;;  %v1391_v47 = vadd.f32 %v1390_v7, %v5627_v48  ;;  %2004 = vmatprep.mubr.f32.mxu0 %v3795_v36  ;;  %v3797_v48 = vld [vmem:[%s7767_s0 + $0x5c8] sm:$0xff]  ;;  %v3798_v10 = vld [vmem:[%s7767_s0 + $0x5b0] sm:$0xff]  ;;  %v3800_v36 = vld [vmem:[%s7767_s0 + $0x5c0] sm:$0xff] }
 0x1a9   :  { %v1647_v43 = vpop.f32.mrf.mxu1  ;;  %2256 = vmatmul.mubr.f32.gmra.mxu1 %v3796_v17  ;;  %v1392_v45 = vpop.f32.mrf.mxu0 }
 0x1aa   :  { %v6460_v59 = vadd.f32 %v1647_v43, %v1391_v47  ;;  %v1393_v52 = vadd.f32 %v1392_v45, %v5640_v57  ;;  %2261 = vmatprep.mubr.f32.mxu1 %v3797_v48  ;;  %v3799_v57 = vld [vmem:[%s7767_s0 + $0x5f0] sm:$0xff] }
 0x1ab   :  { %v1649_v2 = vpop.f32.mrf.mxu1  ;;  %v1396_v27 = vpop.f32.mrf.mxu0  ;;  %2005 = vmatmul.mubr.f32.gmra.mxu0 %v3798_v10 }
 0x1ac   :  { %v6469_v7 = vadd.f32 %v1649_v2, %v1393_v52  ;;  %v1397_v20 = vadd.f32 %v1396_v27, %v5656_v5  ;;  %2010 = vmatprep.mubr.f32.mxu0 %v3799_v57  ;;  %v3801_v5 = vld [vmem:[%s7767_s0 + $0x600] sm:$0xff]  ;;  %v3802_v2 = vld [vmem:[%s7767_s0 + $0x5e8] sm:$0xff]  ;;  %v3804_v57 = vld [vmem:[%s7767_s0 + $0x5f8] sm:$0xff] }
 0x1ad   :  { %v1653_v47 = vpop.f32.mrf.mxu1  ;;  %2262 = vmatmul.mubr.f32.gmra.mxu1 %v3800_v36  ;;  %v1398_v43 = vpop.f32.mrf.mxu0 }
 0x1ae   :  { %v6478_v17 = vadd.f32 %v1653_v47, %v1397_v20  ;;  %v1399_v45 = vadd.f32 %v1398_v43, %v5669_v18  ;;  %2267 = vmatprep.mubr.f32.mxu1 %v3801_v5  ;;  %v3803_v18 = vld [vmem:[%s7767_s0 + $0x628] sm:$0xff] }
 0x1af   :  { %v1655_v52 = vpop.f32.mrf.mxu1  ;;  %v1402_v48 = vpop.f32.mrf.mxu0  ;;  %2011 = vmatmul.mubr.f32.gmra.mxu0 %v3802_v2 }
 0x1b0   :  { %v6487_v27 = vadd.f32 %v1655_v52, %v1399_v45  ;;  %v1403_v10 = vadd.f32 %v1402_v48, %v5685_v29  ;;  %2016 = vmatprep.mubr.f32.mxu0 %v3803_v18  ;;  %v3805_v29 = vld [vmem:[%s7767_s0 + $0x638] sm:$0xff]  ;;  %v3806_v52 = vld [vmem:[%s7767_s0 + $0x620] sm:$0xff]  ;;  %v3808_v18 = vld [vmem:[%s7767_s0 + $0x630] sm:$0xff] }
 0x1b1   :  { %v1659_v20 = vpop.f32.mrf.mxu1  ;;  %2268 = vmatmul.mubr.f32.gmra.mxu1 %v3804_v57  ;;  %v1404_v47 = vpop.f32.mrf.mxu0 }
 0x1b2   :  { %v6496_v36 = vadd.f32 %v1659_v20, %v1403_v10  ;;  %v1405_v43 = vadd.f32 %v1404_v47, %v5698_v40  ;;  %2273 = vmatprep.mubr.f32.mxu1 %v3805_v29  ;;  %v3807_v40 = vld [vmem:[%s7767_s0 + $0x660] sm:$0xff] }
 0x1b3   :  { %v1661_v45 = vpop.f32.mrf.mxu1  ;;  %v1408_v5 = vpop.f32.mrf.mxu0  ;;  %2017 = vmatmul.mubr.f32.gmra.mxu0 %v3806_v52 }
 0x1b4   :  { %v6505_v48 = vadd.f32 %v1661_v45, %v1405_v43  ;;  %v1409_v2 = vadd.f32 %v1408_v5, %v5714_v54  ;;  %2022 = vmatprep.mubr.f32.mxu0 %v3807_v40  ;;  %v3809_v54 = vld [vmem:[%s7767_s0 + $0x670] sm:$0xff]  ;;  %v3810_v45 = vld [vmem:[%s7767_s0 + $0x658] sm:$0xff]  ;;  %v3812_v40 = vld [vmem:[%s7767_s0 + $0x668] sm:$0xff] }
 0x1b5   :  { %v1665_v10 = vpop.f32.mrf.mxu1  ;;  %2274 = vmatmul.mubr.f32.gmra.mxu1 %v3808_v18  ;;  %v1410_v20 = vpop.f32.mrf.mxu0 }
 0x1b6   :  { %v6514_v57 = vadd.f32 %v1665_v10, %v1409_v2  ;;  %v1411_v47 = vadd.f32 %v1410_v20, %v5727_v1  ;;  %2279 = vmatprep.mubr.f32.mxu1 %v3809_v54  ;;  %v3811_v1 = vld [vmem:[%s7767_s0 + $0x698] sm:$0xff] }
 0x1b7   :  { %v1667_v43 = vpop.f32.mrf.mxu1  ;;  %v1414_v29 = vpop.f32.mrf.mxu0  ;;  %2023 = vmatmul.mubr.f32.gmra.mxu0 %v3810_v45 }
 0x1b8   :  { %v6523_v5 = vadd.f32 %v1667_v43, %v1411_v47  ;;  %v1415_v52 = vadd.f32 %v1414_v29, %v5743_v14  ;;  %2028 = vmatprep.mubr.f32.mxu0 %v3811_v1  ;;  %v3813_v14 = vld [vmem:[%s7767_s0 + $0x6a8] sm:$0xff]  ;;  %v3814_v43 = vld [vmem:[%s7767_s0 + $0x690] sm:$0xff]  ;;  %v3816_v1 = vld [vmem:[%s7767_s0 + $0x6a0] sm:$0xff] }
 0x1b9   :  { %v1671_v2 = vpop.f32.mrf.mxu1  ;;  %2280 = vmatmul.mubr.f32.gmra.mxu1 %v3812_v40  ;;  %v1416_v10 = vpop.f32.mrf.mxu0 }
 0x1ba   :  { %v6532_v18 = vadd.f32 %v1671_v2, %v1415_v52  ;;  %v1417_v20 = vadd.f32 %v1416_v10, %v5756_v28  ;;  %2285 = vmatprep.mubr.f32.mxu1 %v3813_v14  ;;  %v3815_v28 = vld [vmem:[%s7767_s0 + $0x6d0] sm:$0xff] }
 0x1bb   :  { %v1673_v47 = vpop.f32.mrf.mxu1  ;;  %v1420_v54 = vpop.f32.mrf.mxu0  ;;  %2029 = vmatmul.mubr.f32.gmra.mxu0 %v3814_v43 }
 0x1bc   :  { %v6541_v29 = vadd.f32 %v1673_v47, %v1417_v20  ;;  %v1421_v45 = vadd.f32 %v1420_v54, %v5769_v42  ;;  %2034 = vmatprep.mubr.f32.mxu0 %v3815_v28  ;;  %v3817_v42 = vld [vmem:[%s7767_s0 + $0x6e0] sm:$0xff]  ;;  %v3818_v47 = vld [vmem:[%s7767_s0 + $0x6c8] sm:$0xff]  ;;  %v3820_v28 = vld [vmem:[%s7767_s0 + $0x6d8] sm:$0xff] }
 0x1bd   :  { %v1677_v52 = vpop.f32.mrf.mxu1  ;;  %2286 = vmatmul.mubr.f32.gmra.mxu1 %v3816_v1  ;;  %v1422_v2 = vpop.f32.mrf.mxu0  ;;  %v2955_v1 = vld [vmem:[%s7770_s3 + $0x78] sm:$0xff] }
 0x1be   :  { %v6550_v40 = vadd.f32 %v1677_v52, %v1421_v45  ;;  %v1423_v10 = vadd.f32 %v1422_v2, %v5782_v55  ;;  %2291 = vmatprep.mubr.f32.mxu1 %v3817_v42  ;;  %v3819_v55 = vld [vmem:[%s7767_s0 + $0x28] sm:$0xff] }
 0x1bf   :  { %v1679_v20 = vpop.f32.mrf.mxu1  ;;  %v1426_v14 = vpop.f32.mrf.mxu0  ;;  %2035 = vmatmul.mubr.f32.gmra.mxu0 %v3818_v47 }
 0x1c0   :  { %v6559_v54 = vadd.f32 %v1679_v20, %v1423_v10  ;;  %v1427_v43 = vadd.f32 %v1426_v14, %v5795_v4  ;;  %2362 = vmatprep.mubr.f32.mxu0 %v3819_v55  ;;  %v3821_v20 = vld [vmem:[%s7767_s0 + $0x20] sm:$0xff]  ;;  %v2954_v14 = vld [vmem:[%s7770_s3 + $0x70] sm:$0xff] }
 0x1c1   :  { %v1683_v45 = vpop.f32.mrf.mxu1  ;;  %2292 = vmatmul.mubr.f32.gmra.mxu1 %v3820_v28  ;;  %v1428_v52 = vpop.f32.mrf.mxu0 }
 0x1c2   :  { %v6571_v2 = vadd.f32 %v1683_v45, %v1427_v43  ;;  %v1429_v4 = vadd.f32 %v1428_v52, %v5810_v21  ;;  %2619 = vmatprep.mubr.f32.mxu1 %v7781_v34  ;;  %v3822_v21 = vld [vmem:[%s7767_s0 + $0x60] sm:$0xff]  ;;  %v3823_v45 = vld [vmem:[%s7767_s0 + $0x30] sm:$0xff] }
 0x1c3   :  { %v1685_v10 = vpop.f32.mrf.mxu1  ;;  %v1432_v42 = vpop.f32.mrf.mxu0  ;;  %2363 = vmatmul.mubr.f32.vlgmr.msra.gmra.mxu0 %v3821_v20  ;;  %v2952_v20 = vld [vmem:[%s7770_s3 + $0x60] sm:$0xff] }
 0x1c4   :  { %v6581_v47 = vadd.f32 %v1685_v10, %v1429_v4  ;;  %v1433_v43 = vadd.f32 %v1432_v42, %v5825_v38  ;;  %2368 = vmatprep.mubr.f32.mxu0 %v3822_v21  ;;  %3094 = vmatpush1.msra.mxu0 %v2955_v1  ;;  %v2953_v38 = vld [vmem:[%s7770_s3 + $0x68] sm:$0xff]  ;;  %v3824_v42 = vld [vmem:[%s7767_s0 + $0x58] sm:$0xff] }
 0x1c5   :  { %v1689_v55 = vpop.f32.mrf.mxu1  ;;  %3623 = vmatmul.mubr.msk.f32.vlgmr.msra.gmra.mxu1 %vm659_vm0, %v3823_v45  ;;  %v1434_v28 = vpop.f32.mrf.mxu0  ;;  %3095 = vmatprep.subr.mxu0 %v7781_v34 }
 0x1c6   :  { %v6595_v52 = vadd.f32 %v1689_v55, %v1433_v43  ;;  %v1435_v4 = vadd.f32 %v1434_v28, %v5840_v56  ;;  %2625 = vmatprep.mubr.f32.mxu1 %v7781_v34  ;;  %3096 = vmatpush1.msra.mxu0 %v2954_v14  ;;  %v3825_v14 = vld [vmem:[%s7767_s0 + $0x98] sm:$0xff]  ;;  %v3826_v55 = vld [vmem:[%s7767_s0 + $0x68] sm:$0xff] }
 0x1c7   :  { %v1691_v1 = vpop.f32.mrf.mxu1  ;;  %v1438_v10 = vpop.f32.mrf.mxu0  ;;  %2369 = vmatmul.mubr.f32.gmra.mxu0 %v3824_v42  ;;  %3097 = vmatprep.subr.mxu0 %v7781_v34  ;;  %v2950_v42 = vld [vmem:[%s7770_s3 + $0x50] sm:$0xff] }
 0x1c8   :  { %v6606_v43 = vadd.f32 %v1691_v1, %v1435_v4  ;;  %v1439_v56 = vadd.f32 %v1438_v10, %v5855_v11  ;;  %2374 = vmatprep.mubr.f32.mxu0 %v3825_v14  ;;  %3098 = vmatpush1.msra.mxu0 %v2953_v38  ;;  %v2951_v11 = vld [vmem:[%s7770_s3 + $0x58] sm:$0xff]  ;;  %v3827_v10 = vld [vmem:[%s7767_s0 + $0x90] sm:$0xff] }
 0x1c9   :  { %v1695_v21 = vpop.f32.mrf.mxu1  ;;  %3624 = vmatmul.mubr.msk.f32.gmra.mxu1 %vm659_vm0, %v3826_v55  ;;  %v1440_v45 = vpop.f32.mrf.mxu0  ;;  %3099 = vmatprep.subr.mxu0 %v7781_v34  ;;  %v2987_v14 = vld [vmem:[%s7770_s3 + $0x178] sm:$0xff]  ;;  %v3829_v55 = vld [vmem:[%s7767_s0 + $0xa0] sm:$0xff] }
 0x1ca   :  { %v6620_v28 = vadd.f32 %v1695_v21, %v1439_v56  ;;  %v1441_v4 = vadd.f32 %v1440_v45, %v5870_v31  ;;  %2631 = vmatprep.mubr.f32.mxu1 %v7781_v34  ;;  %3100 = vmatpush1.msra.mxu0 %v2952_v20  ;;  %v3828_v20 = vld [vmem:[%s7767_s0 + $0xd0] sm:$0xff] }
 0x1cb   :  { %v1697_v38 = vpop.f32.mrf.mxu1  ;;  %v1444_v1 = vpop.f32.mrf.mxu0  ;;  %2375 = vmatmul.mubr.f32.gmra.mxu0 %v3827_v10  ;;  %3101 = vmatprep.subr.mxu0 %v7781_v34  ;;  %v3830_v10 = vld [vmem:[%s7767_s0 + $0xc8] sm:$0xff] }
 0x1cc   :  { %v6631_v56 = vadd.f32 %v1697_v38, %v1441_v4  ;;  %v1445_v31 = vadd.f32 %v1444_v1, %v5885_v49  ;;  %2380 = vmatprep.mubr.f32.mxu0 %v3828_v20  ;;  %3102 = vmatpush1.msra.mxu0 %v2951_v11  ;;  %v2949_v11 = vld [vmem:[%s7770_s3 + $0x48] sm:$0xff] }
 0x1cd   :  { %v1701_v21 = vpop.f32.mrf.mxu1  ;;  %3625 = vmatmul.mubr.msk.f32.gmra.mxu1 %vm659_vm0, %v3829_v55  ;;  %v1446_v45 = vpop.f32.mrf.mxu0  ;;  %3103 = vmatprep.subr.mxu0 %v7781_v34 }
 0x1ce   :  { %v6645_v49 = vadd.f32 %v1701_v21, %v1445_v31  ;;  %v1447_v4 = vadd.f32 %v1446_v45, %v5900_v8  ;;  %2637 = vmatprep.mubr.f32.mxu1 %v7781_v34  ;;  %3104 = vmatpush1.msra.mxu0 %v2950_v42  ;;  %v3831_v8 = vld [vmem:[%s7767_s0 + $0x108] sm:$0xff]  ;;  %v3832_v21 = vld [vmem:[%s7767_s0 + $0xd8] sm:$0xff] }
 0x1cf   :  { %v1703_v38 = vpop.f32.mrf.mxu1  ;;  %v1450_v1 = vpop.f32.mrf.mxu0  ;;  %2381 = vmatmul.mubr.f32.gmra.mxu0 %v3830_v10  ;;  %3319 = vmatpush1.msra.mxu1 %v2987_v14 }
 0x1d0   :  { %v6655_v20 = vadd.f32 %v1703_v38, %v1447_v4  ;;  %v1451_v31 = vadd.f32 %v1450_v1, %v5915_v26  ;;  %2386 = vmatprep.mubr.f32.mxu0 %v3831_v8  ;;  %3105 = vmatprep.subr.mxu0 %v7781_v34  ;;  %v2948_v26 = vld [vmem:[%s7770_s3 + $0x40] sm:$0xff] }
 0x1d1   :  { %v1707_v42 = vpop.f32.mrf.mxu1  ;;  %3626 = vmatmul.mubr.msk.f32.gmra.mxu1 %vm659_vm0, %v3832_v21  ;;  %v1452_v55 = vpop.f32.mrf.mxu0  ;;  %3106 = vmatpush1.msra.mxu0 %v2949_v11  ;;  %v3833_v1 = vld [vmem:[%s7767_s0 + $0x100] sm:$0xff]  ;;  %v2947_v11 = vld [vmem:[%s7770_s3 + $0x38] sm:$0xff] }
 0x1d2   :  { %v6669_v14 = vadd.f32 %v1707_v42, %v1451_v31  ;;  %v1453_v45 = vadd.f32 %v1452_v55, %v5930_v50  ;;  %2643 = vmatprep.mubr.f32.mxu1 %v7781_v34  ;;  %3107 = vmatprep.subr.mxu0 %v7781_v34  ;;  %v3834_v31 = vld [vmem:[%s7767_s0 + $0x140] sm:$0xff]  ;;  %v3835_v42 = vld [vmem:[%s7767_s0 + $0x110] sm:$0xff] }
 0x1d3   :  { %v1709_v4 = vpop.f32.mrf.mxu1  ;;  %v1456_v38 = vpop.f32.mrf.mxu0  ;;  %2387 = vmatmul.mubr.f32.gmra.mxu0 %v3833_v1  ;;  %3320 = vmatprep.subr.mxu1 %v7781_v34  ;;  %v2986_v1 = vld [vmem:[%s7770_s3 + $0x170] sm:$0xff] }
 0x1d4   :  { %v6681_v10 = vadd.f32 %v1709_v4, %v1453_v45  ;;  %v1457_v50 = vadd.f32 %v1456_v38, %v5945_v12  ;;  %2392 = vmatprep.mubr.f32.mxu0 %v3834_v31  ;;  %3108 = vmatpush1.msra.mxu0 %v2948_v26  ;;  %v2946_v12 = vld [vmem:[%s7770_s3 + $0x30] sm:$0xff]  ;;  %v3836_v38 = vld [vmem:[%s7767_s0 + $0x138] sm:$0xff] }
 0x1d5   :  { %v1713_v8 = vpop.f32.mrf.mxu1  ;;  %3627 = vmatmul.mubr.msk.f32.gmra.mxu1 %vm659_vm0, %v3835_v42  ;;  %v1458_v21 = vpop.f32.mrf.mxu0  ;;  %3109 = vmatprep.subr.mxu0 %v7781_v34 }
 0x1d6   :  { %v6695_v55 = vadd.f32 %v1713_v8, %v1457_v50  ;;  %v1459_v45 = vadd.f32 %v1458_v21, %v5960_v35  ;;  %2649 = vmatprep.mubr.f32.mxu1 %v7781_v34  ;;  %3110 = vmatpush1.msra.mxu0 %v2947_v11  ;;  %v3837_v11 = vld [vmem:[%s7767_s0 + $0x178] sm:$0xff]  ;;  %v3838_v8 = vld [vmem:[%s7767_s0 + $0x148] sm:$0xff] }
 0x1d7   :  { %v1715_v26 = vpop.f32.mrf.mxu1  ;;  %v1462_v4 = vpop.f32.mrf.mxu0  ;;  %2393 = vmatmul.mubr.f32.gmra.mxu0 %v3836_v38  ;;  %3111 = vmatprep.subr.mxu0 %v7781_v34  ;;  %v2944_v38 = vld [vmem:[%s7770_s3 + $0x20] sm:$0xff] }
 0x1d8   :  { %v6706_v50 = vadd.f32 %v1715_v26, %v1459_v45  ;;  %v1463_v35 = vadd.f32 %v1462_v4, %v5975_v63  ;;  %2398 = vmatprep.mubr.f32.mxu0 %v3837_v11  ;;  %3112 = vmatpush1.msra.mxu0 %v2946_v12  ;;  %v2945_v63 = vld [vmem:[%s7770_s3 + $0x28] sm:$0xff]  ;;  %v3839_v4 = vld [vmem:[%s7767_s0 + $0x170] sm:$0xff] }
 0x1d9   :  { %v1719_v31 = vpop.f32.mrf.mxu1  ;;  %3628 = vmatmul.mubr.msk.f32.gmra.mxu1 %vm659_vm0, %v3838_v8  ;;  %v1464_v42 = vpop.f32.mrf.mxu0  ;;  %3113 = vmatprep.subr.mxu0 %v7781_v34 }
 0x1da   :  { %v6720_v21 = vadd.f32 %v1719_v31, %v1463_v35  ;;  %v1465_v45 = vadd.f32 %v1464_v42, %v5990_v25  ;;  %2655 = vmatprep.mubr.f32.mxu1 %v7781_v34  ;;  %3321 = vmatpush1.msra.mxu1 %v2986_v1  ;;  %v3840_v1 = vld [vmem:[%s7767_s0 + $0x1b0] sm:$0xff]  ;;  %v3841_v31 = vld [vmem:[%s7767_s0 + $0x180] sm:$0xff] }
 0x1db   :  { %v1721_v12 = vpop.f32.mrf.mxu1  ;;  %v1468_v26 = vpop.f32.mrf.mxu0  ;;  %2399 = vmatmul.mubr.f32.gmra.mxu0 %v3839_v4  ;;  %3322 = vmatprep.subr.mxu1 %v7781_v34  ;;  %v2985_v4 = vld [vmem:[%s7770_s3 + $0x168] sm:$0xff] }
 0x1dc   :  { %7792 = vst [vmem:[#allocation19_spill] sm:$0xff] %v6720_v21  ;;  %v6731_v35 = vadd.f32 %v1721_v12, %v1465_v45  ;;  %v1469_v25 = vadd.f32 %v1468_v26, %v6005_v58  ;;  %2404 = vmatprep.mubr.f32.mxu0 %v3840_v1  ;;  %3114 = vmatpush1.msra.mxu0 %v2945_v63  ;;  %v2943_v58 = vld [vmem:[%s7770_s3 + $0x18] sm:$0xff]  ;;  %v3842_v26 = vld [vmem:[%s7767_s0 + $0x1a8] sm:$0xff] }
 0x1dd   :  { %v1725_v11 = vpop.f32.mrf.mxu1  ;;  %3629 = vmatmul.mubr.msk.f32.gmra.mxu1 %vm659_vm0, %v3841_v31  ;;  %v1470_v8 = vpop.f32.mrf.mxu0  ;;  %3115 = vmatprep.subr.mxu0 %v7781_v34 }
 0x1de   :  { %v6745_v42 = vadd.f32 %v1725_v11, %v1469_v25  ;;  %v1471_v45 = vadd.f32 %v1470_v8, %v6020_v32  ;;  %2661 = vmatprep.mubr.f32.mxu1 %v7781_v34  ;;  %3116 = vmatpush1.msra.mxu0 %v2944_v38  ;;  %v3843_v38 = vld [vmem:[%s7767_s0 + $0x1e8] sm:$0xff]  ;;  %v3844_v11 = vld [vmem:[%s7767_s0 + $0x1b8] sm:$0xff] }
 0x1df   :  { %v1727_v63 = vpop.f32.mrf.mxu1  ;;  %v1474_v12 = vpop.f32.mrf.mxu0  ;;  %2405 = vmatmul.mubr.f32.gmra.mxu0 %v3842_v26  ;;  %3117 = vmatprep.subr.mxu0 %v7781_v34  ;;  %v2941_v26 = vld [vmem:[%s7770_s3 + $0x8] sm:$0xff] }
 0x1e0   :  { %7793 = vst [vmem:[#allocation20_spill] sm:$0xff] %v6745_v42  ;;  %v6756_v25 = vadd.f32 %v1727_v63, %v1471_v45  ;;  %v1475_v32 = vadd.f32 %v1474_v12, %v6035_v0  ;;  %2410 = vmatprep.mubr.f32.mxu0 %v3843_v38  ;;  %3118 = vmatpush1.msra.mxu0 %v2943_v58  ;;  %v2942_v0 = vld [vmem:[%s7770_s3 + $0x10] sm:$0xff]  ;;  %v3845_v12 = vld [vmem:[%s7767_s0 + $0x1e0] sm:$0xff]  ;;  %v7797_v38 = vld [vmem:[#allocation6_spill] sm:$0xff] }
 0x1e1   :  { %v1731_v1 = vpop.f32.mrf.mxu1  ;;  %3630 = vmatmul.mubr.msk.f32.gmra.mxu1 %vm659_vm0, %v3844_v11  ;;  %v1476_v31 = vpop.f32.mrf.mxu0  ;;  %3119 = vmatprep.subr.mxu0 %v7781_v34  ;;  %v3847_v11 = vld [vmem:[%s7767_s0 + $0x1f0] sm:$0xff] }
 0x1e2   :  { %7794 = vst [vmem:[#allocation21_spill] sm:$0xff] %v6756_v25  ;;  %v6770_v8 = vadd.f32 %v1731_v1, %v1475_v32  ;;  %v1477_v45 = vadd.f32 %v1476_v31, %v6050_v44  ;;  %2667 = vmatprep.mubr.f32.mxu1 %v7781_v34  ;;  %3323 = vmatpush1.msra.mxu1 %v2985_v4  ;;  %v3846_v4 = vld [vmem:[%s7767_s0 + $0x220] sm:$0xff] }
 0x1e3   :  { %v1733_v58 = vpop.f32.mrf.mxu1  ;;  %v1480_v63 = vpop.f32.mrf.mxu0  ;;  %2411 = vmatmul.mubr.f32.gmra.mxu0 %v3845_v12  ;;  %3324 = vmatprep.subr.mxu1 %v7781_v34  ;;  %v3882_v25 = vld [vmem:[%s7767_s0 + $0x480] sm:$0xff] }
 0x1e4   :  { %7795 = vst [vmem:[#allocation22_spill] sm:$0xff] %v6770_v8  ;;  %v6781_v32 = vadd.f32 %v1733_v58, %v1477_v45  ;;  %v1481_v44 = vadd.f32 %v1480_v63, %v7797_v38  ;;  %2416 = vmatprep.mubr.f32.mxu0 %v3846_v4  ;;  %3120 = vmatpush1.msra.mxu0 %v2942_v0  ;;  %v2940_v45 = vld [vmem:[%s7770_s3] sm:$0xff]  ;;  %v7799_v63 = vld [vmem:[#allocation7_spill] sm:$0xff]  ;;  %v3848_v4 = vld [vmem:[%s7767_s0 + $0x218] sm:$0xff] }
 0x1e5   :  { %v1737_v1 = vpop.f32.mrf.mxu1  ;;  %3631 = vmatmul.mubr.msk.f32.gmra.mxu1 %vm659_vm0, %v3847_v11  ;;  %v1482_v31 = vpop.f32.mrf.mxu0  ;;  %3121 = vmatprep.subr.mxu0 %v7781_v34  ;;  %v2971_v11 = vld [vmem:[%s7770_s3 + $0xf8] sm:$0xff] }
 0x1e6   :  { %7796 = vst [vmem:[#allocation23_spill] sm:$0xff] %v6781_v32  ;;  %v6795_v58 = vadd.f32 %v1737_v1, %v1481_v44  ;;  %v1483_v12 = vadd.f32 %v1482_v31, %v7799_v63  ;;  %2673 = vmatprep.mubr.f32.mxu1 %v7781_v34  ;;  %3122 = vmatpush1.msra.mxu0 %v2941_v26  ;;  %v7801_v1 = vld [vmem:[#allocation8_spill] sm:$0xff]  ;;  %v2984_v63 = vld [vmem:[%s7770_s3 + $0x160] sm:$0xff]  ;;  %v2962_v32 = vld [vmem:[%s7770_s3 + $0xb0] sm:$0xff] }
 0x1e7   :  { %v1739_v0 = vpop.f32.mrf.mxu1  ;;  %v1486_v38 = vpop.f32.mrf.mxu0  ;;  %2417 = vmatmul.mubr.f32.gmra.mxu0 %v3848_v4  ;;  %3123 = vmatprep.subr.mxu0 %v7781_v34  ;;  %v3849_v26 = vld [vmem:[%s7767_s0 + $0x258] sm:$0xff] }
 0x1e8   :  { %7798 = vst [vmem:[#allocation6_spill] sm:$0xff] %v6795_v58  ;;  %v6806_v44 = vadd.f32 %v1739_v0, %v1483_v12  ;;  %v1487_v31 = vadd.f32 %v1486_v38, %v7801_v1  ;;  %2422 = vmatprep.mubr.f32.mxu0 %v3849_v26  ;;  %3124 = vmatpush1.msra.mxu0 %v2940_v45  ;;  %v3850_v58 = vld [vmem:[%s7767_s0 + $0x228] sm:$0xff]  ;;  %v7803_v38 = vld [vmem:[#allocation9_spill] sm:$0xff]  ;;  %v2970_v45 = vld [vmem:[%s7770_s3 + $0xf0] sm:$0xff] }
 0x1e9   :  { %v1743_v4 = vpop.f32.mrf.mxu1  ;;  %3632 = vmatmul.mubr.msk.f32.gmra.mxu1 %vm659_vm0, %v3850_v58  ;;  %v1488_v12 = vpop.f32.mrf.mxu0  ;;  %3125 = vmatprep.subr.mxu0 %v7781_v34  ;;  %v3851_v58 = vld [vmem:[%s7767_s0 + $0x250] sm:$0xff] }
 0x1ea   :  { %7800 = vst [vmem:[#allocation7_spill] sm:$0xff] %v6806_v44  ;;  %v6820_v0 = vadd.f32 %v1743_v4, %v1487_v31  ;;  %v1489_v1 = vadd.f32 %v1488_v12, %v7803_v38  ;;  %2679 = vmatprep.mubr.f32.mxu1 %v7781_v34  ;;  %3126 = vmatpush2.msra.mxu0 %v2971_v11  ;;  %v7805_v31 = vld [vmem:[#allocation10_spill] sm:$0xff]  ;;  %v3852_v11 = vld [vmem:[%s7767_s0 + $0x290] sm:$0xff]  ;;  %v3853_v38 = vld [vmem:[%s7767_s0 + $0x260] sm:$0xff] }
 0x1eb   :  { %v1745_v26 = vpop.f32.mrf.mxu1  ;;  %v1492_v44 = vpop.f32.mrf.mxu0  ;;  %2423 = vmatmul.mubr.f32.gmra.mxu0 %v3851_v58  ;;  %3325 = vmatpush1.msra.mxu1 %v2984_v63 }
 0x1ec   :  { %7802 = vst [vmem:[#allocation8_spill] sm:$0xff] %v6820_v0  ;;  %v6830_v8 = vadd.f32 %v1745_v26, %v1489_v1  ;;  %v1493_v4 = vadd.f32 %v1492_v44, %v7805_v31  ;;  %2428 = vmatprep.mubr.f32.mxu0 %v3852_v11  ;;  %3127 = vmatprep.subr.mxu0 %v7781_v34  ;;  %v2969_v44 = vld [vmem:[%s7770_s3 + $0xe8] sm:$0xff]  ;;  %v7807_v1 = vld [vmem:[#allocation11_spill] sm:$0xff] }
 0x1ed   :  { %v1749_v12 = vpop.f32.mrf.mxu1  ;;  %3633 = vmatmul.mubr.msk.f32.gmra.mxu1 %vm659_vm0, %v3853_v38  ;;  %v1494_v58 = vpop.f32.mrf.mxu0  ;;  %3128 = vmatpush2.msra.mxu0 %v2970_v45  ;;  %v3854_v38 = vld [vmem:[%s7767_s0 + $0x288] sm:$0xff]  ;;  %v2968_v45 = vld [vmem:[%s7770_s3 + $0xe0] sm:$0xff] }
 0x1ee   :  { %7804 = vst [vmem:[#allocation9_spill] sm:$0xff] %v6830_v8  ;;  %v6844_v63 = vadd.f32 %v1749_v12, %v1493_v4  ;;  %v1495_v26 = vadd.f32 %v1494_v58, %v7807_v1  ;;  %2685 = vmatprep.mubr.f32.mxu1 %v7781_v34  ;;  %3129 = vmatprep.subr.mxu0 %v7781_v34  ;;  %v7809_v12 = vld [vmem:[#allocation12_spill] sm:$0xff]  ;;  %v3855_v1 = vld [vmem:[%s7767_s0 + $0x2c8] sm:$0xff] }
 0x1ef   :  { %v1751_v31 = vpop.f32.mrf.mxu1  ;;  %v1498_v11 = vpop.f32.mrf.mxu0  ;;  %2429 = vmatmul.mubr.f32.gmra.mxu0 %v3854_v38  ;;  %3326 = vmatprep.subr.mxu1 %v7781_v34  ;;  %v3856_v38 = vld [vmem:[%s7767_s0 + $0x298] sm:$0xff] }
 0x1f0   :  { %7806 = vst [vmem:[#allocation10_spill] sm:$0xff] %v6844_v63  ;;  %v6856_v4 = vadd.f32 %v1751_v31, %v1495_v26  ;;  %v1499_v58 = vadd.f32 %v1498_v11, %v7809_v12  ;;  %2434 = vmatprep.mubr.f32.mxu0 %v3855_v1  ;;  %3130 = vmatpush2.msra.mxu0 %v2969_v44  ;;  %v2983_v26 = vld [vmem:[%s7770_s3 + $0x158] sm:$0xff]  ;;  %v7811_v11 = vld [vmem:[#allocation13_spill] sm:$0xff] }
 0x1f1   :  { %v1755_v63 = vpop.f32.mrf.mxu1  ;;  %3634 = vmatmul.mubr.msk.f32.gmra.mxu1 %vm659_vm0, %v3856_v38  ;;  %v1500_v0 = vpop.f32.mrf.mxu0  ;;  %3131 = vmatprep.subr.mxu0 %v7781_v34  ;;  %v2967_v44 = vld [vmem:[%s7770_s3 + $0xd8] sm:$0xff] }
 0x1f2   :  { %7808 = vst [vmem:[#allocation11_spill] sm:$0xff] %v6856_v4  ;;  %v6870_v31 = vadd.f32 %v1755_v63, %v1499_v58  ;;  %v1501_v12 = vadd.f32 %v1500_v0, %v7811_v11  ;;  %2691 = vmatprep.mubr.f32.mxu1 %v7781_v34  ;;  %3132 = vmatpush2.msra.mxu0 %v2968_v45  ;;  %v3857_v4 = vld [vmem:[%s7767_s0 + $0x2c0] sm:$0xff]  ;;  %v7813_v58 = vld [vmem:[#allocation14_spill] sm:$0xff] }
 0x1f3   :  { %v1757_v1 = vpop.f32.mrf.mxu1  ;;  %v1504_v38 = vpop.f32.mrf.mxu0  ;;  %2435 = vmatmul.mubr.f32.gmra.mxu0 %v3857_v4  ;;  %3133 = vmatprep.subr.mxu0 %v7781_v34  ;;  %v3858_v45 = vld [vmem:[%s7767_s0 + $0x300] sm:$0xff] }
 0x1f4   :  { %7810 = vst [vmem:[#allocation12_spill] sm:$0xff] %v6870_v31  ;;  %v6881_v63 = vadd.f32 %v1757_v1, %v1501_v12  ;;  %v1505_v0 = vadd.f32 %v1504_v38, %v7813_v58  ;;  %2440 = vmatprep.mubr.f32.mxu0 %v3858_v45  ;;  %3327 = vmatpush1.msra.mxu1 %v2983_v26  ;;  %v3859_v31 = vld [vmem:[%s7767_s0 + $0x2d0] sm:$0xff] }
 0x1f5   :  { %v1761_v11 = vpop.f32.mrf.mxu1  ;;  %3635 = vmatmul.mubr.msk.f32.gmra.mxu1 %vm659_vm0, %v3859_v31  ;;  %v1506_v4 = vpop.f32.mrf.mxu0  ;;  %3134 = vmatpush2.msra.mxu0 %v2967_v44  ;;  %v2966_v12 = vld [vmem:[%s7770_s3 + $0xd0] sm:$0xff]  ;;  %v3860_v31 = vld [vmem:[%s7767_s0 + $0x2f8] sm:$0xff]  ;;  %v2965_v44 = vld [vmem:[%s7770_s3 + $0xc8] sm:$0xff] }
 0x1f6   :  { %7812 = vst [vmem:[#allocation13_spill] sm:$0xff] %v6881_v63  ;;  %v6894_v1 = vadd.f32 %v1761_v11, %v1505_v0  ;;  %v7815_v38 = vld [vmem:[#allocation15_spill] sm:$0xff]  ;;  %2697 = vmatprep.mubr.f32.mxu1 %v7781_v34  ;;  %3135 = vmatprep.subr.mxu0 %v7781_v34  ;;  %v7817_v11 = vld [vmem:[#allocation16_spill] sm:$0xff] }
 0x1f7   :  { %v1507_v58 = vadd.f32 %v1506_v4, %v7815_v38  ;;  %v1763_v26 = vpop.f32.mrf.mxu1  ;;  %v1510_v45 = vpop.f32.mrf.mxu0  ;;  %2441 = vmatmul.mubr.f32.gmra.mxu0 %v3860_v31  ;;  %3328 = vmatprep.subr.mxu1 %v7781_v34  ;;  %v3861_v38 = vld [vmem:[%s7767_s0 + $0x338] sm:$0xff]  ;;  %v3862_v31 = vld [vmem:[%s7767_s0 + $0x308] sm:$0xff] }
 0x1f8   :  { %7814 = vst [vmem:[#allocation14_spill] sm:$0xff] %v6894_v1  ;;  %v1511_v4 = vadd.f32 %v1510_v45, %v7817_v11  ;;  %2446 = vmatprep.mubr.f32.mxu0 %v3861_v38  ;;  %3136 = vmatpush2.msra.mxu0 %v2966_v12  ;;  %v7819_v45 = vld [vmem:[#allocation17_spill] sm:$0xff] }
 0x1f9   :  { %v6906_v0 = vadd.f32 %v1763_v26, %v1507_v58  ;;  %v1767_v1 = vpop.f32.mrf.mxu1  ;;  %3636 = vmatmul.mubr.msk.f32.gmra.mxu1 %vm659_vm0, %v3862_v31  ;;  %v1512_v63 = vpop.f32.mrf.mxu0  ;;  %3137 = vmatprep.subr.mxu0 %v7781_v34  ;;  %v2964_v58 = vld [vmem:[%s7770_s3 + $0xc0] sm:$0xff]  ;;  %v3863_v31 = vld [vmem:[%s7767_s0 + $0x330] sm:$0xff] }
 0x1fa   :  { %v6920_v26 = vadd.f32 %v1767_v1, %v1511_v4  ;;  %v1513_v11 = vadd.f32 %v1512_v63, %v7819_v45  ;;  %2703 = vmatprep.mubr.f32.mxu1 %v7781_v34  ;;  %3138 = vmatpush2.msra.mxu0 %v2965_v44  ;;  %v3864_v44 = vld [vmem:[%s7767_s0 + $0x370] sm:$0xff]  ;;  %v7821_v4 = vld [vmem:[#allocation5_spill] sm:$0xff] }
 0x1fb   :  { %7816 = vst [vmem:[#allocation15_spill] sm:$0xff] %v6906_v0  ;;  %v1769_v12 = vpop.f32.mrf.mxu1  ;;  %v1516_v38 = vpop.f32.mrf.mxu0  ;;  %2447 = vmatmul.mubr.f32.gmra.mxu0 %v3863_v31  ;;  %3139 = vmatprep.subr.mxu0 %v7781_v34  ;;  %v2982_v0 = vld [vmem:[%s7770_s3 + $0x150] sm:$0xff]  ;;  %v649_v45 = vsub.s32 2, %v7821_v4  ;;  %v3865_v31 = vld [vmem:[%s7767_s0 + $0x340] sm:$0xff] }
 0x1fc   :  { %7818 = vst [vmem:[#allocation16_spill] sm:$0xff] %v6920_v26  ;;  %v6931_v1 = vadd.f32 %v1769_v12, %v1513_v11  ;;  %v1517_v63 = vadd.f32 %v1516_v38, %v6243_v19  ;;  %2452 = vmatprep.mubr.f32.mxu0 %v3864_v44  ;;  %3140 = vmatpush2.msra.mxu0 %v2964_v58  ;;  %v2963_v19 = vld [vmem:[%s7770_s3 + $0xb8] sm:$0xff]  ;;  %v7823_v12 = vld [vmem:[#allocation18_spill] sm:$0xff]  ;;  %v653_v58 = vsub.s32 3, %v7821_v4 }
 0x1fd   :  { %v1773_v26 = vpop.f32.mrf.mxu1  ;;  %3637 = vmatmul.mubr.msk.f32.gmra.mxu1 %vm659_vm0, %v3865_v31  ;;  %v1518_v8 = vpop.f32.mrf.mxu0  ;;  %3141 = vmatprep.subr.mxu0 %v7781_v34  ;;  %v3866_v31 = vld [vmem:[%s7767_s0 + $0x368] sm:$0xff] }
 0x1fe   :  { %7820 = vst [vmem:[#allocation17_spill] sm:$0xff] %v6931_v1  ;;  %v6946_v11 = vadd.f32 %v1773_v26, %v1517_v63  ;;  %v1519_v38 = vadd.f32 %v1518_v8, %v7823_v12  ;;  %2709 = vmatprep.mubr.f32.mxu1 %v7781_v34  ;;  %3329 = vmatpush1.msra.mxu1 %v2982_v0  ;;  %v3867_v0 = vld [vmem:[%s7767_s0 + $0x3a8] sm:$0xff]  ;;  %v3868_v63 = vld [vmem:[%s7769_s2] sm:$0xf] }
 0x1ff   :  { %v1775_v44 = vpop.f32.mrf.mxu1  ;;  %v1522_v1 = vpop.f32.mrf.mxu0  ;;  %2453 = vmatmul.mubr.f32.gmra.mxu0 %v3866_v31  ;;  %3330 = vmatprep.subr.mxu1 %v7781_v34  ;;  %v6967_v4 = vrot.slane %v3868_v63, %v649_v45 }
 0x200   :  { %7822 = vst [vmem:[#allocation5_spill] sm:$0xff] %v6946_v11  ;;  %v6958_v26 = vadd.f32 %v1775_v44, %v1519_v38  ;;  %v1523_v8 = vadd.f32 %v1522_v1, %v6273_v60  ;;  %2458 = vmatprep.mubr.f32.mxu0 %v3867_v0  ;;  %3142 = vmatpush2.msra.mxu0 %v2963_v19  ;;  %v3869_v38 = vld [vmem:[%s7767_s0 + $0x378] sm:$0xff]  ;;  %v2961_v1 = vld [vmem:[%s7770_s3 + $0xa8] sm:$0xff]  ;;  %v3878_v11 = vld [vmem:[%s7767_s0 + $0x420] sm:$0xff] }
 0x201   :  { %v1779_v12 = vpop.f32.mrf.mxu1  ;;  %3638 = vmatmul.mubr.msk.f32.gmra.mxu1 %vm659_vm0, %v3869_v38  ;;  %v1524_v60 = vpop.f32.mrf.mxu0  ;;  %3143 = vmatprep.subr.mxu0 %v7781_v34  ;;  %v6981_v19 = vrot.slane %v3868_v63, %v653_v58  ;;  %v3870_v38 = vld [vmem:[%s7767_s0 + $0x3a0] sm:$0xff]  ;;  %v3872_v63 = vld [vmem:[%s7767_s0 + $0x3b0] sm:$0xff] }
 0x202   :  { %7824 = vst [vmem:[#allocation18_spill] sm:$0xff] %v6958_v26  ;;  %v6977_v44 = vadd.f32 %v1779_v12, %v1523_v8  ;;  %v1525_v45 = vadd.f32 %v1524_v60, %v6288_v23  ;;  %2715 = vmatprep.mubr.f32.mxu1 %v7781_v34  ;;  %3144 = vmatpush2.msra.mxu0 %v2962_v32  ;;  %v2981_v8 = vld [vmem:[%s7770_s3 + $0x148] sm:$0xff]  ;;  %v3871_v32 = vld [vmem:[%s7767_s0 + $0x3e0] sm:$0xff] }
 0x203   :  { %v1781_v31 = vpop.f32.mrf.mxu1  ;;  %v1850_v0 = vpop.f32.mrf.mxu0  ;;  %2459 = vmatmul.mubr.f32.gmra.mxu0 %v3870_v38  ;;  %3145 = vmatprep.subr.mxu0 %v7781_v34 }
 0x204   :  { %7825 = vst [vmem:[#allocation24_spill] sm:$0xff] %v6977_v44  ;;  %v6990_v12 = vadd.f32 %v1781_v31, %v1525_v45  ;;  %v1851_v23 = vadd.f32 %v1850_v0, %v6967_v4  ;;  %2464 = vmatprep.mubr.f32.mxu0 %v3871_v32  ;;  %3146 = vmatpush2.msra.mxu0 %v2961_v1  ;;  %v2960_v45 = vld [vmem:[%s7770_s3 + $0xa0] sm:$0xff]  ;;  %v3873_v32 = vld [vmem:[%s7767_s0 + $0x3d8] sm:$0xff] }
 0x205   :  { %v2107_v58 = vpop.f32.mrf.mxu1  ;;  %3639 = vmatmul.mubr.msk.f32.gmra.mxu1 %vm659_vm0, %v3872_v63  ;;  %v1852_v60 = vpop.f32.mrf.mxu0  ;;  %3147 = vmatprep.subr.mxu0 %v7781_v34  ;;  %v2959_v63 = vld [vmem:[%s7770_s3 + $0x98] sm:$0xff] }
 0x206   :  { %7826 = vst [vmem:[#allocation25_spill] sm:$0xff] %v6990_v12  ;;  %v7004_v31 = vadd.f32 %v2107_v58, %v1851_v23  ;;  %v1853_v0 = vadd.f32 %v1852_v60, %v6981_v19  ;;  %2721 = vmatprep.mubr.f32.mxu1 %v7781_v34  ;;  %3331 = vmatpush1.msra.mxu1 %v2981_v8  ;;  %v3874_v8 = vld [vmem:[%s7767_s0 + $0x418] sm:$0xff]  ;;  %v2957_v12 = vld [vmem:[%s7770_s3 + $0x88] sm:$0xff] }
 0x207   :  { %v2109_v1 = vpop.f32.mrf.mxu1  ;;  %v1856_v38 = vpop.f32.mrf.mxu0  ;;  %2465 = vmatmul.mubr.f32.gmra.mxu0 %v3873_v32  ;;  %3332 = vmatprep.subr.mxu1 %v7781_v34  ;;  %v3875_v32 = vld [vmem:[%s7767_s0 + $0x3e8] sm:$0xff] }
 0x208   :  { %v7015_v23 = vadd.f32 %v2109_v1, %v1853_v0  ;;  %v1857_v58 = vadd.f32 %v1856_v38, %v6967_v4  ;;  %2470 = vmatprep.mubr.f32.mxu0 %v3874_v8  ;;  %3148 = vmatpush2.msra.mxu0 %v2960_v45  ;;  %v2958_v0 = vld [vmem:[%s7770_s3 + $0x90] sm:$0xff] }
 0x209   :  { %v2113_v60 = vpop.f32.mrf.mxu1  ;;  %3640 = vmatmul.mubr.msk.f32.gmra.mxu1 %vm659_vm0, %v3875_v32  ;;  %v1858_v44 = vpop.f32.mrf.mxu0  ;;  %3149 = vmatprep.subr.mxu0 %v7781_v34  ;;  %v3876_v32 = vld [vmem:[%s7767_s0 + $0x410] sm:$0xff] }
 0x20a   :  { %v7029_v1 = vadd.f32 %v2113_v60, %v1857_v58  ;;  %v1859_v38 = vadd.f32 %v1858_v44, %v6981_v19  ;;  %2727 = vmatprep.mubr.f32.mxu1 %v7781_v34  ;;  %3150 = vmatpush2.msra.mxu0 %v2959_v63  ;;  %v3877_v63 = vld [vmem:[%s7767_s0 + $0x450] sm:$0xff]  ;;  %v2980_v60 = vld [vmem:[%s7770_s3 + $0x140] sm:$0xff] }
 0x20b   :  { %v2115_v45 = vpop.f32.mrf.mxu1  ;;  %v1862_v8 = vpop.f32.mrf.mxu0  ;;  %2471 = vmatmul.mubr.f32.gmra.mxu0 %v3876_v32  ;;  %3151 = vmatprep.subr.mxu0 %v7781_v34 }
 0x20c   :  { %v7040_v58 = vadd.f32 %v2115_v45, %v1859_v38  ;;  %v1863_v44 = vadd.f32 %v1862_v8, %v6967_v4  ;;  %2476 = vmatprep.mubr.f32.mxu0 %v3877_v63  ;;  %3152 = vmatpush2.msra.mxu0 %v2958_v0  ;;  %v2956_v0 = vld [vmem:[%s7770_s3 + $0x80] sm:$0xff] }
 0x20d   :  { %v2119_v32 = vpop.f32.mrf.mxu1  ;;  %3641 = vmatmul.mubr.msk.f32.gmra.mxu1 %vm659_vm0, %v3878_v11  ;;  %v1864_v38 = vpop.f32.mrf.mxu0  ;;  %3153 = vmatprep.subr.mxu0 %v7781_v34  ;;  %v3879_v11 = vld [vmem:[%s7767_s0 + $0x448] sm:$0xff] }
 0x20e   :  { %v7054_v45 = vadd.f32 %v2119_v32, %v1863_v44  ;;  %v1865_v8 = vadd.f32 %v1864_v38, %v6981_v19  ;;  %2733 = vmatprep.mubr.f32.mxu1 %v7781_v34  ;;  %3154 = vmatpush2.msra.mxu0 %v2957_v12  ;;  %v3880_v12 = vld [vmem:[%s7767_s0 + $0x488] sm:$0xff]  ;;  %v2979_v32 = vld [vmem:[%s7770_s3 + $0x138] sm:$0xff] }
 0x20f   :  { %v2121_v63 = vpop.f32.mrf.mxu1  ;;  %v1868_v26 = vpop.f32.mrf.mxu0  ;;  %2477 = vmatmul.mubr.f32.gmra.mxu0 %v3879_v11  ;;  %3333 = vmatpush1.msra.mxu1 %v2980_v60  ;;  %v3881_v60 = vld [vmem:[%s7767_s0 + $0x458] sm:$0xff] }
 0x210   :  { %v7064_v42 = vadd.f32 %v2121_v63, %v1865_v8  ;;  %v1869_v44 = vadd.f32 %v1868_v26, %v6967_v4  ;;  %2482 = vmatprep.mubr.f32.mxu0 %v3880_v12  ;;  %3155 = vmatprep.subr.mxu0 %v7781_v34 }
 0x211   :  { %v2125_v38 = vpop.f32.mrf.mxu1  ;;  %3642 = vmatmul.mubr.msk.f32.gmra.mxu1 %vm659_vm0, %v3881_v60  ;;  %v1870_v8 = vpop.f32.mrf.mxu0  ;;  %3156 = vmatpush2.msra.mxu0 %v2956_v0  ;;  %v2978_v0 = vld [vmem:[%s7770_s3 + $0x130] sm:$0xff]  ;;  %v3883_v60 = vld [vmem:[%s7767_s0 + $0x4c0] sm:$0xff] }
 0x212   :  { %v7078_v26 = vadd.f32 %v2125_v38, %v1869_v44  ;;  %v1871_v63 = vadd.f32 %v1870_v8, %v6981_v19  ;;  %2739 = vmatprep.mubr.f32.mxu1 %v7781_v34  ;;  %3334 = vmatprep.subr.mxu1 %v7781_v34 }
 0x213   :  { %v2127_v11 = vpop.f32.mrf.mxu1  ;;  %v1874_v12 = vpop.f32.mrf.mxu0  ;;  %2483 = vmatmul.mubr.f32.gmra.mxu0 %v3882_v25  ;;  %3335 = vmatpush1.msra.mxu1 %v2979_v32  ;;  %v3884_v25 = vld [vmem:[%s7767_s0 + $0x490] sm:$0xff] }
 0x214   :  { %v7089_v44 = vadd.f32 %v2127_v11, %v1871_v63  ;;  %v1875_v38 = vadd.f32 %v1874_v12, %v6967_v4  ;;  %2488 = vmatprep.mubr.f32.mxu0 %v3883_v60  ;;  %3336 = vmatprep.subr.mxu1 %v7781_v34  ;;  %v2977_v63 = vld [vmem:[%s7770_s3 + $0x128] sm:$0xff] }
 0x215   :  { %v2131_v8 = vpop.f32.mrf.mxu1  ;;  %3643 = vmatmul.mubr.msk.f32.gmra.mxu1 %vm659_vm0, %v3884_v25  ;;  %v1876_v32 = vpop.f32.mrf.mxu0  ;;  %v2976_v25 = vld [vmem:[%s7770_s3 + $0x120] sm:$0xff] }
 0x216   :  { %7827 = vst [vmem:[#allocation26_spill] sm:$0xff] %v7089_v44  ;;  %v7103_v11 = vadd.f32 %v2131_v8, %v1875_v38  ;;  %v1877_v12 = vadd.f32 %v1876_v32, %v6981_v19  ;;  %2745 = vmatprep.mubr.f32.mxu1 %v7781_v34  ;;  %3337 = vmatpush1.msra.mxu1 %v2978_v0  ;;  %v3885_v44 = vld [vmem:[%s7767_s0 + $0x4b8] sm:$0xff] }
 0x217   :  { %v2133_v60 = vpop.f32.mrf.mxu1  ;;  %v1880_v21 = vpop.f32.mrf.mxu0  ;;  %2489 = vmatmul.mubr.f32.gmra.mxu0 %v3885_v44  ;;  %3338 = vmatprep.subr.mxu1 %v7781_v34  ;;  %v3886_v0 = vld [vmem:[%s7767_s0 + $0x4f8] sm:$0xff]  ;;  %v3887_v44 = vld [vmem:[%s7767_s0 + $0x4c8] sm:$0xff] }
 0x218   :  { %7828 = vst [vmem:[#allocation27_spill] sm:$0xff] %v7103_v11  ;;  %v7114_v38 = vadd.f32 %v2133_v60, %v1877_v12  ;;  %v1881_v8 = vadd.f32 %v1880_v21, %v6967_v4  ;;  %2494 = vmatprep.mubr.f32.mxu0 %v3886_v0  ;;  %3339 = vmatpush1.msra.mxu1 %v2977_v63  ;;  %v2975_v21 = vld [vmem:[%s7770_s3 + $0x118] sm:$0xff] }
 0x219   :  { %v2137_v32 = vpop.f32.mrf.mxu1  ;;  %3644 = vmatmul.mubr.msk.f32.gmra.mxu1 %vm659_vm0, %v3887_v44  ;;  %v1882_v11 = vpop.f32.mrf.mxu0  ;;  %3340 = vmatprep.subr.mxu1 %v7781_v34  ;;  %v3888_v44 = vld [vmem:[%s7767_s0 + $0x4f0] sm:$0xff] }
 0x21a   :  { %7829 = vst [vmem:[#allocation28_spill] sm:$0xff] %v7114_v38  ;;  %v7128_v12 = vadd.f32 %v2137_v32, %v1881_v8  ;;  %v1883_v60 = vadd.f32 %v1882_v11, %v6981_v19  ;;  %2751 = vmatprep.mubr.f32.mxu1 %v7781_v34  ;;  %3341 = vmatpush1.msra.mxu1 %v2976_v25  ;;  %v2974_v38 = vld [vmem:[%s7770_s3 + $0x110] sm:$0xff] }
 0x21b   :  { %v2139_v63 = vpop.f32.mrf.mxu1  ;;  %v1886_v0 = vpop.f32.mrf.mxu0  ;;  %2495 = vmatmul.mubr.f32.gmra.mxu0 %v3888_v44  ;;  %3342 = vmatprep.subr.mxu1 %v7781_v34  ;;  %v3889_v25 = vld [vmem:[%s7767_s0 + $0x530] sm:$0xff]  ;;  %v3890_v44 = vld [vmem:[%s7767_s0 + $0x500] sm:$0xff] }
 0x21c   :  { %7830 = vst [vmem:[#allocation29_spill] sm:$0xff] %v7128_v12  ;;  %v7139_v8 = vadd.f32 %v2139_v63, %v1883_v60  ;;  %v1887_v11 = vadd.f32 %v1886_v0, %v6967_v4  ;;  %2500 = vmatprep.mubr.f32.mxu0 %v3889_v25  ;;  %3343 = vmatpush1.msra.mxu1 %v2975_v21  ;;  %v2973_v60 = vld [vmem:[%s7770_s3 + $0x108] sm:$0xff] }
 0x21d   :  { %v2143_v32 = vpop.f32.mrf.mxu1  ;;  %3645 = vmatmul.mubr.msk.f32.gmra.mxu1 %vm659_vm0, %v3890_v44  ;;  %v1888_v12 = vpop.f32.mrf.mxu0  ;;  %3344 = vmatprep.subr.mxu1 %v7781_v34  ;;  %v3891_v44 = vld [vmem:[%s7767_s0 + $0x528] sm:$0xff] }
 0x21e   :  { %7831 = vst [vmem:[#allocation30_spill] sm:$0xff] %v7139_v8  ;;  %v7153_v63 = vadd.f32 %v2143_v32, %v1887_v11  ;;  %v1889_v0 = vadd.f32 %v1888_v12, %v6981_v19  ;;  %2757 = vmatprep.mubr.f32.mxu1 %v7781_v34  ;;  %3345 = vmatpush1.msra.mxu1 %v2974_v38  ;;  %v2972_v8 = vld [vmem:[%s7770_s3 + $0x100] sm:$0xff]  ;;  %v3892_v38 = vld [vmem:[%s7767_s0 + $0x568] sm:$0xff] }
 0x21f   :  { %v2145_v21 = vpop.f32.mrf.mxu1  ;;  %v1892_v25 = vpop.f32.mrf.mxu0  ;;  %2501 = vmatmul.mubr.f32.gmra.mxu0 %v3891_v44  ;;  %3346 = vmatprep.subr.mxu1 %v7781_v34  ;;  %v3893_v44 = vld [vmem:[%s7767_s0 + $0x538] sm:$0xff] }
 0x220   :  { %7832 = vst [vmem:[#allocation31_spill] sm:$0xff] %v7153_v63  ;;  %v7164_v11 = vadd.f32 %v2145_v21, %v1889_v0  ;;  %v1893_v12 = vadd.f32 %v1892_v25, %v6967_v4  ;;  %2506 = vmatprep.mubr.f32.mxu0 %v3892_v38  ;;  %3347 = vmatpush1.msra.mxu1 %v2973_v60  ;;  %v2989_v0 = vld [vmem:[%s7770_s3 + $0x188] sm:$0xff] }
 0x221   :  { %v2149_v32 = vpop.f32.mrf.mxu1  ;;  %3646 = vmatmul.mubr.msk.f32.gmra.mxu1 %vm659_vm0, %v3893_v44  ;;  %v1894_v63 = vpop.f32.mrf.mxu0  ;;  %3348 = vmatprep.subr.mxu1 %v7781_v34  ;;  %v3894_v44 = vld [vmem:[%s7767_s0 + $0x560] sm:$0xff] }
 0x222   :  { %7833 = vst [vmem:[#allocation32_spill] sm:$0xff] %v7164_v11  ;;  %v7178_v21 = vadd.f32 %v2149_v32, %v1893_v12  ;;  %v1895_v25 = vadd.f32 %v1894_v63, %v6981_v19  ;;  %2763 = vmatprep.mubr.f32.mxu1 %v7781_v34  ;;  %3349 = vmatpush1.msra.mxu1 %v2972_v8  ;;  %v2988_v11 = vld [vmem:[%s7770_s3 + $0x180] sm:$0xff] }
 0x223   :  { %v2151_v60 = vpop.f32.mrf.mxu1  ;;  %v1898_v38 = vpop.f32.mrf.mxu0  ;;  %2507 = vmatmul.mubr.f32.gmra.mxu0 %v3894_v44  ;;  %3378 = vmatprep.subr.mxu1 %v7781_v34  ;;  %v3895_v8 = vld [vmem:[%s7767_s0 + $0x5a0] sm:$0xff]  ;;  %v3896_v44 = vld [vmem:[%s7767_s0 + $0x570] sm:$0xff] }
 0x224   :  { %7834 = vst [vmem:[#allocation33_spill] sm:$0xff] %v7178_v21  ;;  %v7189_v12 = vadd.f32 %v2151_v60, %v1895_v25  ;;  %v1899_v63 = vadd.f32 %v1898_v38, %v6967_v4  ;;  %2512 = vmatprep.mubr.f32.mxu0 %v3895_v8  ;;  %3379 = vmatpush2.msra.mxu1 %v2989_v0  ;;  %v3897_v0 = vld [vmem:[%s7767_s0 + $0x598] sm:$0xff] }
 0x225   :  { %v2155_v32 = vpop.f32.mrf.mxu1  ;;  %3647 = vmatmul.mubr.msk.f32.gmra.mxu1 %vm659_vm0, %v3896_v44  ;;  %v7199_v21 = vpop.f32.mrf.mxu0  ;;  %3380 = vmatprep.subr.mxu1 %v7781_v34  ;;  %v3898_v44 = vld [vmem:[%s7767_s0 + $0x5d8] sm:$0xff] }
 0x226   :  { %7835 = vst [vmem:[#allocation34_spill] sm:$0xff] %v7189_v12  ;;  %7836 = vst [vmem:[#allocation35_spill] sm:$0xff] %v7199_v21  ;;  %v7202_v25 = vadd.f32 %v2155_v32, %v1899_v63  ;;  %2769 = vmatprep.mubr.f32.mxu1 %v7781_v34  ;;  %3381 = vmatpush2.msra.mxu1 %v2988_v11  ;;  %v3899_v11 = vld [vmem:[%s7767_s0 + $0x5a8] sm:$0xff] }
 0x227   :  { %v7205_v60 = vpop.f32.mrf.mxu1  ;;  %v1904_v38 = vpop.f32.mrf.mxu0  ;;  %2513 = vmatmul.mubr.f32.gmra.mxu0 %v3897_v0 }
 0x228   :  { %7837 = vst [vmem:[#allocation36_spill] sm:$0xff] %v7202_v25  ;;  %7838 = vst [vmem:[#allocation37_spill] sm:$0xff] %v7205_v60  ;;  %v1905_v8 = vadd.f32 %v1904_v38, %v6967_v4  ;;  %2518 = vmatprep.mubr.f32.mxu0 %v3898_v44  ;;  %v3900_v44 = vld [vmem:[%s7767_s0 + $0x5d0] sm:$0xff] }
 0x229   :  { %v2161_v63 = vpop.f32.mrf.mxu1  ;;  %3648 = vmatmul.mubr.msk.f32.gmra.mxu1 %vm659_vm0, %v3899_v11  ;;  %v7218_v32 = vpop.f32.mrf.mxu0  ;;  %v3901_v11 = vld [vmem:[%s7767_s0 + $0x610] sm:$0xff] }
 0x22a   :  { %7839 = vst [vmem:[#allocation38_spill] sm:$0xff] %v7218_v32  ;;  %v7220_v25 = vadd.f32 %v2161_v63, %v1905_v8  ;;  %2775 = vmatprep.mubr.f32.mxu1 %v7781_v34  ;;  %v3902_v8 = vld [vmem:[%s7767_s0 + $0x5e0] sm:$0xff] }
 0x22b   :  { %v7223_v0 = vpop.f32.mrf.mxu1  ;;  %v1910_v38 = vpop.f32.mrf.mxu0  ;;  %2519 = vmatmul.mubr.f32.gmra.mxu0 %v3900_v44 }
 0x22c   :  { %7840 = vst [vmem:[#allocation39_spill] sm:$0xff] %v7220_v25  ;;  %7841 = vst [vmem:[#allocation40_spill] sm:$0xff] %v7223_v0  ;;  %v1911_v60 = vadd.f32 %v1910_v38, %v6967_v4  ;;  %2524 = vmatprep.mubr.f32.mxu0 %v3901_v11  ;;  %v3903_v11 = vld [vmem:[%s7767_s0 + $0x608] sm:$0xff] }
 0x22d   :  { %v2167_v32 = vpop.f32.mrf.mxu1  ;;  %3649 = vmatmul.mubr.msk.f32.gmra.mxu1 %vm659_vm0, %v3902_v8  ;;  %v7236_v63 = vpop.f32.mrf.mxu0  ;;  %v3904_v8 = vld [vmem:[%s7767_s0 + $0x648] sm:$0xff] }
 0x22e   :  { %7842 = vst [vmem:[#allocation41_spill] sm:$0xff] %v7236_v63  ;;  %v7238_v25 = vadd.f32 %v2167_v32, %v1911_v60  ;;  %2781 = vmatprep.mubr.f32.mxu1 %v7781_v34  ;;  %v3905_v60 = vld [vmem:[%s7767_s0 + $0x618] sm:$0xff] }
 0x22f   :  { %v7241_v44 = vpop.f32.mrf.mxu1  ;;  %v1916_v38 = vpop.f32.mrf.mxu0  ;;  %2525 = vmatmul.mubr.f32.gmra.mxu0 %v3903_v11 }
 0x230   :  { %7843 = vst [vmem:[#allocation42_spill] sm:$0xff] %v7238_v25  ;;  %7844 = vst [vmem:[#allocation43_spill] sm:$0xff] %v7241_v44  ;;  %v1917_v0 = vadd.f32 %v1916_v38, %v6967_v4  ;;  %2530 = vmatprep.mubr.f32.mxu0 %v3904_v8  ;;  %v3906_v8 = vld [vmem:[%s7767_s0 + $0x640] sm:$0xff] }
 0x231   :  { %v2173_v63 = vpop.f32.mrf.mxu1  ;;  %3650 = vmatmul.mubr.msk.f32.gmra.mxu1 %vm659_vm0, %v3905_v60  ;;  %v7254_v32 = vpop.f32.mrf.mxu0  ;;  %v3907_v60 = vld [vmem:[%s7767_s0 + $0x680] sm:$0xff] }
 0x232   :  { %7845 = vst [vmem:[#allocation44_spill] sm:$0xff] %v7254_v32  ;;  %v7256_v25 = vadd.f32 %v2173_v63, %v1917_v0  ;;  %2787 = vmatprep.mubr.f32.mxu1 %v7781_v34  ;;  %v3908_v0 = vld [vmem:[%s7767_s0 + $0x650] sm:$0xff] }
 0x233   :  { %v7259_v11 = vpop.f32.mrf.mxu1  ;;  %v1922_v38 = vpop.f32.mrf.mxu0  ;;  %2531 = vmatmul.mubr.f32.gmra.mxu0 %v3906_v8 }
 0x234   :  { %7846 = vst [vmem:[#allocation45_spill] sm:$0xff] %v7256_v25  ;;  %7847 = vst [vmem:[#allocation46_spill] sm:$0xff] %v7259_v11  ;;  %v1923_v44 = vadd.f32 %v1922_v38, %v6967_v4  ;;  %2536 = vmatprep.mubr.f32.mxu0 %v3907_v60  ;;  %v3909_v60 = vld [vmem:[%s7767_s0 + $0x678] sm:$0xff] }
 0x235   :  { %v2179_v32 = vpop.f32.mrf.mxu1  ;;  %3651 = vmatmul.mubr.msk.f32.gmra.mxu1 %vm659_vm0, %v3908_v0  ;;  %v7272_v63 = vpop.f32.mrf.mxu0  ;;  %v3910_v0 = vld [vmem:[%s7767_s0 + $0x6b8] sm:$0xff] }
 0x236   :  { %7848 = vst [vmem:[#allocation47_spill] sm:$0xff] %v7272_v63  ;;  %v7274_v25 = vadd.f32 %v2179_v32, %v1923_v44  ;;  %2793 = vmatprep.mubr.f32.mxu1 %v7781_v34  ;;  %v3911_v44 = vld [vmem:[%s7767_s0 + $0x688] sm:$0xff] }
 0x237   :  { %v7277_v8 = vpop.f32.mrf.mxu1  ;;  %v1928_v38 = vpop.f32.mrf.mxu0  ;;  %2537 = vmatmul.mubr.f32.gmra.mxu0 %v3909_v60 }
 0x238   :  { %7849 = vst [vmem:[#allocation48_spill] sm:$0xff] %v7274_v25  ;;  %7850 = vst [vmem:[#allocation49_spill] sm:$0xff] %v7277_v8  ;;  %v1929_v11 = vadd.f32 %v1928_v38, %v6967_v4  ;;  %2542 = vmatprep.mubr.f32.mxu0 %v3910_v0  ;;  %v3912_v0 = vld [vmem:[%s7767_s0 + $0x6b0] sm:$0xff] }
 0x239   :  { %v2185_v63 = vpop.f32.mrf.mxu1  ;;  %3652 = vmatmul.mubr.msk.f32.gmra.mxu1 %vm659_vm0, %v3911_v44  ;;  %v7290_v32 = vpop.f32.mrf.mxu0  ;;  %v3913_v44 = vld [vmem:[%s7767_s0 + $0x6f0] sm:$0xff] }
 0x23a   :  { %7851 = vst [vmem:[#allocation50_spill] sm:$0xff] %v7290_v32  ;;  %v7292_v25 = vadd.f32 %v2185_v63, %v1929_v11  ;;  %2799 = vmatprep.mubr.f32.mxu1 %v7781_v34  ;;  %v3914_v11 = vld [vmem:[%s7767_s0 + $0x6c0] sm:$0xff] }
 0x23b   :  { %v7295_v60 = vpop.f32.mrf.mxu1  ;;  %v1934_v38 = vpop.f32.mrf.mxu0  ;;  %2543 = vmatmul.mubr.f32.gmra.mxu0 %v3912_v0 }
 0x23c   :  { %7852 = vst [vmem:[#allocation51_spill] sm:$0xff] %v7292_v25  ;;  %7853 = vst [vmem:[#allocation52_spill] sm:$0xff] %v7295_v60  ;;  %v1935_v8 = vadd.f32 %v1934_v38, %v6967_v4  ;;  %2548 = vmatprep.mubr.f32.mxu0 %v3913_v44  ;;  %v2813_v25 = vmax.f32 %v6307_v39, 0.0  ;;  %v3915_v44 = vld [vmem:[%s7767_s0 + $0x6e8] sm:$0xff]  ;;  %v3916_v39 = vld [vmem:[%s7767_s0 + $0x6f8] sm:$0xff] }
 0x23d   :  { %v2191_v32 = vpop.f32.mrf.mxu1  ;;  %3653 = vmatmul.mubr.msk.f32.gmra.mxu1 %vm659_vm0, %v3914_v11  ;;  %v7308_v63 = vpop.f32.mrf.mxu0  ;;  %v2812_v11 = vmax.f32 %v6297_v9, 0.0  ;;  %v2816_v9 = vmax.f32 %v6316_v13, 0.0  ;;  %v2825_v13 = vmax.f32 %v6361_v30, 0.0 }
 0x23e   :  { %7854 = vst [vmem:[#allocation53_spill] sm:$0xff] %v7308_v63  ;;  %v7311_v60 = vadd.f32 %v2191_v32, %v1935_v8  ;;  %2805 = vmatprep.mubr.f32.mxu1 %v7781_v34  ;;  %v2817_v8 = vmax.f32 %v6325_v61, 0.0 }
 0x23f   :  { %v7314_v38 = vpop.f32.mrf.mxu1  ;;  %v1940_v0 = vpop.f32.mrf.mxu0  ;;  %2549 = vmatmul.mubr.f32.gmra.mxu0 %v3915_v44 }
 0x240   :  { %7855 = vst [vmem:[#allocation54_spill] sm:$0xff] %v7311_v60  ;;  %7856 = vst [vmem:[#allocation55_spill] sm:$0xff] %v7314_v38  ;;  %v1941_v12 = vadd.f32 %v1940_v0, %v6967_v4  ;;  %3157 = vmatprep.mubr.f32.mxu0 %v2813_v25 }
 0x241   :  { %v2197_v63 = vpop.f32.mrf.mxu1  ;;  %3654 = vmatmul.mubr.msk.f32.gmra.mxu1 %vm659_vm0, %v3916_v39  ;;  %v7325_v34 = vpop.f32.mrf.mxu0  ;;  %v2821_v39 = vmax.f32 %v6343_v15, 0.0 }
 0x242   :  { %7857 = vst [vmem:[#allocation56_spill] sm:$0xff] %v7325_v34  ;;  %v7328_v32 = vadd.f32 %v2197_v63, %v1941_v12  ;;  %v2820_v63 = vmax.f32 %v6334_v3, 0.0  ;;  %v2829_v3 = vmax.f32 %v6379_v46, 0.0 }
 0x243   :  { %v7330_v60 = vpop.f32.mrf.mxu1  ;;  %v1946_v44 = vpop.f32.mrf.mxu0  ;;  %3158 = vmatmul.mubr.f32.vlgmr.msra.gmra.mxu0 %v2812_v11 }
 0x244   :  { %7858 = vst [vmem:[#allocation57_spill] sm:$0xff] %v7328_v32  ;;  %v1947_v25 = vadd.f32 %v1946_v44, %v6967_v4  ;;  %3162 = vmatprep.mubr.f32.mxu0 %v2817_v8 }
 0x245   :  { %v2203_v0 = vpop.f32.mrf.mxu1  ;;  %v7334_v38 = vpop.f32.mrf.mxu0 }
 0x246   :  { %v7337_v21 = vadd.f32 %v2203_v0, %v1947_v25 }
 0x247   :  { %v7339_v34 = vpop.f32.mrf.mxu1  ;;  %v1952_v61 = vpop.f32.mrf.mxu0  ;;  %3163 = vmatmul.mubr.f32.gmra.mxu0 %v2816_v9  ;;  %v2824_v9 = vmax.f32 %v6352_v22, 0.0  ;;  %v2833_v22 = vmax.f32 %v6397_v62, 0.0 }
 0x248   :  { %7859 = vst [vmem:[#allocation58_spill] sm:$0xff] %v7337_v21  ;;  %v1953_v12 = vadd.f32 %v1952_v61, %v6967_v4  ;;  %3167 = vmatprep.mubr.f32.mxu0 %v2821_v39 }
 0x249   :  { %v2209_v11 = vpop.f32.mrf.mxu1  ;;  %v7343_v8 = vpop.f32.mrf.mxu0 }
 0x24a   :  { %v7346_v44 = vadd.f32 %v2209_v11, %v1953_v12 }
 0x24b   :  { %v7348_v32 = vpop.f32.mrf.mxu1  ;;  %v1958_v15 = vpop.f32.mrf.mxu0  ;;  %3168 = vmatmul.mubr.f32.gmra.mxu0 %v2820_v63  ;;  %v2828_v63 = vmax.f32 %v6370_v37, 0.0  ;;  %v2837_v37 = vmax.f32 %v6415_v16, 0.0 }
 0x24c   :  { %7860 = vst [vmem:[#allocation59_spill] sm:$0xff] %v7346_v44  ;;  %v1959_v25 = vadd.f32 %v1958_v15, %v6967_v4  ;;  %3172 = vmatprep.mubr.f32.mxu0 %v2825_v13 }
 0x24d   :  { %v2215_v0 = vpop.f32.mrf.mxu1  ;;  %v7352_v39 = vpop.f32.mrf.mxu0 }
 0x24e   :  { %v7355_v61 = vadd.f32 %v2215_v0, %v1959_v25 }
 0x24f   :  { %v7357_v21 = vpop.f32.mrf.mxu1  ;;  %v1964_v30 = vpop.f32.mrf.mxu0  ;;  %3173 = vmatmul.mubr.f32.gmra.mxu0 %v2824_v9  ;;  %v2832_v9 = vmax.f32 %v6388_v53, 0.0  ;;  %v2841_v53 = vmax.f32 %v6433_v33, 0.0 }
 0x250   :  { %7861 = vst [vmem:[#allocation60_spill] sm:$0xff] %v7355_v61  ;;  %v1965_v12 = vadd.f32 %v1964_v30, %v6967_v4  ;;  %3177 = vmatprep.mubr.f32.mxu0 %v2829_v3 }
 0x251   :  { %v2221_v11 = vpop.f32.mrf.mxu1  ;;  %v7361_v13 = vpop.f32.mrf.mxu0 }
 0x252   :  { %v7364_v15 = vadd.f32 %v2221_v11, %v1965_v12 }
 0x253   :  { %v7366_v44 = vpop.f32.mrf.mxu1  ;;  %v1970_v46 = vpop.f32.mrf.mxu0  ;;  %3178 = vmatmul.mubr.f32.gmra.mxu0 %v2828_v63  ;;  %v2836_v63 = vmax.f32 %v6406_v6, 0.0  ;;  %v2845_v6 = vmax.f32 %v6451_v51, 0.0 }
 0x254   :  { %7862 = vst [vmem:[#allocation61_spill] sm:$0xff] %v7364_v15  ;;  %v1971_v25 = vadd.f32 %v1970_v46, %v6967_v4  ;;  %3182 = vmatprep.mubr.f32.mxu0 %v2833_v22 }
 0x255   :  { %v2227_v0 = vpop.f32.mrf.mxu1  ;;  %v7370_v3 = vpop.f32.mrf.mxu0 }
 0x256   :  { %v7373_v30 = vadd.f32 %v2227_v0, %v1971_v25 }
 0x257   :  { %v7375_v61 = vpop.f32.mrf.mxu1  ;;  %v1976_v62 = vpop.f32.mrf.mxu0  ;;  %3183 = vmatmul.mubr.f32.gmra.mxu0 %v2832_v9  ;;  %v2840_v9 = vmax.f32 %v6424_v24, 0.0  ;;  %v2849_v24 = vmax.f32 %v6469_v7, 0.0 }
 0x258   :  { %7863 = vst [vmem:[#allocation62_spill] sm:$0xff] %v7373_v30  ;;  %v1977_v12 = vadd.f32 %v1976_v62, %v6967_v4  ;;  %3187 = vmatprep.mubr.f32.mxu0 %v2837_v37 }
 0x259   :  { %v2233_v11 = vpop.f32.mrf.mxu1  ;;  %v7379_v22 = vpop.f32.mrf.mxu0 }
 0x25a   :  { %v7382_v46 = vadd.f32 %v2233_v11, %v1977_v12 }
 0x25b   :  { %v7384_v15 = vpop.f32.mrf.mxu1  ;;  %v1982_v16 = vpop.f32.mrf.mxu0  ;;  %3188 = vmatmul.mubr.f32.gmra.mxu0 %v2836_v63  ;;  %v2844_v63 = vmax.f32 %v6442_v41, 0.0  ;;  %v2853_v41 = vmax.f32 %v6487_v27, 0.0 }
 0x25c   :  { %7864 = vst [vmem:[#allocation63_spill] sm:$0xff] %v7382_v46  ;;  %v1983_v25 = vadd.f32 %v1982_v16, %v6967_v4  ;;  %3192 = vmatprep.mubr.f32.mxu0 %v2841_v53 }
 0x25d   :  { %v2239_v0 = vpop.f32.mrf.mxu1  ;;  %v7388_v37 = vpop.f32.mrf.mxu0 }
 0x25e   :  { %v7391_v62 = vadd.f32 %v2239_v0, %v1983_v25 }
 0x25f   :  { %v7393_v30 = vpop.f32.mrf.mxu1  ;;  %v1988_v33 = vpop.f32.mrf.mxu0  ;;  %3193 = vmatmul.mubr.f32.gmra.mxu0 %v2840_v9  ;;  %v2848_v9 = vmax.f32 %v6460_v59, 0.0  ;;  %v2857_v59 = vmax.f32 %v6505_v48, 0.0 }
 0x260   :  { %7865 = vst [vmem:[#allocation64_spill] sm:$0xff] %v7391_v62  ;;  %v1989_v12 = vadd.f32 %v1988_v33, %v6967_v4  ;;  %3197 = vmatprep.mubr.f32.mxu0 %v2845_v6 }
 0x261   :  { %v2245_v11 = vpop.f32.mrf.mxu1  ;;  %v7397_v53 = vpop.f32.mrf.mxu0 }
 0x262   :  { %v7400_v16 = vadd.f32 %v2245_v11, %v1989_v12 }
 0x263   :  { %v7402_v46 = vpop.f32.mrf.mxu1  ;;  %v1994_v51 = vpop.f32.mrf.mxu0  ;;  %3198 = vmatmul.mubr.f32.gmra.mxu0 %v2844_v63  ;;  %v2852_v63 = vmax.f32 %v6478_v17, 0.0  ;;  %v2861_v17 = vmax.f32 %v6523_v5, 0.0 }
 0x264   :  { %7866 = vst [vmem:[#allocation65_spill] sm:$0xff] %v7400_v16  ;;  %v1995_v25 = vadd.f32 %v1994_v51, %v6967_v4  ;;  %3202 = vmatprep.mubr.f32.mxu0 %v2849_v24 }
 0x265   :  { %v2251_v0 = vpop.f32.mrf.mxu1  ;;  %v7406_v6 = vpop.f32.mrf.mxu0 }
 0x266   :  { %v7409_v33 = vadd.f32 %v2251_v0, %v1995_v25 }
 0x267   :  { %v7411_v62 = vpop.f32.mrf.mxu1  ;;  %v2000_v7 = vpop.f32.mrf.mxu0  ;;  %3203 = vmatmul.mubr.f32.gmra.mxu0 %v2848_v9  ;;  %v2856_v9 = vmax.f32 %v6496_v36, 0.0  ;;  %v2865_v36 = vmax.f32 %v6541_v29, 0.0 }
 0x268   :  { %7867 = vst [vmem:[#allocation66_spill] sm:$0xff] %v7409_v33  ;;  %v2001_v12 = vadd.f32 %v2000_v7, %v6967_v4  ;;  %3207 = vmatprep.mubr.f32.mxu0 %v2853_v41 }
 0x269   :  { %v2257_v11 = vpop.f32.mrf.mxu1  ;;  %v7415_v24 = vpop.f32.mrf.mxu0 }
 0x26a   :  { %v7418_v51 = vadd.f32 %v2257_v11, %v2001_v12 }
 0x26b   :  { %v7420_v16 = vpop.f32.mrf.mxu1  ;;  %v2006_v27 = vpop.f32.mrf.mxu0  ;;  %3208 = vmatmul.mubr.f32.gmra.mxu0 %v2852_v63  ;;  %v2860_v63 = vmax.f32 %v6514_v57, 0.0  ;;  %v2869_v57 = vmax.f32 %v6559_v54, 0.0 }
 0x26c   :  { %7868 = vst [vmem:[#allocation67_spill] sm:$0xff] %v7418_v51  ;;  %v2007_v25 = vadd.f32 %v2006_v27, %v6967_v4  ;;  %3212 = vmatprep.mubr.f32.mxu0 %v2857_v59 }
 0x26d   :  { %v2263_v0 = vpop.f32.mrf.mxu1  ;;  %v7424_v41 = vpop.f32.mrf.mxu0 }
 0x26e   :  { %v7427_v7 = vadd.f32 %v2263_v0, %v2007_v25 }
 0x26f   :  { %v7429_v33 = vpop.f32.mrf.mxu1  ;;  %v2012_v48 = vpop.f32.mrf.mxu0  ;;  %3213 = vmatmul.mubr.f32.gmra.mxu0 %v2856_v9  ;;  %v2864_v9 = vmax.f32 %v6532_v18, 0.0  ;;  %v2873_v18 = vmax.f32 %v6581_v47, 0.0 }
 0x270   :  { %7869 = vst [vmem:[#allocation68_spill] sm:$0xff] %v7427_v7  ;;  %v2013_v12 = vadd.f32 %v2012_v48, %v6967_v4  ;;  %3217 = vmatprep.mubr.f32.mxu0 %v2861_v17 }
 0x271   :  { %v2269_v11 = vpop.f32.mrf.mxu1  ;;  %v7433_v59 = vpop.f32.mrf.mxu0 }
 0x272   :  { %v7436_v27 = vadd.f32 %v2269_v11, %v2013_v12 }
 0x273   :  { %v7438_v51 = vpop.f32.mrf.mxu1  ;;  %v2018_v5 = vpop.f32.mrf.mxu0  ;;  %3218 = vmatmul.mubr.f32.gmra.mxu0 %v2860_v63  ;;  %v2868_v63 = vmax.f32 %v6550_v40, 0.0  ;;  %v2877_v40 = vmax.f32 %v6606_v43, 0.0 }
 0x274   :  { %7870 = vst [vmem:[#allocation69_spill] sm:$0xff] %v7436_v27  ;;  %v2019_v25 = vadd.f32 %v2018_v5, %v6967_v4  ;;  %3222 = vmatprep.mubr.f32.mxu0 %v2865_v36 }
 0x275   :  { %v2275_v0 = vpop.f32.mrf.mxu1  ;;  %v7442_v17 = vpop.f32.mrf.mxu0 }
 0x276   :  { %v7445_v48 = vadd.f32 %v2275_v0, %v2019_v25 }
 0x277   :  { %v7447_v7 = vpop.f32.mrf.mxu1  ;;  %v2024_v29 = vpop.f32.mrf.mxu0  ;;  %3223 = vmatmul.mubr.f32.gmra.mxu0 %v2864_v9  ;;  %v2872_v9 = vmax.f32 %v6571_v2, 0.0  ;;  %v2881_v2 = vmax.f32 %v6631_v56, 0.0 }
 0x278   :  { %7871 = vst [vmem:[#allocation70_spill] sm:$0xff] %v7445_v48  ;;  %v2025_v12 = vadd.f32 %v2024_v29, %v6967_v4  ;;  %3227 = vmatprep.mubr.f32.mxu0 %v2869_v57 }
 0x279   :  { %v2281_v11 = vpop.f32.mrf.mxu1  ;;  %v7451_v36 = vpop.f32.mrf.mxu0 }
 0x27a   :  { %v7454_v5 = vadd.f32 %v2281_v11, %v2025_v12 }
 0x27b   :  { %v7456_v27 = vpop.f32.mrf.mxu1  ;;  %v2030_v54 = vpop.f32.mrf.mxu0  ;;  %3228 = vmatmul.mubr.f32.gmra.mxu0 %v2868_v63  ;;  %v2876_v63 = vmax.f32 %v6595_v52, 0.0  ;;  %v2885_v52 = vmax.f32 %v6655_v20, 0.0 }
 0x27c   :  { %7872 = vst [vmem:[#allocation71_spill] sm:$0xff] %v7454_v5  ;;  %v2031_v25 = vadd.f32 %v2030_v54, %v6967_v4  ;;  %3232 = vmatprep.mubr.f32.mxu0 %v2873_v18 }
 0x27d   :  { %v2287_v0 = vpop.f32.mrf.mxu1  ;;  %v7460_v57 = vpop.f32.mrf.mxu0 }
 0x27e   :  { %v7463_v29 = vadd.f32 %v2287_v0, %v2031_v25 }
 0x27f   :  { %v7465_v48 = vpop.f32.mrf.mxu1  ;;  %v2036_v47 = vpop.f32.mrf.mxu0  ;;  %3233 = vmatmul.mubr.f32.gmra.mxu0 %v2872_v9  ;;  %v2880_v9 = vmax.f32 %v6620_v28, 0.0  ;;  %v2889_v28 = vmax.f32 %v6681_v10, 0.0  ;;  %v2893_v10 = vmax.f32 %v6706_v50, 0.0  ;;  %v2897_v50 = vmax.f32 %v6731_v35, 0.0  ;;  %v7879_v35 = vld [vmem:[#allocation21_spill] sm:$0xff] }
 0x280   :  { %7873 = vst [vmem:[#allocation72_spill] sm:$0xff] %v7463_v29  ;;  %v2037_v12 = vadd.f32 %v2036_v47, %v6967_v4  ;;  %3237 = vmatprep.mubr.f32.mxu0 %v2877_v40 }
 0x281   :  { %v2293_v11 = vpop.f32.mrf.mxu1  ;;  %v7469_v18 = vpop.f32.mrf.mxu0 }
 0x282   :  { %v7472_v54 = vadd.f32 %v2293_v11, %v2037_v12 }
 0x283   :  { %v7474_v5 = vpop.f32.mrf.mxu1  ;;  %v2364_v43 = vpop.f32.mrf.mxu0  ;;  %3238 = vmatmul.mubr.f32.gmra.mxu0 %v2876_v63  ;;  %v2884_v63 = vmax.f32 %v6645_v49, 0.0  ;;  %v2888_v49 = vmax.f32 %v6669_v14, 0.0  ;;  %v2892_v14 = vmax.f32 %v6695_v55, 0.0  ;;  %v7878_v55 = vld [vmem:[#allocation19_spill] sm:$0xff] }
 0x284   :  { %7874 = vst [vmem:[#allocation73_spill] sm:$0xff] %v7472_v54  ;;  %7875 = vst [vmem:[#allocation74_spill] sm:$0xff] %v7474_v5  ;;  %v2365_v25 = vadd.f32 %v2364_v43, %v7004_v31  ;;  %3242 = vmatprep.mubr.f32.mxu0 %v2881_v2 }
 0x285   :  { %v2621_v4 = vpop.f32.mrf.mxu1  ;;  %v2366_v0 = vpop.f32.mrf.mxu0 }
 0x286   :  { %v2367_v40 = vadd.f32 %v2366_v0, %v7015_v23  ;;  %v2622_v47 = vadd.f32 %v2621_v4, %v2365_v25 }
 0x287   :  { %v2623_v29 = vpop.f32.mrf.mxu1  ;;  %v2370_v56 = vpop.f32.mrf.mxu0  ;;  %3243 = vmatmul.mubr.f32.gmra.mxu0 %v2880_v9 }
 0x288   :  { %v2624_v12 = vadd.f32 %v2623_v29, %v2367_v40  ;;  %v2371_v11 = vadd.f32 %v2370_v56, %v7029_v1  ;;  %3247 = vmatprep.mubr.f32.mxu0 %v2885_v52  ;;  %v2814_v20 = vmax.f32 %v2622_v47, 0.0 }
 0x289   :  { %v2627_v31 = vpop.f32.mrf.mxu1  ;;  %v2372_v2 = vpop.f32.mrf.mxu0 }
 0x28a   :  { %v2815_v43 = vmax.f32 %v2624_v12, 0.0  ;;  %v2373_v54 = vadd.f32 %v2372_v2, %v7040_v58  ;;  %v2628_v5 = vadd.f32 %v2627_v31, %v2371_v11 }
 0x28b   :  { %v2629_v23 = vpop.f32.mrf.mxu1  ;;  %v2376_v25 = vpop.f32.mrf.mxu0  ;;  %3248 = vmatmul.mubr.f32.gmra.mxu0 %v2884_v63 }
 0x28c   :  { %v2630_v4 = vadd.f32 %v2629_v23, %v2373_v54  ;;  %v2377_v29 = vadd.f32 %v2376_v25, %v7054_v45  ;;  %3252 = vmatprep.mubr.f32.mxu0 %v2889_v28  ;;  %3656 = vmatprep.mubr.msk.f32.mxu1 %vm659_vm0, %v2815_v43  ;;  %v2818_v52 = vmax.f32 %v2628_v5, 0.0  ;;  %v2896_v25 = vmax.f32 %v7878_v55, 0.0 }
 0x28d   :  { %v2633_v1 = vpop.f32.mrf.mxu1  ;;  %v2378_v9 = vpop.f32.mrf.mxu0  ;;  %3383 = vmatmul.mubr.f32.vlgmr.msra.gmra.mxu1 %v2814_v20 }
 0x28e   :  { %v2819_v0 = vmax.f32 %v2630_v4, 0.0  ;;  %v2379_v58 = vadd.f32 %v2378_v9, %v7064_v42  ;;  %v2634_v40 = vadd.f32 %v2633_v1, %v2377_v29  ;;  %v7876_v42 = vld [vmem:[#allocation26_spill] sm:$0xff]  ;;  %v7880_v9 = vld [vmem:[#allocation28_spill] sm:$0xff] }
 0x28f   :  { %v2635_v47 = vpop.f32.mrf.mxu1  ;;  %v2382_v56 = vpop.f32.mrf.mxu0  ;;  %3253 = vmatmul.mubr.f32.gmra.mxu0 %v2888_v49  ;;  %v2901_v49 = vmax.f32 %v7879_v35, 0.0 }
 0x290   :  { %v2636_v54 = vadd.f32 %v2635_v47, %v2379_v58  ;;  %v2383_v45 = vadd.f32 %v2382_v56, %v7078_v26  ;;  %3257 = vmatprep.mubr.f32.mxu0 %v2893_v10  ;;  %3657 = vmatprep.mubr.msk.f32.mxu1 %vm659_vm0, %v2819_v0  ;;  %v2822_v31 = vmax.f32 %v2634_v40, 0.0  ;;  %v7877_v26 = vld [vmem:[#allocation27_spill] sm:$0xff]  ;;  %v7881_v56 = vld [vmem:[#allocation29_spill] sm:$0xff] }
 0x291   :  { %v2639_v12 = vpop.f32.mrf.mxu1  ;;  %v2384_v11 = vpop.f32.mrf.mxu0  ;;  %3388 = vmatmul.mubr.f32.gmra.mxu1 %v2818_v52 }
 0x292   :  { %v2823_v63 = vmax.f32 %v2636_v54, 0.0  ;;  %v2385_v5 = vadd.f32 %v2384_v11, %v7876_v42  ;;  %v2640_v2 = vadd.f32 %v2639_v12, %v2383_v45  ;;  %v7882_v45 = vld [vmem:[#allocation20_spill] sm:$0xff] }
 0x293   :  { %v2641_v28 = vpop.f32.mrf.mxu1  ;;  %v2388_v43 = vpop.f32.mrf.mxu0  ;;  %3258 = vmatmul.mubr.f32.gmra.mxu0 %v2892_v14  ;;  %v2900_v14 = vmax.f32 %v7882_v45, 0.0 }
 0x294   :  { %v2642_v20 = vadd.f32 %v2641_v28, %v2385_v5  ;;  %v2389_v23 = vadd.f32 %v2388_v43, %v7877_v26  ;;  %3262 = vmatprep.mubr.f32.mxu0 %v2897_v50  ;;  %3658 = vmatprep.mubr.msk.f32.mxu1 %vm659_vm0, %v2823_v63  ;;  %v2826_v0 = vmax.f32 %v2640_v2, 0.0  ;;  %v7883_v50 = vld [vmem:[#allocation23_spill] sm:$0xff]  ;;  %v7884_v5 = vld [vmem:[#allocation30_spill] sm:$0xff] }
 0x295   :  { %v2645_v4 = vpop.f32.mrf.mxu1  ;;  %v2390_v29 = vpop.f32.mrf.mxu0  ;;  %3393 = vmatmul.mubr.f32.gmra.mxu1 %v2822_v31  ;;  %v2905_v63 = vmax.f32 %v7883_v50, 0.0 }
 0x296   :  { %v2827_v1 = vmax.f32 %v2642_v20, 0.0  ;;  %v2391_v10 = vadd.f32 %v2390_v29, %v7880_v9  ;;  %v2646_v58 = vadd.f32 %v2645_v4, %v2389_v23  ;;  %v7885_v23 = vld [vmem:[#allocation31_spill] sm:$0xff] }
 0x297   :  { %v2647_v52 = vpop.f32.mrf.mxu1  ;;  %v2394_v40 = vpop.f32.mrf.mxu0  ;;  %3263 = vmatmul.mubr.f32.gmra.mxu0 %v2896_v25  ;;  %v7886_v25 = vld [vmem:[#allocation22_spill] sm:$0xff] }
 0x298   :  { %v2648_v47 = vadd.f32 %v2647_v52, %v2391_v10  ;;  %v2395_v54 = vadd.f32 %v2394_v40, %v7881_v56  ;;  %3267 = vmatprep.mubr.f32.mxu0 %v2901_v49  ;;  %3659 = vmatprep.mubr.msk.f32.mxu1 %vm659_vm0, %v2827_v1  ;;  %v2830_v2 = vmax.f32 %v2646_v58, 0.0  ;;  %v2904_v4 = vmax.f32 %v7886_v25, 0.0  ;;  %v7887_v49 = vld [vmem:[#allocation7_spill] sm:$0xff]  ;;  %v7888_v10 = vld [vmem:[#allocation32_spill] sm:$0xff] }
 0x299   :  { %v2651_v12 = vpop.f32.mrf.mxu1  ;;  %v2396_v11 = vpop.f32.mrf.mxu0  ;;  %3398 = vmatmul.mubr.f32.gmra.mxu1 %v2826_v0  ;;  %v2909_v1 = vmax.f32 %v7887_v49, 0.0  ;;  %v7889_v58 = vld [vmem:[#allocation35_spill] sm:$0xff] }
 0x29a   :  { %v2831_v42 = vmax.f32 %v2648_v47, 0.0  ;;  %v2397_v31 = vadd.f32 %v2396_v11, %v7884_v5  ;;  %v2652_v28 = vadd.f32 %v2651_v12, %v2395_v54  ;;  %v1901_v52 = vadd.f32 %v7889_v58, %v6981_v19  ;;  %v7891_v11 = vld [vmem:[#allocation6_spill] sm:$0xff]  ;;  %v7892_v5 = vld [vmem:[#allocation9_spill] sm:$0xff] }
 0x29b   :  { %v2653_v43 = vpop.f32.mrf.mxu1  ;;  %v2400_v20 = vpop.f32.mrf.mxu0  ;;  %3268 = vmatmul.mubr.f32.gmra.mxu0 %v2900_v14  ;;  %v7890_v14 = vld [vmem:[#allocation33_spill] sm:$0xff]  ;;  %v2908_v50 = vmax.f32 %v7891_v11, 0.0 }
 0x29c   :  { %v2654_v26 = vadd.f32 %v2653_v43, %v2397_v31  ;;  %v2401_v55 = vadd.f32 %v2400_v20, %v7885_v23  ;;  %3272 = vmatprep.mubr.f32.mxu0 %v2905_v63  ;;  %3660 = vmatprep.mubr.msk.f32.mxu1 %vm659_vm0, %v2831_v42  ;;  %v2834_v40 = vmax.f32 %v2652_v28, 0.0  ;;  %v2913_v31 = vmax.f32 %v7892_v5, 0.0  ;;  %v7893_v43 = vld [vmem:[#allocation34_spill] sm:$0xff]  ;;  %v7894_v20 = vld [vmem:[#allocation37_spill] sm:$0xff] }
 0x29d   :  { %v2657_v29 = vpop.f32.mrf.mxu1  ;;  %v2402_v35 = vpop.f32.mrf.mxu0  ;;  %3403 = vmatmul.mubr.f32.gmra.mxu1 %v2830_v2 }
 0x29e   :  { %v2835_v9 = vmax.f32 %v2654_v26, 0.0  ;;  %v2403_v0 = vadd.f32 %v2402_v35, %v7888_v10  ;;  %v2658_v47 = vadd.f32 %v2657_v29, %v2401_v55  ;;  %v2158_v26 = vadd.f32 %v7894_v20, %v1901_v52  ;;  %v7895_v29 = vld [vmem:[#allocation38_spill] sm:$0xff]  ;;  %v7897_v10 = vld [vmem:[#allocation8_spill] sm:$0xff]  ;;  %v7898_v52 = vld [vmem:[#allocation11_spill] sm:$0xff] }
 0x29f   :  { %v2659_v56 = vpop.f32.mrf.mxu1  ;;  %v2406_v54 = vpop.f32.mrf.mxu0  ;;  %3273 = vmatmul.mubr.f32.gmra.mxu0 %v2904_v4  ;;  %v1907_v35 = vadd.f32 %v7895_v29, %v6981_v19 }
 0x2a0   :  { %v2660_v45 = vadd.f32 %v2659_v56, %v2403_v0  ;;  %v2407_v12 = vadd.f32 %v2406_v54, %v7890_v14  ;;  %3277 = vmatprep.mubr.f32.mxu0 %v2909_v1  ;;  %3661 = vmatprep.mubr.msk.f32.mxu1 %vm659_vm0, %v2835_v9  ;;  %v2838_v23 = vmax.f32 %v2658_v47, 0.0  ;;  %v7896_v1 = vld [vmem:[#allocation36_spill] sm:$0xff]  ;;  %v2912_v0 = vmax.f32 %v7897_v10, 0.0 }
 0x2a1   :  { %v2663_v63 = vpop.f32.mrf.mxu1  ;;  %v2408_v42 = vpop.f32.mrf.mxu0  ;;  %3408 = vmatmul.mubr.f32.gmra.mxu1 %v2834_v40  ;;  %v2917_v47 = vmax.f32 %v7898_v52, 0.0 }
 0x2a2   :  { %v2839_v2 = vmax.f32 %v2660_v45, 0.0  ;;  %v2409_v28 = vadd.f32 %v2408_v42, %v7893_v43  ;;  %v2664_v55 = vadd.f32 %v2663_v63, %v2407_v12  ;;  %v7899_v45 = vld [vmem:[#allocation41_spill] sm:$0xff]  ;;  %v7900_v42 = vld [vmem:[#allocation40_spill] sm:$0xff] }
 0x2a3   :  { %v2665_v25 = vpop.f32.mrf.mxu1  ;;  %v2412_v4 = vpop.f32.mrf.mxu0  ;;  %3278 = vmatmul.mubr.f32.gmra.mxu0 %v2908_v50  ;;  %v1913_v14 = vadd.f32 %v7899_v45, %v6981_v19  ;;  %v2164_v5 = vadd.f32 %v7900_v42, %v1907_v35 }
 0x2a4   :  { %v2666_v49 = vadd.f32 %v2665_v25, %v2409_v28  ;;  %v2413_v9 = vadd.f32 %v2412_v4, %v7896_v1  ;;  %3282 = vmatprep.mubr.f32.mxu0 %v2913_v31  ;;  %3662 = vmatprep.mubr.msk.f32.mxu1 %vm659_vm0, %v2839_v2  ;;  %v2842_v12 = vmax.f32 %v2664_v55, 0.0  ;;  %v7901_v2 = vld [vmem:[#allocation39_spill] sm:$0xff]  ;;  %v7902_v28 = vld [vmem:[#allocation10_spill] sm:$0xff]  ;;  %v7903_v25 = vld [vmem:[#allocation13_spill] sm:$0xff] }
 0x2a5   :  { %v2669_v58 = vpop.f32.mrf.mxu1  ;;  %v2414_v40 = vpop.f32.mrf.mxu0  ;;  %3413 = vmatmul.mubr.f32.gmra.mxu1 %v2838_v23  ;;  %v2916_v20 = vmax.f32 %v7902_v28, 0.0  ;;  %v2921_v4 = vmax.f32 %v7903_v25, 0.0 }
 0x2a6   :  { %v2843_v56 = vmax.f32 %v2666_v49, 0.0  ;;  %v2415_v54 = vadd.f32 %v2414_v40, %v2158_v26  ;;  %v2670_v11 = vadd.f32 %v2669_v58, %v2413_v9  ;;  %v7904_v49 = vld [vmem:[#allocation43_spill] sm:$0xff]  ;;  %v7905_v58 = vld [vmem:[#allocation44_spill] sm:$0xff] }
 0x2a7   :  { %v2671_v50 = vpop.f32.mrf.mxu1  ;;  %v2418_v63 = vpop.f32.mrf.mxu0  ;;  %3283 = vmatmul.mubr.f32.gmra.mxu0 %v2912_v0  ;;  %v2170_v1 = vadd.f32 %v7904_v49, %v1913_v14  ;;  %v1919_v40 = vadd.f32 %v7905_v58, %v6981_v19  ;;  %v7908_v14 = vld [vmem:[#allocation15_spill] sm:$0xff] }
 0x2a8   :  { %v2672_v31 = vadd.f32 %v2671_v50, %v2415_v54  ;;  %v2419_v43 = vadd.f32 %v2418_v63, %v7901_v2  ;;  %3287 = vmatprep.mubr.f32.mxu0 %v2917_v47  ;;  %3663 = vmatprep.mubr.msk.f32.mxu1 %vm659_vm0, %v2843_v56  ;;  %v2846_v9 = vmax.f32 %v2670_v11, 0.0  ;;  %v7906_v47 = vld [vmem:[#allocation42_spill] sm:$0xff]  ;;  %v7907_v54 = vld [vmem:[#allocation12_spill] sm:$0xff]  ;;  %v2925_v11 = vmax.f32 %v7908_v14, 0.0 }
 0x2a9   :  { %v2675_v23 = vpop.f32.mrf.mxu1  ;;  %v2420_v26 = vpop.f32.mrf.mxu0  ;;  %3418 = vmatmul.mubr.f32.gmra.mxu1 %v2842_v12  ;;  %v2920_v45 = vmax.f32 %v7907_v54, 0.0 }
 0x2aa   :  { %v2847_v55 = vmax.f32 %v2672_v31, 0.0  ;;  %v2421_v29 = vadd.f32 %v2420_v26, %v2164_v5  ;;  %v2676_v10 = vadd.f32 %v2675_v23, %v2419_v43  ;;  %v7909_v5 = vld [vmem:[#allocation47_spill] sm:$0xff]  ;;  %v7910_v23 = vld [vmem:[#allocation46_spill] sm:$0xff] }
 0x2ab   :  { %v2677_v35 = vpop.f32.mrf.mxu1  ;;  %v2424_v0 = vpop.f32.mrf.mxu0  ;;  %3288 = vmatmul.mubr.f32.gmra.mxu0 %v2916_v20  ;;  %v1925_v31 = vadd.f32 %v7909_v5, %v6981_v19  ;;  %v2176_v26 = vadd.f32 %v7910_v23, %v1919_v40 }
 0x2ac   :  { %v2678_v52 = vadd.f32 %v2677_v35, %v2421_v29  ;;  %v2425_v56 = vadd.f32 %v2424_v0, %v7906_v47  ;;  %3292 = vmatprep.mubr.f32.mxu0 %v2921_v4  ;;  %3664 = vmatprep.mubr.msk.f32.mxu1 %vm659_vm0, %v2847_v55  ;;  %v2850_v2 = vmax.f32 %v2676_v10, 0.0  ;;  %v7911_v4 = vld [vmem:[#allocation45_spill] sm:$0xff]  ;;  %v7912_v29 = vld [vmem:[#allocation14_spill] sm:$0xff] }
 0x2ad   :  { %v2681_v12 = vpop.f32.mrf.mxu1  ;;  %v2426_v50 = vpop.f32.mrf.mxu0  ;;  %3423 = vmatmul.mubr.f32.gmra.mxu1 %v2846_v9  ;;  %v2924_v49 = vmax.f32 %v7912_v29, 0.0  ;;  %v7913_v35 = vld [vmem:[#allocation17_spill] sm:$0xff] }
 0x2ae   :  { %v2851_v63 = vmax.f32 %v2678_v52, 0.0  ;;  %v2427_v42 = vadd.f32 %v2426_v50, %v2170_v1  ;;  %v2682_v43 = vadd.f32 %v2681_v12, %v2425_v56  ;;  %v2929_v0 = vmax.f32 %v7913_v35, 0.0  ;;  %v7914_v52 = vld [vmem:[#allocation49_spill] sm:$0xff]  ;;  %v7915_v12 = vld [vmem:[#allocation50_spill] sm:$0xff] }
 0x2af   :  { %v2683_v28 = vpop.f32.mrf.mxu1  ;;  %v2430_v20 = vpop.f32.mrf.mxu0  ;;  %3293 = vmatmul.mubr.f32.gmra.mxu0 %v2920_v45  ;;  %v2182_v47 = vadd.f32 %v7914_v52, %v1925_v31  ;;  %v1931_v50 = vadd.f32 %v7915_v12, %v6981_v19  ;;  %v7918_v31 = vld [vmem:[#allocation18_spill] sm:$0xff] }
 0x2b0   :  { %v2684_v25 = vadd.f32 %v2683_v28, %v2427_v42  ;;  %v2431_v55 = vadd.f32 %v2430_v20, %v7911_v4  ;;  %3297 = vmatprep.mubr.f32.mxu0 %v2925_v11  ;;  %3665 = vmatprep.mubr.msk.f32.mxu1 %vm659_vm0, %v2851_v63  ;;  %v2854_v56 = vmax.f32 %v2682_v43, 0.0  ;;  %v7916_v11 = vld [vmem:[#allocation48_spill] sm:$0xff]  ;;  %v2933_v43 = vmax.f32 %v7918_v31, 0.0 }
 0x2b1   :  { %v2687_v9 = vpop.f32.mrf.mxu1  ;;  %v2432_v1 = vpop.f32.mrf.mxu0  ;;  %3428 = vmatmul.mubr.f32.gmra.mxu1 %v2850_v2  ;;  %v7917_v42 = vld [vmem:[#allocation16_spill] sm:$0xff] }
 0x2b2   :  { %v2855_v10 = vmax.f32 %v2684_v25, 0.0  ;;  %v2433_v58 = vadd.f32 %v2432_v1, %v2176_v26  ;;  %v2688_v54 = vadd.f32 %v2687_v9, %v2431_v55  ;;  %v2928_v5 = vmax.f32 %v7917_v42, 0.0  ;;  %v7919_v26 = vld [vmem:[#allocation53_spill] sm:$0xff]  ;;  %v7920_v9 = vld [vmem:[#allocation52_spill] sm:$0xff] }
 0x2b3   :  { %v2689_v40 = vpop.f32.mrf.mxu1  ;;  %v2436_v45 = vpop.f32.mrf.mxu0  ;;  %3298 = vmatmul.mubr.f32.gmra.mxu0 %v2924_v49  ;;  %v1937_v25 = vadd.f32 %v7919_v26, %v6981_v19  ;;  %v2188_v1 = vadd.f32 %v7920_v9, %v1931_v50 }
 0x2b4   :  { %v2690_v14 = vadd.f32 %v2689_v40, %v2433_v58  ;;  %v2437_v63 = vadd.f32 %v2436_v45, %v7916_v11  ;;  %3302 = vmatprep.mubr.f32.mxu0 %v2929_v0  ;;  %3666 = vmatprep.mubr.msk.f32.mxu1 %vm659_vm0, %v2855_v10  ;;  %v2858_v4 = vmax.f32 %v2688_v54, 0.0  ;;  %v7921_v0 = vld [vmem:[#allocation51_spill] sm:$0xff]  ;;  %v7922_v58 = vld [vmem:[#allocation5_spill] sm:$0xff] }
 0x2b5   :  { %v2693_v2 = vpop.f32.mrf.mxu1  ;;  %v2438_v28 = vpop.f32.mrf.mxu0  ;;  %3433 = vmatmul.mubr.f32.gmra.mxu1 %v2854_v56  ;;  %v2932_v52 = vmax.f32 %v7922_v58, 0.0  ;;  %v7923_v40 = vld [vmem:[#allocation25_spill] sm:$0xff] }
 0x2b6   :  { %v2859_v20 = vmax.f32 %v2690_v14, 0.0  ;;  %v2439_v23 = vadd.f32 %v2438_v28, %v2182_v47  ;;  %v2694_v55 = vadd.f32 %v2693_v2, %v2437_v63  ;;  %v2937_v45 = vmax.f32 %v7923_v40, 0.0  ;;  %v7924_v14 = vld [vmem:[#allocation55_spill] sm:$0xff]  ;;  %v7925_v2 = vld [vmem:[#allocation56_spill] sm:$0xff] }
 0x2b7   :  { %v2695_v29 = vpop.f32.mrf.mxu1  ;;  %v2442_v49 = vpop.f32.mrf.mxu0  ;;  %3303 = vmatmul.mubr.f32.gmra.mxu0 %v2928_v5  ;;  %v2194_v11 = vadd.f32 %v7924_v14, %v1937_v25  ;;  %v1943_v28 = vadd.f32 %v7925_v2, %v6981_v19 }
 0x2b8   :  { %v2696_v35 = vadd.f32 %v2695_v29, %v2439_v23  ;;  %v2443_v10 = vadd.f32 %v2442_v49, %v7921_v0  ;;  %3307 = vmatprep.mubr.f32.mxu0 %v2933_v43  ;;  %3667 = vmatprep.mubr.msk.f32.mxu1 %vm659_vm0, %v2859_v20  ;;  %v2862_v63 = vmax.f32 %v2694_v55, 0.0  ;;  %v7926_v43 = vld [vmem:[#allocation54_spill] sm:$0xff]  ;;  %v7927_v23 = vld [vmem:[#allocation24_spill] sm:$0xff] }
 0x2b9   :  { %v2699_v56 = vpop.f32.mrf.mxu1  ;;  %v2444_v47 = vpop.f32.mrf.mxu0  ;;  %3438 = vmatmul.mubr.f32.gmra.mxu1 %v2858_v4  ;;  %v2936_v26 = vmax.f32 %v7927_v23, 0.0  ;;  %v2200_v0 = vadd.f32 %v7330_v60, %v1943_v28  ;;  %v1955_v60 = vadd.f32 %v7343_v8, %v6981_v19 }
 0x2ba   :  { %v2863_v54 = vmax.f32 %v2696_v35, 0.0  ;;  %v2445_v12 = vadd.f32 %v2444_v47, %v2188_v1  ;;  %v2700_v42 = vadd.f32 %v2699_v56, %v2443_v10  ;;  %v1949_v10 = vadd.f32 %v7334_v38, %v6981_v19 }
 0x2bb   :  { %v2701_v50 = vpop.f32.mrf.mxu1  ;;  %v2448_v5 = vpop.f32.mrf.mxu0  ;;  %3308 = vmatmul.mubr.f32.gmra.mxu0 %v2932_v52  ;;  %v7928_v52 = vld [vmem:[#allocation57_spill] sm:$0xff] }
 0x2bc   :  { %v2702_v31 = vadd.f32 %v2701_v50, %v2445_v12  ;;  %v2449_v20 = vadd.f32 %v2448_v5, %v7926_v43  ;;  %3312 = vmatprep.mubr.f32.mxu0 %v2937_v45  ;;  %3668 = vmatprep.mubr.msk.f32.mxu1 %vm659_vm0, %v2863_v54  ;;  %v2866_v49 = vmax.f32 %v2700_v42, 0.0  ;;  %v2206_v42 = vadd.f32 %v7339_v34, %v1949_v10  ;;  %v7929_v50 = vld [vmem:[#allocation58_spill] sm:$0xff] }
 0x2bd   :  { %v2705_v4 = vpop.f32.mrf.mxu1  ;;  %v2450_v29 = vpop.f32.mrf.mxu0  ;;  %3443 = vmatmul.mubr.f32.gmra.mxu1 %v2862_v63  ;;  %v1961_v34 = vadd.f32 %v7352_v39, %v6981_v19 }
 0x2be   :  { %v2867_v25 = vmax.f32 %v2702_v31, 0.0  ;;  %v2451_v55 = vadd.f32 %v2450_v29, %v2194_v11  ;;  %v2706_v9 = vadd.f32 %v2705_v4, %v2449_v20  ;;  %v2212_v29 = vadd.f32 %v7348_v32, %v1955_v60 }
 0x2bf   :  { %v2707_v1 = vpop.f32.mrf.mxu1  ;;  %v2454_v35 = vpop.f32.mrf.mxu0  ;;  %3313 = vmatmul.mubr.f32.gmra.mxu0 %v2936_v26  ;;  %v1967_v32 = vadd.f32 %v7361_v13, %v6981_v19 }
 0x2c0   :  { %v2708_v58 = vadd.f32 %v2707_v1, %v2451_v55  ;;  %v2455_v56 = vadd.f32 %v2454_v35, %v7928_v52  ;;  %3669 = vmatprep.mubr.msk.f32.mxu1 %vm659_vm0, %v2867_v25  ;;  %v2870_v12 = vmax.f32 %v2706_v9, 0.0  ;;  %v7930_v25 = vld [vmem:[#allocation59_spill] sm:$0xff] }
 0x2c1   :  { %v2711_v47 = vpop.f32.mrf.mxu1  ;;  %v2456_v40 = vpop.f32.mrf.mxu0  ;;  %3448 = vmatmul.mubr.f32.gmra.mxu1 %v2866_v49 }
 0x2c2   :  { %v2871_v45 = vmax.f32 %v2708_v58, 0.0  ;;  %v2457_v54 = vadd.f32 %v2456_v40, %v2200_v0  ;;  %v2712_v14 = vadd.f32 %v2711_v47, %v2455_v56  ;;  %v2218_v56 = vadd.f32 %v7357_v21, %v1961_v34  ;;  %v7931_v47 = vld [vmem:[#allocation60_spill] sm:$0xff]  ;;  %v7933_v34 = vld [vmem:[#allocation62_spill] sm:$0xff] }
 0x2c3   :  { %v2713_v11 = vpop.f32.mrf.mxu1  ;;  %v2460_v63 = vpop.f32.mrf.mxu0  ;;  %v1973_v21 = vadd.f32 %v7370_v3, %v6981_v19 }
 0x2c4   :  { %v2714_v38 = vadd.f32 %v2713_v11, %v2457_v54  ;;  %v2461_v5 = vadd.f32 %v2460_v63, %v7929_v50  ;;  %3670 = vmatprep.mubr.msk.f32.mxu1 %vm659_vm0, %v2871_v45  ;;  %v2874_v20 = vmax.f32 %v2712_v14, 0.0  ;;  %v7932_v50 = vld [vmem:[#allocation61_spill] sm:$0xff] }
 0x2c5   :  { %v2717_v2 = vpop.f32.mrf.mxu1  ;;  %v2462_v28 = vpop.f32.mrf.mxu0  ;;  %3453 = vmatmul.mubr.f32.gmra.mxu1 %v2870_v12 }
 0x2c6   :  { %v2875_v31 = vmax.f32 %v2714_v38, 0.0  ;;  %v2463_v43 = vadd.f32 %v2462_v28, %v2206_v42  ;;  %v2718_v23 = vadd.f32 %v2717_v2, %v2461_v5  ;;  %v2224_v38 = vadd.f32 %v7366_v44, %v1967_v32 }
 0x2c7   :  { %v2719_v26 = vpop.f32.mrf.mxu1  ;;  %v2466_v4 = vpop.f32.mrf.mxu0  ;;  %v1979_v44 = vadd.f32 %v7379_v22, %v6981_v19 }
 0x2c8   :  { %v2720_v8 = vadd.f32 %v2719_v26, %v2463_v43  ;;  %v2467_v55 = vadd.f32 %v2466_v4, %v7930_v25  ;;  %3671 = vmatprep.mubr.msk.f32.mxu1 %vm659_vm0, %v2875_v31  ;;  %v2878_v0 = vmax.f32 %v2718_v23, 0.0 }
 0x2c9   :  { %v2723_v49 = vpop.f32.mrf.mxu1  ;;  %v2468_v9 = vpop.f32.mrf.mxu0  ;;  %3458 = vmatmul.mubr.f32.gmra.mxu1 %v2874_v20 }
 0x2ca   :  { %v2879_v1 = vmax.f32 %v2720_v8, 0.0  ;;  %v2469_v35 = vadd.f32 %v2468_v9, %v2212_v29  ;;  %v2724_v10 = vadd.f32 %v2723_v49, %v2467_v55  ;;  %v2230_v29 = vadd.f32 %v7375_v61, %v1973_v21 }
 0x2cb   :  { %v2725_v58 = vpop.f32.mrf.mxu1  ;;  %v2472_v52 = vpop.f32.mrf.mxu0  ;;  %v1985_v61 = vadd.f32 %v7388_v37, %v6981_v19 }
 0x2cc   :  { %v2726_v39 = vadd.f32 %v2725_v58, %v2469_v35  ;;  %v2473_v40 = vadd.f32 %v2472_v52, %v7931_v47  ;;  %3672 = vmatprep.mubr.msk.f32.mxu1 %vm659_vm0, %v2879_v1  ;;  %v2882_v11 = vmax.f32 %v2724_v10, 0.0  ;;  %v2236_v58 = vadd.f32 %v7384_v15, %v1979_v44  ;;  %v7934_v52 = vld [vmem:[#allocation63_spill] sm:$0xff] }
 0x2cd   :  { %v2729_v45 = vpop.f32.mrf.mxu1  ;;  %v2474_v54 = vpop.f32.mrf.mxu0  ;;  %3463 = vmatmul.mubr.f32.gmra.mxu1 %v2878_v0  ;;  %v1991_v15 = vadd.f32 %v7397_v53, %v6981_v19 }
 0x2ce   :  { %v2883_v12 = vmax.f32 %v2726_v39, 0.0  ;;  %v2475_v14 = vadd.f32 %v2474_v54, %v2218_v56  ;;  %v2730_v63 = vadd.f32 %v2729_v45, %v2473_v40 }
 0x2cf   :  { %v2731_v42 = vpop.f32.mrf.mxu1  ;;  %v2478_v60 = vpop.f32.mrf.mxu0 }
 0x2d0   :  { %v2732_v13 = vadd.f32 %v2731_v42, %v2475_v14  ;;  %v2479_v5 = vadd.f32 %v2478_v60, %v7932_v50  ;;  %3673 = vmatprep.mubr.msk.f32.mxu1 %vm659_vm0, %v2883_v12  ;;  %v2886_v20 = vmax.f32 %v2730_v63, 0.0  ;;  %v7935_v63 = vld [vmem:[#allocation64_spill] sm:$0xff] }
 0x2d1   :  { %v2735_v2 = vpop.f32.mrf.mxu1  ;;  %v2480_v28 = vpop.f32.mrf.mxu0  ;;  %3468 = vmatmul.mubr.f32.gmra.mxu1 %v2882_v11  ;;  %v2242_v11 = vadd.f32 %v7393_v30, %v1985_v61  ;;  %v1997_v30 = vadd.f32 %v7406_v6, %v6981_v19 }
 0x2d2   :  { %v2887_v31 = vmax.f32 %v2732_v13, 0.0  ;;  %v2481_v43 = vadd.f32 %v2480_v28, %v2224_v38  ;;  %v2736_v23 = vadd.f32 %v2735_v2, %v2479_v5 }
 0x2d3   :  { %v2737_v26 = vpop.f32.mrf.mxu1  ;;  %v2484_v4 = vpop.f32.mrf.mxu0 }
 0x2d4   :  { %v2738_v3 = vadd.f32 %v2737_v26, %v2481_v43  ;;  %v2485_v8 = vadd.f32 %v2484_v4, %v7933_v34  ;;  %3674 = vmatprep.mubr.msk.f32.mxu1 %vm659_vm0, %v2887_v31  ;;  %v2890_v1 = vmax.f32 %v2736_v23, 0.0  ;;  %v2248_v31 = vadd.f32 %v7402_v46, %v1991_v15  ;;  %v7936_v43 = vld [vmem:[#allocation65_spill] sm:$0xff] }
 0x2d5   :  { %v2741_v25 = vpop.f32.mrf.mxu1  ;;  %v2486_v55 = vpop.f32.mrf.mxu0  ;;  %3473 = vmatmul.mubr.f32.gmra.mxu1 %v2886_v20  ;;  %v2003_v46 = vadd.f32 %v7415_v24, %v6981_v19 }
 0x2d6   :  { %v2891_v49 = vmax.f32 %v2738_v3, 0.0  ;;  %v2487_v9 = vadd.f32 %v2486_v55, %v2230_v29  ;;  %v2742_v35 = vadd.f32 %v2741_v25, %v2485_v8  ;;  %v2254_v25 = vadd.f32 %v7411_v62, %v1997_v30  ;;  %v7937_v55 = vld [vmem:[#allocation66_spill] sm:$0xff] }
 0x2d7   :  { %v2743_v0 = vpop.f32.mrf.mxu1  ;;  %v2490_v10 = vpop.f32.mrf.mxu0  ;;  %v2009_v62 = vadd.f32 %v7424_v41, %v6981_v19 }
 0x2d8   :  { %v2744_v22 = vadd.f32 %v2743_v0, %v2487_v9  ;;  %v2491_v56 = vadd.f32 %v2490_v10, %v7934_v52  ;;  %3675 = vmatprep.mubr.msk.f32.mxu1 %vm659_vm0, %v2891_v49  ;;  %v2894_v45 = vmax.f32 %v2742_v35, 0.0  ;;  %v2260_v52 = vadd.f32 %v7420_v16, %v2003_v46 }
 0x2d9   :  { %v2747_v32 = vpop.f32.mrf.mxu1  ;;  %v2492_v39 = vpop.f32.mrf.mxu0  ;;  %3478 = vmatmul.mubr.f32.gmra.mxu1 %v2890_v1  ;;  %v2266_v15 = vadd.f32 %v7429_v33, %v2009_v62  ;;  %v2015_v16 = vadd.f32 %v7433_v59, %v6981_v19  ;;  %v2021_v33 = vadd.f32 %v7442_v17, %v6981_v19 }
 0x2da   :  { %v2895_v47 = vmax.f32 %v2744_v22, 0.0  ;;  %v2493_v40 = vadd.f32 %v2492_v39, %v2236_v58  ;;  %v2748_v54 = vadd.f32 %v2747_v32, %v2491_v56  ;;  %v7938_v56 = vld [vmem:[#allocation67_spill] sm:$0xff] }
 0x2db   :  { %v2749_v12 = vpop.f32.mrf.mxu1  ;;  %v2496_v14 = vpop.f32.mrf.mxu0 }
 0x2dc   :  { %v2750_v37 = vadd.f32 %v2749_v12, %v2493_v40  ;;  %v2497_v42 = vadd.f32 %v2496_v14, %v7935_v63  ;;  %3676 = vmatprep.mubr.msk.f32.mxu1 %vm659_vm0, %v2895_v47  ;;  %v2898_v50 = vmax.f32 %v2748_v54, 0.0 }
 0x2dd   :  { %v2753_v60 = vpop.f32.mrf.mxu1  ;;  %v2498_v38 = vpop.f32.mrf.mxu0  ;;  %3483 = vmatmul.mubr.f32.gmra.mxu1 %v2894_v45 }
 0x2de   :  { %v2899_v21 = vmax.f32 %v2750_v37, 0.0  ;;  %v2499_v13 = vadd.f32 %v2498_v38, %v2242_v11  ;;  %v2754_v5 = vadd.f32 %v2753_v60, %v2497_v42  ;;  %v7939_v37 = vld [vmem:[#allocation68_spill] sm:$0xff] }
 0x2df   :  { %v2755_v2 = vpop.f32.mrf.mxu1  ;;  %v2502_v28 = vpop.f32.mrf.mxu0 }
 0x2e0   :  { %v2756_v53 = vadd.f32 %v2755_v2, %v2499_v13  ;;  %v2503_v20 = vadd.f32 %v2502_v28, %v7936_v43  ;;  %3677 = vmatprep.mubr.msk.f32.mxu1 %vm659_vm0, %v2899_v21  ;;  %v2902_v44 = vmax.f32 %v2754_v5, 0.0  ;;  %v2272_v28 = vadd.f32 %v7438_v51, %v2015_v16 }
 0x2e1   :  { %v2759_v23 = vpop.f32.mrf.mxu1  ;;  %v2504_v26 = vpop.f32.mrf.mxu0  ;;  %3488 = vmatmul.mubr.f32.gmra.mxu1 %v2898_v50  ;;  %v2027_v51 = vadd.f32 %v7451_v36, %v6981_v19 }
 0x2e2   :  { %v2903_v4 = vmax.f32 %v2756_v53, 0.0  ;;  %v2505_v29 = vadd.f32 %v2504_v26, %v2248_v31  ;;  %v2760_v3 = vadd.f32 %v2759_v23, %v2503_v20  ;;  %v7940_v31 = vld [vmem:[#allocation69_spill] sm:$0xff] }
 0x2e3   :  { %v2761_v34 = vpop.f32.mrf.mxu1  ;;  %v2508_v8 = vpop.f32.mrf.mxu0 }
 0x2e4   :  { %v2762_v6 = vadd.f32 %v2761_v34, %v2505_v29  ;;  %v2509_v49 = vadd.f32 %v2508_v8, %v7937_v55  ;;  %3678 = vmatprep.mubr.msk.f32.mxu1 %vm659_vm0, %v2903_v4  ;;  %v2906_v10 = vmax.f32 %v2760_v3, 0.0  ;;  %v2278_v3 = vadd.f32 %v7447_v7, %v2021_v33  ;;  %v7941_v34 = vld [vmem:[#allocation70_spill] sm:$0xff] }
 0x2e5   :  { %v2765_v9 = vpop.f32.mrf.mxu1  ;;  %v2510_v1 = vpop.f32.mrf.mxu0  ;;  %3493 = vmatmul.mubr.f32.gmra.mxu1 %v2902_v44  ;;  %v2033_v7 = vadd.f32 %v7460_v57, %v6981_v19 }
 0x2e6   :  { %v2907_v35 = vmax.f32 %v2762_v6, 0.0  ;;  %v2511_v0 = vadd.f32 %v2510_v1, %v2254_v25  ;;  %v2766_v58 = vadd.f32 %v2765_v9, %v2509_v49 }
 0x2e7   :  { %v2767_v61 = vpop.f32.mrf.mxu1  ;;  %v2514_v22 = vpop.f32.mrf.mxu0 }
 0x2e8   :  { %v2768_v24 = vadd.f32 %v2767_v61, %v2511_v0  ;;  %v2515_v32 = vadd.f32 %v2514_v22, %v7938_v56  ;;  %3679 = vmatprep.mubr.msk.f32.mxu1 %vm659_vm0, %v2907_v35  ;;  %v2910_v54 = vmax.f32 %v2766_v58, 0.0  ;;  %v2284_v0 = vadd.f32 %v7456_v27, %v2027_v51 }
 0x2e9   :  { %v2771_v39 = vpop.f32.mrf.mxu1  ;;  %v2516_v47 = vpop.f32.mrf.mxu0  ;;  %3498 = vmatmul.mubr.f32.gmra.mxu1 %v2906_v10  ;;  %v7942_v10 = vld [vmem:[#allocation71_spill] sm:$0xff]  ;;  %v2039_v27 = vadd.f32 %v7469_v18, %v6981_v19 }
 0x2ea   :  { %v2911_v40 = vmax.f32 %v2768_v24, 0.0  ;;  %v2517_v45 = vadd.f32 %v2516_v47, %v2260_v52  ;;  %v2772_v12 = vadd.f32 %v2771_v39, %v2515_v32  ;;  %v2290_v47 = vadd.f32 %v7465_v48, %v2033_v7 }
 0x2eb   :  { %v2773_v14 = vpop.f32.mrf.mxu1  ;;  %v2520_v11 = vpop.f32.mrf.mxu0 }
 0x2ec   :  { %v2774_v41 = vadd.f32 %v2773_v14, %v2517_v45  ;;  %v2521_v63 = vadd.f32 %v2520_v11, %v7939_v37  ;;  %3680 = vmatprep.mubr.msk.f32.mxu1 %vm659_vm0, %v2911_v40  ;;  %v2914_v13 = vmax.f32 %v2772_v12, 0.0  ;;  %v7943_v40 = vld [vmem:[#allocation72_spill] sm:$0xff] }
 0x2ed   :  { %v2777_v42 = vpop.f32.mrf.mxu1  ;;  %v2522_v60 = vpop.f32.mrf.mxu0  ;;  %3503 = vmatmul.mubr.f32.gmra.mxu1 %v2910_v54 }
 0x2ee   :  { %v2915_v38 = vmax.f32 %v2774_v41, 0.0  ;;  %v2523_v21 = vadd.f32 %v2522_v60, %v2266_v15  ;;  %v2778_v50 = vadd.f32 %v2777_v42, %v2521_v63  ;;  %v7944_v63 = vld [vmem:[#allocation74_spill] sm:$0xff]  ;;  %v7945_v60 = vld [vmem:[#allocation73_spill] sm:$0xff] }
 0x2ef   :  { %v2779_v5 = vpop.f32.mrf.mxu1  ;;  %v2526_v2 = vpop.f32.mrf.mxu0  ;;  %v2296_v42 = vadd.f32 %v7944_v63, %v2039_v27 }
 0x2f0   :  { %v2780_v59 = vadd.f32 %v2779_v5, %v2523_v21  ;;  %v2527_v30 = vadd.f32 %v2526_v2, %v7940_v31  ;;  %3681 = vmatprep.mubr.msk.f32.mxu1 %vm659_vm0, %v2915_v38  ;;  %v2918_v26 = vmax.f32 %v2778_v50, 0.0 }
 0x2f1   :  { %v2783_v53 = vpop.f32.mrf.mxu1  ;;  %v2528_v43 = vpop.f32.mrf.mxu0  ;;  %3508 = vmatmul.mubr.f32.gmra.mxu1 %v2914_v13 }
 0x2f2   :  { %v2919_v20 = vmax.f32 %v2780_v59, 0.0  ;;  %v2529_v23 = vadd.f32 %v2528_v43, %v2272_v28  ;;  %v2784_v4 = vadd.f32 %v2783_v53, %v2527_v30 }
 0x2f3   :  { %v2785_v29 = vpop.f32.mrf.mxu1  ;;  %v2532_v44 = vpop.f32.mrf.mxu0 }
 0x2f4   :  { %v2786_v17 = vadd.f32 %v2785_v29, %v2529_v23  ;;  %v2533_v8 = vadd.f32 %v2532_v44, %v7941_v34  ;;  %3682 = vmatprep.mubr.msk.f32.mxu1 %vm659_vm0, %v2919_v20  ;;  %v2922_v49 = vmax.f32 %v2784_v4, 0.0 }
 0x2f5   :  { %v2789_v25 = vpop.f32.mrf.mxu1  ;;  %v2534_v46 = vpop.f32.mrf.mxu0  ;;  %3513 = vmatmul.mubr.f32.gmra.mxu1 %v2918_v26 }
 0x2f6   :  { %v2923_v6 = vmax.f32 %v2786_v17, 0.0  ;;  %v2535_v55 = vadd.f32 %v2534_v46, %v2278_v3  ;;  %v2790_v9 = vadd.f32 %v2789_v25, %v2533_v8 }
 0x2f7   :  { %v2791_v1 = vpop.f32.mrf.mxu1  ;;  %v2538_v35 = vpop.f32.mrf.mxu0 }
 0x2f8   :  { %v2792_v36 = vadd.f32 %v2791_v1, %v2535_v55  ;;  %v2539_v58 = vadd.f32 %v2538_v35, %v7942_v10  ;;  %3683 = vmatprep.mubr.msk.f32.mxu1 %vm659_vm0, %v2923_v6  ;;  %v2926_v24 = vmax.f32 %v2790_v9, 0.0 }
 0x2f9   :  { %v2795_v61 = vpop.f32.mrf.mxu1  ;;  %v2540_v22 = vpop.f32.mrf.mxu0  ;;  %3518 = vmatmul.mubr.f32.gmra.mxu1 %v2922_v49 }
 0x2fa   :  { %v2927_v52 = vmax.f32 %v2792_v36, 0.0  ;;  %v2541_v62 = vadd.f32 %v2540_v22, %v2284_v0  ;;  %v2796_v56 = vadd.f32 %v2795_v61, %v2539_v58 }
 0x2fb   :  { %v2797_v32 = vpop.f32.mrf.mxu1  ;;  %v2544_v39 = vpop.f32.mrf.mxu0 }
 0x2fc   :  { %v2798_v57 = vadd.f32 %v2797_v32, %v2541_v62  ;;  %v2545_v45 = vadd.f32 %v2544_v39, %v7943_v40  ;;  %3684 = vmatprep.mubr.msk.f32.mxu1 %vm659_vm0, %v2927_v52  ;;  %v2930_v15 = vmax.f32 %v2796_v56, 0.0  ;;  %v7676_v39 = vld [vmem:[%s7771_s4] ss:$0 sm:$0xff]  ;;  %s3940_s4 = smov [#allocation2]  }
 0x2fd   :  { %v2801_v54 = vpop.f32.mrf.mxu1  ;;  %v2546_v12 = vpop.f32.mrf.mxu0  ;;  %3523 = vmatmul.mubr.f32.gmra.mxu1 %v2926_v24  ;;  %s3580_s30 = sshll.u32 %s3940_s4, 4  ;;  %s3581_s30 = int_to_ptr.vmem [resolvable:$true] %s3580_s30 }
 0x2fe   :  { %v2931_v14 = vmax.f32 %v2798_v57, 0.0  ;;  %v2547_v11 = vadd.f32 %v2546_v12, %v2290_v47  ;;  %v2802_v16 = vadd.f32 %v2801_v54, %v2545_v45  ;;  %s3917_s6 = scalar_lea.vmem %s3581_s30, 4096  ;;  %p3922_p1 = scmp.lt.s32.totalorder %s3581_s30, %s3581_s30 }
 0x2ff   :  { %v2803_v41 = vpop.f32.mrf.mxu1  ;;  %v2550_v37 = vpop.f32.mrf.mxu0  ;;  %p3918_p0 = scmp.ne.s32.totalorder %s3581_s30, %s3917_s6  ;;  %p3923_p2 = scmp.lt.s32.totalorder %s3917_s6, %s3917_s6 }
 0x300   :  { %v2804_v48 = vadd.f32 %v2803_v41, %v2547_v11  ;;  %v2551_v38 = vadd.f32 %v2550_v37, %v7945_v60  ;;  %3685 = vmatprep.mubr.msk.f32.mxu1 %vm659_vm0, %v2931_v14  ;;  %v2934_v50 = vmax.f32 %v2802_v16, 0.0 }
 0x301   :  { %v2807_v19 = vpop.f32.mrf.mxu1  ;;  %v2552_v18 = vpop.f32.mrf.mxu0  ;;  %3528 = vmatmul.mubr.f32.gmra.mxu1 %v2930_v15  ;;  %p3924_p3 = por %p3923_p2, %p3922_p1 }
 0x302   :  { %v2935_v21 = vmax.f32 %v2804_v48, 0.0  ;;  %v2553_v13 = vadd.f32 %v2552_v18, %v2296_v42  ;;  %v2808_v5 = vadd.f32 %v2807_v19, %v2551_v38 }
 0x303   :  { %v2809_v2 = vpop.f32.mrf.mxu1  ;;  %v3159_v28 = vpop.f32.mrf.mxu0  ;;  %p3925_p4 = pnand %p3924_p3, %p3918_p0 }
 0x304   :  { %v2810_v33 = vadd.f32 %v2809_v2, %v2553_v13  ;;  %3686 = vmatprep.mubr.msk.f32.mxu1 %vm659_vm0, %v2935_v21  ;;  %v2938_v30 = vmax.f32 %v2808_v5, 0.0  ;;  %v3160_v57 = vadd.f32 %v7676_v39, %v3159_v28 }
 0x305   :  { %v3161_v59 = vpop.f32.mrf.mxu0  ;;  %3533 = vmatmul.mubr.f32.gmra.mxu1 %v2934_v50 }
 0x306   :  { %v2939_v31 = vmax.f32 %v2810_v33, 0.0 }
 0x307   :  { %v3164_v53 = vpop.f32.mrf.mxu0 }
 0x308   :  { %3687 = vmatprep.mubr.msk.f32.mxu1 %vm659_vm0, %v2939_v31  ;;  %v3165_v11 = vadd.f32 %v7676_v39, %v3164_v53 }
 0x309   :  { %v3166_v43 = vpop.f32.mrf.mxu0  ;;  %3538 = vmatmul.mubr.f32.gmra.mxu1 %v2938_v30 }
 0x30b   :  { %v3169_v20 = vpop.f32.mrf.mxu0 }
 0x30c   :  { %v3170_v42 = vadd.f32 %v7676_v39, %v3169_v20 }
 0x30d   :  { %v3171_v23 = vpop.f32.mrf.mxu0 }
 0x30f   :  { %v3174_v26 = vpop.f32.mrf.mxu0 }
 0x310   :  { %v3175_v21 = vadd.f32 %v7676_v39, %v3174_v26 }
 0x311   :  { %v3176_v4 = vpop.f32.mrf.mxu0 }
 0x313   :  { %v3179_v29 = vpop.f32.mrf.mxu0 }
 0x314   :  { %v3180_v33 = vadd.f32 %v7676_v39, %v3179_v29 }
 0x315   :  { %v3181_v44 = vpop.f32.mrf.mxu0 }
 0x317   :  { %v3184_v3 = vpop.f32.mrf.mxu0 }
 0x318   :  { %v3185_v20 = vadd.f32 %v7676_v39, %v3184_v3 }
 0x319   :  { %v3186_v51 = vpop.f32.mrf.mxu0 }
 0x31b   :  { %v7649_v17 = vpop.f32.mrf.mxu0 }
 0x31d   :  { %v3191_v34 = vpop.f32.mrf.mxu0 }
 0x31e   :  { %v3190_v34 = vadd.f32 %v7676_v39, %v7649_v17 }
 0x31f   :  { %v7651_v8 = vpop.f32.mrf.mxu0 }
 0x320   :  { %v3195_v3 = vadd.f32 %v7676_v39, %v7651_v8 }
 0x321   :  { %v3196_v25 = vpop.f32.mrf.mxu0 }
 0x323   :  { %v7653_v46 = vpop.f32.mrf.mxu0 }
 0x324   :  { %v3200_v17 = vadd.f32 %v7676_v39, %v7653_v46 }
 0x325   :  { %v3201_v6 = vpop.f32.mrf.mxu0 }
 0x327   :  { %v7655_v55 = vpop.f32.mrf.mxu0 }
 0x328   :  { %v3205_v8 = vadd.f32 %v7676_v39, %v7655_v55 }
 0x329   :  { %v3206_v49 = vpop.f32.mrf.mxu0 }
 0x32b   :  { %v7657_v9 = vpop.f32.mrf.mxu0 }
 0x32c   :  { %v3210_v46 = vadd.f32 %v7676_v39, %v7657_v9 }
 0x32d   :  { %v3211_v1 = vpop.f32.mrf.mxu0 }
 0x32f   :  { %v7659_v35 = vpop.f32.mrf.mxu0 }
 0x330   :  { %v3215_v55 = vadd.f32 %v7676_v39, %v7659_v35 }
 0x331   :  { %v3216_v0 = vpop.f32.mrf.mxu0 }
 0x333   :  { %v7661_v7 = vpop.f32.mrf.mxu0 }
 0x334   :  { %v3220_v9 = vadd.f32 %v7676_v39, %v7661_v7 }
 0x335   :  { %v3221_v36 = vpop.f32.mrf.mxu0 }
 0x337   :  { %v7663_v10 = vpop.f32.mrf.mxu0 }
 0x338   :  { %v3225_v35 = vadd.f32 %v7676_v39, %v7663_v10 }
 0x339   :  { %v3226_v58 = vpop.f32.mrf.mxu0 }
 0x33b   :  { %v7665_v61 = vpop.f32.mrf.mxu0 }
 0x33d   :  { %v3231_v22 = vpop.f32.mrf.mxu0 }
 0x33f   :  { %v7667_v52 = vpop.f32.mrf.mxu0 }
 0x341   :  { %v3236_v62 = vpop.f32.mrf.mxu0 }
 0x343   :  { %v7669_v24 = vpop.f32.mrf.mxu0 }
 0x344   :  { %v3240_v10 = vadd.f32 %v7676_v39, %v7669_v24 }
 0x345   :  { %v3241_v56 = vpop.f32.mrf.mxu0 }
 0x347   :  { %v7671_v32 = vpop.f32.mrf.mxu0 }
 0x349   :  { %v3246_v47 = vpop.f32.mrf.mxu0 }
 0x34b   :  { %v7678_v27 = vpop.f32.mrf.mxu0 }
 0x34d   :  { %v3251_v40 = vpop.f32.mrf.mxu0  ;;  %v3384_v45 = vpop.f32.mrf.mxu1 }
 0x34e   :  { %v3385_v54 = vadd.f32 %v3384_v45, %v3160_v57 }
 0x34f   :  { %v7681_v12 = vpop.f32.mrf.mxu0  ;;  %v3386_v14 = vpop.f32.mrf.mxu1 }
 0x350   :  { %3543 = vst [vmem:[#allocation2] sm:$0xff] %v3385_v54  ;;  %v3255_v24 = vadd.f32 %v7676_v39, %v7681_v12 }
 0x351   :  { %v3256_v15 = vpop.f32.mrf.mxu0  ;;  %v3389_v16 = vpop.f32.mrf.mxu1 }
 0x352   :  { %v3390_v41 = vadd.f32 %v3389_v16, %v3165_v11 }
 0x353   :  { %v7684_v37 = vpop.f32.mrf.mxu0  ;;  %v3391_v63 = vpop.f32.mrf.mxu1 }
 0x354   :  { %3544 = vst [vmem:[#allocation2 + $0x8] sm:$0xff] %v3390_v41 }
 0x355   :  { %v3261_v48 = vpop.f32.mrf.mxu0  ;;  %v3394_v60 = vpop.f32.mrf.mxu1 }
 0x356   :  { %v3395_v38 = vadd.f32 %v3394_v60, %v3170_v42 }
 0x357   :  { %v7687_v19 = vpop.f32.mrf.mxu0  ;;  %v3396_v18 = vpop.f32.mrf.mxu1 }
 0x358   :  { %3545 = vst [vmem:[#allocation2 + $0x10] sm:$0xff] %v3395_v38 }
 0x359   :  { %v3266_v13 = vpop.f32.mrf.mxu0  ;;  %v3399_v50 = vpop.f32.mrf.mxu1 }
 0x35a   :  { %v3400_v5 = vadd.f32 %v3399_v50, %v3175_v21 }
 0x35b   :  { %v7690_v2 = vpop.f32.mrf.mxu0  ;;  %v3401_v28 = vpop.f32.mrf.mxu1 }
 0x35c   :  { %3546 = vst [vmem:[#allocation2 + $0x18] sm:$0xff] %v3400_v5  ;;  %v3270_v12 = vadd.f32 %v7676_v39, %v7690_v2 }
 0x35d   :  { %v3271_v59 = vpop.f32.mrf.mxu0  ;;  %v3404_v31 = vpop.f32.mrf.mxu1 }
 0x35e   :  { %v3405_v30 = vadd.f32 %v3404_v31, %v3180_v33 }
 0x35f   :  { %v7693_v53 = vpop.f32.mrf.mxu0  ;;  %v3406_v43 = vpop.f32.mrf.mxu1 }
 0x360   :  { %3547 = vst [vmem:[#allocation2 + $0x20] sm:$0xff] %v3405_v30 }
 0x361   :  { %v3276_v23 = vpop.f32.mrf.mxu0  ;;  %v3409_v26 = vpop.f32.mrf.mxu1 }
 0x362   :  { %v3410_v4 = vadd.f32 %v3409_v26, %v3185_v20  ;;  %v3230_v26 = vadd.f32 %v7676_v39, %v7665_v61  ;;  %v3245_v61 = vadd.f32 %v7676_v39, %v7671_v32  ;;  %v3260_v32 = vadd.f32 %v7676_v39, %v7684_v37 }
 0x363   :  { %v7696_v44 = vpop.f32.mrf.mxu0  ;;  %v3411_v51 = vpop.f32.mrf.mxu1  ;;  %v3275_v37 = vadd.f32 %v7676_v39, %v7693_v53 }
 0x364   :  { %3548 = vst [vmem:[#allocation2 + $0x28] sm:$0xff] %v3410_v4 }
 0x365   :  { %v3281_v29 = vpop.f32.mrf.mxu0  ;;  %v3414_v25 = vpop.f32.mrf.mxu1 }
 0x366   :  { %v3415_v6 = vadd.f32 %v3414_v25, %v3190_v34  ;;  %v3235_v34 = vadd.f32 %v7676_v39, %v7667_v52  ;;  %v3250_v52 = vadd.f32 %v7676_v39, %v7678_v27  ;;  %v3265_v27 = vadd.f32 %v7676_v39, %v7687_v19 }
 0x367   :  { %v7700_v49 = vpop.f32.mrf.mxu0  ;;  %v3416_v1 = vpop.f32.mrf.mxu1  ;;  %v3280_v19 = vadd.f32 %v7676_v39, %v7696_v44 }
 0x368   :  { %3549 = vst [vmem:[#allocation2 + $0x30] sm:$0xff] %v3415_v6  ;;  %v3285_v2 = vadd.f32 %v7676_v39, %v7700_v49 }
 0x369   :  { %v3286_v0 = vpop.f32.mrf.mxu0  ;;  %v3419_v36 = vpop.f32.mrf.mxu1 }
 0x36a   :  { %v3420_v58 = vadd.f32 %v3419_v36, %v3195_v3 }
 0x36b   :  { %v7704_v22 = vpop.f32.mrf.mxu0  ;;  %v3421_v62 = vpop.f32.mrf.mxu1 }
 0x36c   :  { %3550 = vst [vmem:[#allocation2 + $0x38] sm:$0xff] %v3420_v58  ;;  %v3290_v53 = vadd.f32 %v7676_v39, %v7704_v22 }
 0x36d   :  { %v3291_v56 = vpop.f32.mrf.mxu0  ;;  %v3424_v47 = vpop.f32.mrf.mxu1 }
 0x36e   :  { %v3425_v57 = vadd.f32 %v3424_v47, %v3200_v17 }
 0x36f   :  { %v7708_v40 = vpop.f32.mrf.mxu0  ;;  %v3426_v45 = vpop.f32.mrf.mxu1 }
 0x370   :  { %3551 = vst [vmem:[#allocation2 + $0x40] sm:$0xff] %v3425_v57  ;;  %v3295_v44 = vadd.f32 %v7676_v39, %v7708_v40 }
 0x371   :  { %v3296_v54 = vpop.f32.mrf.mxu0  ;;  %v3429_v14 = vpop.f32.mrf.mxu1 }
 0x372   :  { %v3430_v11 = vadd.f32 %v3429_v14, %v3205_v8 }
 0x373   :  { %v7712_v15 = vpop.f32.mrf.mxu0  ;;  %v3431_v16 = vpop.f32.mrf.mxu1 }
 0x374   :  { %3552 = vst [vmem:[#allocation2 + $0x48] sm:$0xff] %v3430_v11  ;;  %v3300_v49 = vadd.f32 %v7676_v39, %v7712_v15 }
 0x375   :  { %v3301_v41 = vpop.f32.mrf.mxu0  ;;  %v3434_v63 = vpop.f32.mrf.mxu1 }
 0x376   :  { %v3435_v42 = vadd.f32 %v3434_v63, %v3210_v46 }
 0x377   :  { %v7716_v48 = vpop.f32.mrf.mxu0  ;;  %v3436_v60 = vpop.f32.mrf.mxu1 }
 0x378   :  { %3553 = vst [vmem:[#allocation2 + $0x50] sm:$0xff] %v3435_v42  ;;  %v3305_v22 = vadd.f32 %v7676_v39, %v7716_v48 }
 0x379   :  { %v3306_v38 = vpop.f32.mrf.mxu0  ;;  %v3439_v18 = vpop.f32.mrf.mxu1 }
 0x37a   :  { %v3440_v21 = vadd.f32 %v3439_v18, %v3215_v55 }
 0x37b   :  { %v7720_v13 = vpop.f32.mrf.mxu0  ;;  %v3441_v50 = vpop.f32.mrf.mxu1 }
 0x37c   :  { %3554 = vst [vmem:[#allocation2 + $0x58] sm:$0xff] %v3440_v21  ;;  %v3310_v40 = vadd.f32 %v7676_v39, %v7720_v13 }
 0x37d   :  { %v3311_v5 = vpop.f32.mrf.mxu0  ;;  %v3444_v28 = vpop.f32.mrf.mxu1 }
 0x37e   :  { %v3445_v33 = vadd.f32 %v3444_v28, %v3220_v9 }
 0x37f   :  { %v7724_v59 = vpop.f32.mrf.mxu0  ;;  %v3446_v31 = vpop.f32.mrf.mxu1 }
 0x380   :  { %3555 = vst [vmem:[#allocation2 + $0x60] sm:$0xff] %v3445_v33  ;;  %v3315_v15 = vadd.f32 %v7676_v39, %v7724_v59 }
 0x381   :  { %v3316_v30 = vpop.f32.mrf.mxu0  ;;  %v3449_v43 = vpop.f32.mrf.mxu1 }
 0x382   :  { %v3450_v20 = vadd.f32 %v3449_v43, %v3225_v35 }
 0x383   :  { %v3451_v23 = vpop.f32.mrf.mxu1 }
 0x384   :  { %3556 = vst [vmem:[#allocation2 + $0x68] sm:$0xff] %v3450_v20 }
 0x385   :  { %v3454_v7 = vpop.f32.mrf.mxu1 }
 0x386   :  { %v3455_v4 = vadd.f32 %v3454_v7, %v3230_v26 }
 0x387   :  { %v3456_v51 = vpop.f32.mrf.mxu1 }
 0x388   :  { %3557 = vst [vmem:[#allocation2 + $0x70] sm:$0xff] %v3455_v4 }
 0x389   :  { %v3459_v29 = vpop.f32.mrf.mxu1 }
 0x38a   :  { %v3460_v25 = vadd.f32 %v3459_v29, %v3235_v34 }
 0x38b   :  { %v3461_v6 = vpop.f32.mrf.mxu1 }
 0x38c   :  { %3558 = vst [vmem:[#allocation2 + $0x78] sm:$0xff] %v3460_v25 }
 0x38d   :  { %v3464_v1 = vpop.f32.mrf.mxu1 }
 0x38e   :  { %v3465_v3 = vadd.f32 %v3464_v1, %v3240_v10 }
 0x38f   :  { %v3466_v0 = vpop.f32.mrf.mxu1 }
 0x390   :  { %3559 = vst [vmem:[#allocation2 + $0x80] sm:$0xff] %v3465_v3 }
 0x391   :  { %v3469_v36 = vpop.f32.mrf.mxu1 }
 0x392   :  { %v3470_v58 = vadd.f32 %v3469_v36, %v3245_v61 }
 0x393   :  { %v3471_v62 = vpop.f32.mrf.mxu1 }
 0x394   :  { %3560 = vst [vmem:[#allocation2 + $0x88] sm:$0xff] %v3470_v58 }
 0x395   :  { %v3474_v17 = vpop.f32.mrf.mxu1 }
 0x396   :  { %v3475_v56 = vadd.f32 %v3474_v17, %v3250_v52 }
 0x397   :  { %v3476_v47 = vpop.f32.mrf.mxu1 }
 0x398   :  { %3561 = vst [vmem:[#allocation2 + $0x90] sm:$0xff] %v3475_v56 }
 0x399   :  { %v3479_v57 = vpop.f32.mrf.mxu1 }
 0x39a   :  { %v3480_v45 = vadd.f32 %v3479_v57, %v3255_v24 }
 0x39b   :  { %v3481_v8 = vpop.f32.mrf.mxu1 }
 0x39c   :  { %3562 = vst [vmem:[#allocation2 + $0x98] sm:$0xff] %v3480_v45 }
 0x39d   :  { %v3484_v54 = vpop.f32.mrf.mxu1 }
 0x39e   :  { %v3485_v14 = vadd.f32 %v3484_v54, %v3260_v32 }
 0x39f   :  { %v3486_v11 = vpop.f32.mrf.mxu1 }
 0x3a0   :  { %3563 = vst [vmem:[#allocation2 + $0xa0] sm:$0xff] %v3485_v14 }
 0x3a1   :  { %v3489_v16 = vpop.f32.mrf.mxu1 }
 0x3a2   :  { %v3490_v46 = vadd.f32 %v3489_v16, %v3265_v27 }
 0x3a3   :  { %v3491_v41 = vpop.f32.mrf.mxu1 }
 0x3a4   :  { %3564 = vst [vmem:[#allocation2 + $0xa8] sm:$0xff] %v3490_v46 }
 0x3a5   :  { %v3494_v63 = vpop.f32.mrf.mxu1 }
 0x3a6   :  { %v3495_v42 = vadd.f32 %v3494_v63, %v3270_v12 }
 0x3a7   :  { %v3496_v60 = vpop.f32.mrf.mxu1 }
 0x3a8   :  { %3565 = vst [vmem:[#allocation2 + $0xb0] sm:$0xff] %v3495_v42 }
 0x3a9   :  { %v3499_v55 = vpop.f32.mrf.mxu1 }
 0x3aa   :  { %v3500_v38 = vadd.f32 %v3499_v55, %v3275_v37 }
 0x3ab   :  { %v3501_v18 = vpop.f32.mrf.mxu1 }
 0x3ac   :  { %3566 = vst [vmem:[#allocation2 + $0xb8] sm:$0xff] %v3500_v38 }
 0x3ad   :  { %v3504_v21 = vpop.f32.mrf.mxu1 }
 0x3ae   :  { %v3505_v50 = vadd.f32 %v3504_v21, %v3280_v19 }
 0x3af   :  { %v3506_v9 = vpop.f32.mrf.mxu1 }
 0x3b0   :  { %3567 = vst [vmem:[#allocation2 + $0xc0] sm:$0xff] %v3505_v50 }
 0x3b1   :  { %v3509_v5 = vpop.f32.mrf.mxu1 }
 0x3b2   :  { %v3510_v28 = vadd.f32 %v3509_v5, %v3285_v2 }
 0x3b3   :  { %v3511_v33 = vpop.f32.mrf.mxu1 }
 0x3b4   :  { %3568 = vst [vmem:[#allocation2 + $0xc8] sm:$0xff] %v3510_v28 }
 0x3b5   :  { %v3514_v31 = vpop.f32.mrf.mxu1 }
 0x3b6   :  { %v3515_v35 = vadd.f32 %v3514_v31, %v3290_v53 }
 0x3b7   :  { %v3516_v30 = vpop.f32.mrf.mxu1 }
 0x3b8   :  { %3569 = vst [vmem:[#allocation2 + $0xd0] sm:$0xff] %v3515_v35 }
 0x3b9   :  { %v3519_v43 = vpop.f32.mrf.mxu1 }
 0x3ba   :  { %v3520_v20 = vadd.f32 %v3519_v43, %v3295_v44 }
 0x3bb   :  { %v3521_v23 = vpop.f32.mrf.mxu1 }
 0x3bc   :  { %3570 = vst [vmem:[#allocation2 + $0xd8] sm:$0xff] %v3520_v20 }
 0x3bd   :  { %v3524_v26 = vpop.f32.mrf.mxu1 }
 0x3be   :  { %v3525_v7 = vadd.f32 %v3524_v26, %v3300_v49 }
 0x3bf   :  { %v3526_v4 = vpop.f32.mrf.mxu1 }
 0x3c0   :  { %3571 = vst [vmem:[#allocation2 + $0xe0] sm:$0xff] %v3525_v7 }
 0x3c1   :  { %v3529_v51 = vpop.f32.mrf.mxu1 }
 0x3c2   :  { %v3530_v34 = vadd.f32 %v3529_v51, %v3305_v22 }
 0x3c3   :  { %v3531_v29 = vpop.f32.mrf.mxu1 }
 0x3c4   :  { %3572 = vst [vmem:[#allocation2 + $0xe8] sm:$0xff] %v3530_v34 }
 0x3c5   :  { %v3534_v25 = vpop.f32.mrf.mxu1 }
 0x3c6   :  { %v3535_v6 = vadd.f32 %v3534_v25, %v3310_v40 }
 0x3c7   :  { %v3536_v10 = vpop.f32.mrf.mxu1 }
 0x3c8   :  { %3573 = vst [vmem:[#allocation2 + $0xf0] sm:$0xff] %v3535_v6 }
 0x3c9   :  { %v3539_v1 = vpop.f32.mrf.mxu1 }
 0x3ca   :  { %v3540_v3 = vadd.f32 %v3539_v1, %v3315_v15 }
 0x3cb   :  { %v3541_v48 = vpop.f32.mrf.mxu1 }
 0x3cc   :  { %3574 = vst [vmem:[#allocation2 + $0xf8] sm:$0xff] %v3540_v3 }
 0x3cd   :  { %3928 = shalt.err (!%p3925_p4)
}
 0x3ce   :  { %s3941_s7 = smov 128   ;;  %s3942_s8 = smov 8  }
 0x3cf   :  { %3586 = dma.vmem_to_hbm [thread:$0]  %s3581_s30, 4096, %s7772_s5, [#allocation3], %s3941_s7, %s3941_s7, %s3942_s8  }
 0x3d0   :  { %3937 = dma.done.wait [#allocation3], 4096  }
 0x3d1   :  { %3938 = vsyncadd [#allocation3], 4294963200 }
 0x3d2   :  { %3590 = vsyncpa [#allocation3], 1 }

</bundles_post_ra>
